<compile_context>
chip_gen: v5e
topology: v5e:2x2
jax: 0.10.0
libtpu: 0.0.40
codegen_flags: <defaults>
</compile_context>

<pallas_src>
import functools

import jax
import jax.numpy as jnp
from jax.experimental import pallas as pl
from jax.experimental.pallas import tpu as pltpu


# ----------------------------------------------------------------------------
# Pallas matmul kernel:  out = act(A @ B + bias)
#   A:(M,K) bf16, B:(K,N) bf16, bias:(1,N) f32  ->  out:(M,N) f32
#   K and N are single full-extent blocks (exempt from the (8,128) rule), so no
#   zero-padding of the contraction / output-channel dims is ever materialized.
# ----------------------------------------------------------------------------
def _mm_bias_act_kernel(a_ref, b_ref, bias_ref, o_ref, *, act):
    r = jnp.dot(a_ref[...], b_ref[...], preferred_element_type=jnp.float32)
    r = r + bias_ref[...]                       # (tm,N) + (1,N) broadcast, f32 epilogue
    if act == "lrelu":
        r = jnp.where(r > 0, r, 0.01 * r)       # nn.LeakyReLU default slope
    elif act == "tanh":
        r = jnp.tanh(r)
    o_ref[...] = r.astype(o_ref.dtype)


def _ceil_to(x, m):
    return ((x + m - 1) // m) * m


def pallas_matmul(a, b, bias, act="none"):
    """a:(M,K), b:(K,N), bias:(N,) -> (M,N) f32. bf16 MXU operands, f32 accumulate."""
    M, K = a.shape
    K2, N = b.shape
    assert K == K2
    a = a.astype(jnp.bfloat16)
    b = b.astype(jnp.bfloat16)
    bias2 = bias.astype(jnp.float32).reshape(1, N)

    # Only M is (cheaply) padded: to a multiple of 8 for small M (one full-extent
    # block), or to a multiple of 256 for large M so there are >=2 parallel grid
    # steps for the two v7x TensorCores.
    if M > 512:
        tm = 256
        Mp = _ceil_to(M, tm)
    else:
        Mp = _ceil_to(M, 8)
        tm = Mp
    if Mp != M:
        a = jnp.pad(a, ((0, Mp - M), (0, 0)))

    kernel = functools.partial(_mm_bias_act_kernel, act=act)
    out = pl.pallas_call(
        kernel,
        out_shape=jax.ShapeDtypeStruct((Mp, N), jnp.float32),
        grid_spec=pltpu.PrefetchScalarGridSpec(
            num_scalar_prefetch=0,
            grid=(Mp // tm,),
            in_specs=[
                pl.BlockSpec((tm, K), lambda i: (i, 0)),   # A tile, full K
                pl.BlockSpec((K, N), lambda i: (0, 0)),    # full B
                pl.BlockSpec((1, N), lambda i: (0, 0)),    # bias
            ],
            out_specs=pl.BlockSpec((tm, N), lambda i: (i, 0)),
        ),
        compiler_params=pltpu.CompilerParams(
            dimension_semantics=("parallel",)),
    )(a, b, bias2)
    if Mp != M:
        out = out[:M]
    return out


# ----------------------------------------------------------------------------
# Conv3d = im2col (plain-JAX glue, bf16) + Pallas matmul (hot path)
# ----------------------------------------------------------------------------
def conv3d(w, b, x, stride=1, padding=1, act="none"):
    """x: (N,D,H,W,Cin); w: (kd,kh,kw,Cin,Cout); b: (Cout,) -> (N,Do,Ho,Wo,Cout) f32."""
    kd, kh, kw, cin, cout = w.shape
    n, D, H, W, _ = x.shape
    # TODO(synk): fold the im2col gather into the Pallas kernel (tap-indexed A-operand
    #             index_map) to avoid materializing the k^3-inflated column matrix in HBM.
    xb = x.astype(jnp.bfloat16)                 # halve im2col HBM traffic
    if padding:
        xb = jnp.pad(xb, ((0, 0), (padding, padding), (padding, padding),
                          (padding, padding), (0, 0)))
    Do = (D + 2 * padding - kd) // stride + 1
    Ho = (H + 2 * padding - kh) // stride + 1
    Wo = (W + 2 * padding - kw) // stride + 1

    if kd == kh == kw == 1 and stride == 1:
        a = xb.reshape(n * Do * Ho * Wo, cin)
    else:
        cols = []
        for dz in range(kd):
            for dy in range(kh):
                for dx in range(kw):
                    cols.append(xb[:, dz:dz + (Do - 1) * stride + 1:stride,
                                      dy:dy + (Ho - 1) * stride + 1:stride,
                                      dx:dx + (Wo - 1) * stride + 1:stride, :])
        col = jnp.concatenate(cols, axis=-1)                  # (N,Do,Ho,Wo,k^3*Cin)
        a = col.reshape(n * Do * Ho * Wo, kd * kh * kw * cin)
    wm = w.reshape(kd * kh * kw * cin, cout)
    out = pallas_matmul(a, wm, b, act=act)
    return out.reshape(n, Do, Ho, Wo, cout)


def upsample2x(x):
    """Nearest-neighbor x2 via a single broadcast (no repeat chain)."""
    n, d, h, w, c = x.shape
    x = x[:, :, None, :, None, :, None, :]
    x = jnp.broadcast_to(x, (n, d, 2, h, 2, w, 2, c))
    return x.reshape(n, 2 * d, 2 * h, 2 * w, c)


# ----------------------------------------------------------------------------
# Parameter init (trunc_normal std=0.02, bias=0), mimicking Seq2Seq3d.init()
# ----------------------------------------------------------------------------
def _tn(key, shape, std=0.02):
    return std * jax.random.truncated_normal(key, -2.0, 2.0, shape, jnp.float32)


def init_params(key, cin=1, c1=8, c2=16, zdim=8, n_dom=4):
    ks = jax.random.split(key, 16)
    enc = {
        "enc1_w": _tn(ks[0], (3, 3, 3, cin, c1)), "enc1_b": jnp.zeros((c1,)),
        "enc2_w": _tn(ks[1], (3, 3, 3, c1, c2)),  "enc2_b": jnp.zeros((c2,)),
        "lat_w":  _tn(ks[2], (1, 1, 1, c2, zdim)), "lat_b": jnp.zeros((zdim,)),
        "film_all_w": _tn(ks[3], (n_dom, 2 * zdim)), "film_all_b": jnp.zeros((2 * zdim,)),
        "film_sub_w": _tn(ks[4], (n_dom, 2 * zdim)), "film_sub_b": jnp.zeros((2 * zdim,)),
        "seg_all_w": _tn(ks[5], (1, 1, 1, c2, zdim)), "seg_all_b": jnp.zeros((zdim,)),
        "seg_sub_w": _tn(ks[6], (1, 1, 1, c2, zdim)), "seg_sub_b": jnp.zeros((zdim,)),
    }
    dec = {
        "film_w": _tn(ks[7], (n_dom, 2 * zdim)), "film_b": jnp.zeros((2 * zdim,)),
        "dec0_w": _tn(ks[8], (3, 3, 3, zdim, c2)), "dec0_b": jnp.zeros((c2,)),
        "head0_w": _tn(ks[9], (3, 3, 3, c2, 1)),   "head0_b": jnp.zeros((1,)),
        "up1_w":  _tn(ks[10], (3, 3, 3, c2, c1)),  "up1_b": jnp.zeros((c1,)),
        "head1_w": _tn(ks[11], (3, 3, 3, c1, 1)),  "head1_b": jnp.zeros((1,)),
        "up2_w":  _tn(ks[12], (3, 3, 3, c1, c1)),  "up2_b": jnp.zeros((c1,)),
        "head2_w": _tn(ks[13], (3, 3, 3, c1, 1)),  "head2_b": jnp.zeros((1,)),
        "fusion_w": _tn(ks[14], (1, 1, 1, zdim, 1)), "fusion_b": jnp.zeros((1,)),
    }
    return {"enc": enc, "dec": dec}


# ----------------------------------------------------------------------------
# Sub-networks (simplified but structurally faithful)
# ----------------------------------------------------------------------------
def image_encoder(p, x, d_all, d_sub):
    h1 = conv3d(p["enc1_w"], p["enc1_b"], x, stride=2, padding=1, act="lrelu")
    h2 = conv3d(p["enc2_w"], p["enc2_b"], h1, stride=2, padding=1, act="lrelu")

    # One fused 1x1x1 projection: latent + seg_all + seg_sub  (single call, N = 3*zdim).
    zdim = p["lat_w"].shape[-1]
    proj_w = jnp.concatenate([p["lat_w"], p["seg_all_w"], p["seg_sub_w"]], axis=-1)
    proj_b = jnp.concatenate([p["lat_b"], p["seg_all_b"], p["seg_sub_b"]], axis=-1)
    proj = conv3d(proj_w, proj_b, h2, stride=1, padding=0, act="none")
    zb = proj[..., :zdim]
    z_all_seg = proj[..., zdim:2 * zdim]
    z_sub_seg = proj[..., 2 * zdim:]

    # Both FiLM linears as ONE block-diagonal Pallas matmul.
    zeros = jnp.zeros_like(p["film_all_w"])
    film_w = jnp.concatenate(
        [jnp.concatenate([p["film_all_w"], zeros], axis=-1),
         jnp.concatenate([zeros, p["film_sub_w"]], axis=-1)], axis=0)
    film_b = jnp.concatenate([p["film_all_b"], p["film_sub_b"]], axis=-1)
    f = pallas_matmul(jnp.concatenate([d_all, d_sub], axis=-1), film_w, film_b)
    f_all, f_sub = jnp.split(f, 2, axis=-1)

    def film(f):
        g, b = jnp.split(f, 2, axis=-1)
        return zb * (1.0 + g[:, None, None, None, :]) + b[:, None, None, None, :]

    z_all = film(f_all)
    z_sub = film(f_sub)
    # commitment-style surrogate for the VQ loss (scalar)
    vq_loss = jnp.mean(z_all ** 2) + jnp.mean(z_sub ** 2)
    return [z_all], [z_sub], z_all_seg, z_sub_seg, vq_loss


def hyper_decoder_batched(p, z, domain_tgt, latent_focal=None):
    """z: (B, Dq, Hq, Wq, zdim) -- both latent streams stacked along batch so every
    conv layer runs as a single pallas_call with 2x M."""
    del latent_focal  # TODO(synk): see header note
    film = pallas_matmul(domain_tgt, p["film_w"], p["film_b"])
    g, b = jnp.split(film, 2, axis=-1)
    zmod = z * (1.0 + g[:, None, None, None, :]) + b[:, None, None, None, :]

    h = conv3d(p["dec0_w"], p["dec0_b"], zmod, 1, 1, "lrelu")
    o0 = conv3d(p["head0_w"], p["head0_b"], h, 1, 1, "none")
    h = upsample2x(h)
    h = conv3d(p["up1_w"], p["up1_b"], h, 1, 1, "lrelu")
    o1 = conv3d(p["head1_w"], p["head1_b"], h, 1, 1, "none")
    h = upsample2x(h)
    h = conv3d(p["up2_w"], p["up2_b"], h, 1, 1, "lrelu")
    o2 = conv3d(p["head2_w"], p["head2_b"], h, 1, 1, "none")

    fusion = conv3d(p["fusion_w"], p["fusion_b"], z, 1, 0, "none")  # image_fusion(z[-1])
    return [o0, o1, o2], fusion


def seq2seq3d_forward(params, x_src, d_all, d_sub, d_tgt,
                      with_latent=False, latent_focal=None):
    z_all, z_sub, z_all_seg, z_sub_seg, vq_loss = image_encoder(
        params["enc"], x_src, d_all, d_sub)
    n = x_src.shape[0]
    # Run the two hyper_decoder passes as one batched pass (decoder is per-sample,
    # so splitting afterwards is exactly equivalent).
    z_cat = jnp.concatenate([z_all[-1], z_sub[-1]], axis=0)
    d_cat = jnp.concatenate([d_tgt, d_tgt], axis=0)
    outs_cat, fusion_cat = hyper_decoder_batched(params["dec"], z_cat, d_cat, latent_focal)
    outputs_all = [o[:n] for o in outs_cat]
    outputs_sub = [o[n:] for o in outs_cat]
    fusion_all, fusion_sub = fusion_cat[:n], fusion_cat[n:]
    if with_latent:
        return (outputs_all, outputs_sub, z_all, z_sub,
                z_all_seg, z_sub_seg, vq_loss, fusion_all, fusion_sub)
    return (outputs_all, outputs_sub, fusion_all, fusion_sub)


# ----------------------------------------------------------------------------
if __name__ == "__main__":
    key = jax.random.PRNGKey(0)
    k_p, k_x = jax.random.split(key)

    N, Cin, D, H, W = 2, 1, 8, 8, 8
    n_dom = 4

    params = init_params(k_p, cin=Cin, c1=8, c2=16, zdim=8, n_dom=n_dom)

    # PyTorch-style NCDHW input, transposed to the kernel's NDHWC layout.
    x_nc = jax.random.normal(k_x, (N, Cin, D, H, W), jnp.float32)
    x_src = jnp.transpose(x_nc, (0, 2, 3, 4, 1))              # (N,D,H,W,C)

    eye = jnp.eye(n_dom, dtype=jnp.float32)
    domain_src_all = eye[jnp.array([0, 1])]                   # (N, n_dom) one-hot
    domain_src_subgroup = eye[jnp.array([1, 2])]
    domain_tgt = eye[jnp.array([3, 0])]

    fwd = jax.jit(functools.partial(seq2seq3d_forward, with_latent=False))
    out = fwd(params, x_src, domain_src_all, domain_src_subgroup, domain_tgt)
    out = jax.tree_util.tree_map(lambda a: jax.block_until_ready(a), out)

    outputs_all, outputs_subgroup, fusion_all, fusion_subgroup = out
    assert len(outputs_all) == 3 and len(outputs_subgroup) == 3
    assert outputs_all[-1].shape == (N, D, H, W, 1)
    assert outputs_subgroup[-1].shape == (N, D, H, W, 1)
    assert fusion_all.shape == (N, D // 4, H // 4, W // 4, 1)
    assert fusion_subgroup.shape == (N, D // 4, H // 4, W // 4, 1)
    print("KERNEL_OK")
</pallas_src>

<mosaic_0001>
module attributes {stable_mosaic.version = 11 : i64} {
  func.func @_mm_bias_act_kernel(%arg0: i32, %arg1: memref<128x27xbf16, #tpu.memory_space<vmem>>, %arg2: memref<27x8xbf16, #tpu.memory_space<vmem>>, %arg3: memref<1x8xf32, #tpu.memory_space<vmem>>, %arg4: memref<128x8xf32, #tpu.memory_space<vmem>>) attributes {dimension_semantics = [#tpu.dimension_semantics<parallel>], iteration_bounds = array<i64: 1>, scalar_prefetch = 0 : i64, scratch_operands = 0 : i64, tpu.core_type = #tpu.core_type<tc>, window_params = [{transform_indices = @transform_0, window_bounds = array<i64: 128, 27>}, {pipeline_mode = #tpu.pipeline_mode<synchronous>, transform_indices = @transform_1, window_bounds = array<i64: 27, 8>}, {pipeline_mode = #tpu.pipeline_mode<synchronous>, transform_indices = @transform_2, window_bounds = array<i64: 1, 8>}, {transform_indices = @transform_3, window_bounds = array<i64: 128, 8>}]} {
    %c0 = arith.constant 0 : index
    %c0_0 = arith.constant 0 : index
    %0 = vector.load %arg1[%c0, %c0_0] : memref<128x27xbf16, #tpu.memory_space<vmem>>, vector<128x27xbf16>
    %c0_1 = arith.constant 0 : index
    %c0_2 = arith.constant 0 : index
    %1 = vector.load %arg2[%c0_1, %c0_2] : memref<27x8xbf16, #tpu.memory_space<vmem>>, vector<27x8xbf16>
    %cst = arith.constant dense<0.000000e+00> : vector<128x8xf32>
    %2 = tpu.matmul %0, %1, %cst {dimension_numbers = #tpu.dot_dimension_numbers<[1], [0], [0], [1], [0, 0, 1, 1], [], []>} : vector<128x27xbf16>, vector<27x8xbf16>, vector<128x8xf32> -> vector<128x8xf32>
    %c0_3 = arith.constant 0 : index
    %c0_4 = arith.constant 0 : index
    %3 = vector.load %arg3[%c0_3, %c0_4] : memref<1x8xf32, #tpu.memory_space<vmem>>, vector<1x8xf32>
    %4 = vector.broadcast %3 : vector<1x8xf32> to vector<128x8xf32>
    %5 = arith.addf %2, %4 : vector<128x8xf32>
    %cst_5 = arith.constant 0.000000e+00 : f32
    %6 = vector.broadcast %cst_5 : f32 to vector<128x8xf32>
    %7 = arith.cmpf ogt, %5, %6 : vector<128x8xf32>
    %cst_6 = arith.constant 0.00999999977 : f32
    %8 = vector.broadcast %cst_6 : f32 to vector<128x8xf32>
    %9 = arith.mulf %8, %5 : vector<128x8xf32>
    %10 = arith.select %7, %5, %9 : vector<128x8xi1>, vector<128x8xf32>
    %c0_7 = arith.constant 0 : index
    %c0_8 = arith.constant 0 : index
    %11 = vector.load %arg4[%c0_7, %c0_8] : memref<128x8xf32, #tpu.memory_space<vmem>>, vector<128x8xf32>
    tpu.vector_store %arg4[%c0_7, %c0_8], %10 {strides = array<i32>} : memref<128x8xf32, #tpu.memory_space<vmem>>, vector<128x8xf32>,
    return
  }
  func.func @transform_0(%arg0: i32) -> (i32, i32) {
    %c0_i32 = arith.constant 0 : i32
    %c0_i32_0 = arith.constant 0 : i32
    return %arg0, %c0_i32 : i32, i32
  }
  func.func @transform_1(%arg0: i32) -> (i32, i32) {
    %c0_i32 = arith.constant 0 : i32
    %c0_i32_0 = arith.constant 0 : i32
    %c0_i32_1 = arith.constant 0 : i32
    return %c0_i32, %c0_i32_0 : i32, i32
  }
  func.func @transform_2(%arg0: i32) -> (i32, i32) {
    %c0_i32 = arith.constant 0 : i32
    %c0_i32_0 = arith.constant 0 : i32
    %c0_i32_1 = arith.constant 0 : i32
    return %c0_i32, %c0_i32_0 : i32, i32
  }
  func.func @transform_3(%arg0: i32) -> (i32, i32) {
    %c0_i32 = arith.constant 0 : i32
    %c0_i32_0 = arith.constant 0 : i32
    return %arg0, %c0_i32 : i32, i32
  }
}

module attributes {stable_mosaic.version = 11 : i64} {
  func.func @_mm_bias_act_kernel(%arg0: i32, %arg1: memref<16x216xbf16, #tpu.memory_space<vmem>>, %arg2: memref<216x16xbf16, #tpu.memory_space<vmem>>, %arg3: memref<1x16xf32, #tpu.memory_space<vmem>>, %arg4: memref<16x16xf32, #tpu.memory_space<vmem>>) attributes {dimension_semantics = [#tpu.dimension_semantics<parallel>], iteration_bounds = array<i64: 1>, scalar_prefetch = 0 : i64, scratch_operands = 0 : i64, tpu.core_type = #tpu.core_type<tc>, window_params = [{transform_indices = @transform_0, window_bounds = array<i64: 16, 216>}, {pipeline_mode = #tpu.pipeline_mode<synchronous>, transform_indices = @transform_1, window_bounds = array<i64: 216, 16>}, {pipeline_mode = #tpu.pipeline_mode<synchronous>, transform_indices = @transform_2, window_bounds = array<i64: 1, 16>}, {transform_indices = @transform_3, window_bounds = array<i64: 16, 16>}]} {
    %c0 = arith.constant 0 : index
    %c0_0 = arith.constant 0 : index
    %0 = vector.load %arg1[%c0, %c0_0] : memref<16x216xbf16, #tpu.memory_space<vmem>>, vector<16x216xbf16>
    %c0_1 = arith.constant 0 : index
    %c0_2 = arith.constant 0 : index
    %1 = vector.load %arg2[%c0_1, %c0_2] : memref<216x16xbf16, #tpu.memory_space<vmem>>, vector<216x16xbf16>
    %cst = arith.constant dense<0.000000e+00> : vector<16x16xf32>
    %2 = tpu.matmul %0, %1, %cst {dimension_numbers = #tpu.dot_dimension_numbers<[1], [0], [0], [1], [0, 0, 1, 1], [], []>} : vector<16x216xbf16>, vector<216x16xbf16>, vector<16x16xf32> -> vector<16x16xf32>
    %c0_3 = arith.constant 0 : index
    %c0_4 = arith.constant 0 : index
    %3 = vector.load %arg3[%c0_3, %c0_4] : memref<1x16xf32, #tpu.memory_space<vmem>>, vector<1x16xf32>
    %4 = vector.broadcast %3 : vector<1x16xf32> to vector<16x16xf32>
    %5 = arith.addf %2, %4 : vector<16x16xf32>
    %cst_5 = arith.constant 0.000000e+00 : f32
    %6 = vector.broadcast %cst_5 : f32 to vector<16x16xf32>
    %7 = arith.cmpf ogt, %5, %6 : vector<16x16xf32>
    %cst_6 = arith.constant 0.00999999977 : f32
    %8 = vector.broadcast %cst_6 : f32 to vector<16x16xf32>
    %9 = arith.mulf %8, %5 : vector<16x16xf32>
    %10 = arith.select %7, %5, %9 : vector<16x16xi1>, vector<16x16xf32>
    %c0_7 = arith.constant 0 : index
    %c0_8 = arith.constant 0 : index
    %11 = vector.load %arg4[%c0_7, %c0_8] : memref<16x16xf32, #tpu.memory_space<vmem>>, vector<16x16xf32>
    tpu.vector_store %arg4[%c0_7, %c0_8], %10 {strides = array<i32>} : memref<16x16xf32, #tpu.memory_space<vmem>>, vector<16x16xf32>,
    return
  }
  func.func @transform_0(%arg0: i32) -> (i32, i32) {
    %c0_i32 = arith.constant 0 : i32
    %c0_i32_0 = arith.constant 0 : i32
    return %arg0, %c0_i32 : i32, i32
  }
  func.func @transform_1(%arg0: i32) -> (i32, i32) {
    %c0_i32 = arith.constant 0 : i32
    %c0_i32_0 = arith.constant 0 : i32
    %c0_i32_1 = arith.constant 0 : i32
    return %c0_i32, %c0_i32_0 : i32, i32
  }
  func.func @transform_2(%arg0: i32) -> (i32, i32) {
    %c0_i32 = arith.constant 0 : i32
    %c0_i32_0 = arith.constant 0 : i32
    %c0_i32_1 = arith.constant 0 : i32
    return %c0_i32, %c0_i32_0 : i32, i32
  }
  func.func @transform_3(%arg0: i32) -> (i32, i32) {
    %c0_i32 = arith.constant 0 : i32
    %c0_i32_0 = arith.constant 0 : i32
    return %arg0, %c0_i32 : i32, i32
  }
}

module attributes {stable_mosaic.version = 11 : i64} {
  func.func @_mm_bias_act_kernel(%arg0: i32, %arg1: memref<16x16xbf16, #tpu.memory_space<vmem>>, %arg2: memref<16x24xbf16, #tpu.memory_space<vmem>>, %arg3: memref<1x24xf32, #tpu.memory_space<vmem>>, %arg4: memref<16x24xf32, #tpu.memory_space<vmem>>) attributes {dimension_semantics = [#tpu.dimension_semantics<parallel>], iteration_bounds = array<i64: 1>, scalar_prefetch = 0 : i64, scratch_operands = 0 : i64, tpu.core_type = #tpu.core_type<tc>, window_params = [{transform_indices = @transform_0, window_bounds = array<i64: 16, 16>}, {pipeline_mode = #tpu.pipeline_mode<synchronous>, transform_indices = @transform_1, window_bounds = array<i64: 16, 24>}, {pipeline_mode = #tpu.pipeline_mode<synchronous>, transform_indices = @transform_2, window_bounds = array<i64: 1, 24>}, {transform_indices = @transform_3, window_bounds = array<i64: 16, 24>}]} {
    %c0 = arith.constant 0 : index
    %c0_0 = arith.constant 0 : index
    %0 = vector.load %arg1[%c0, %c0_0] : memref<16x16xbf16, #tpu.memory_space<vmem>>, vector<16x16xbf16>
    %c0_1 = arith.constant 0 : index
    %c0_2 = arith.constant 0 : index
    %1 = vector.load %arg2[%c0_1, %c0_2] : memref<16x24xbf16, #tpu.memory_space<vmem>>, vector<16x24xbf16>
    %cst = arith.constant dense<0.000000e+00> : vector<16x24xf32>
    %2 = tpu.matmul %0, %1, %cst {dimension_numbers = #tpu.dot_dimension_numbers<[1], [0], [0], [1], [0, 0, 1, 1], [], []>} : vector<16x16xbf16>, vector<16x24xbf16>, vector<16x24xf32> -> vector<16x24xf32>
    %c0_3 = arith.constant 0 : index
    %c0_4 = arith.constant 0 : index
    %3 = vector.load %arg3[%c0_3, %c0_4] : memref<1x24xf32, #tpu.memory_space<vmem>>, vector<1x24xf32>
    %4 = vector.broadcast %3 : vector<1x24xf32> to vector<16x24xf32>
    %5 = arith.addf %2, %4 : vector<16x24xf32>
    %c0_5 = arith.constant 0 : index
    %c0_6 = arith.constant 0 : index
    %6 = vector.load %arg4[%c0_5, %c0_6] : memref<16x24xf32, #tpu.memory_space<vmem>>, vector<16x24xf32>
    tpu.vector_store %arg4[%c0_5, %c0_6], %5 {strides = array<i32>} : memref<16x24xf32, #tpu.memory_space<vmem>>, vector<16x24xf32>,
    return
  }
  func.func @transform_0(%arg0: i32) -> (i32, i32) {
    %c0_i32 = arith.constant 0 : i32
    %c0_i32_0 = arith.constant 0 : i32
    return %arg0, %c0_i32 : i32, i32
  }
  func.func @transform_1(%arg0: i32) -> (i32, i32) {
    %c0_i32 = arith.constant 0 : i32
    %c0_i32_0 = arith.constant 0 : i32
    %c0_i32_1 = arith.constant 0 : i32
    return %c0_i32, %c0_i32_0 : i32, i32
  }
  func.func @transform_2(%arg0: i32) -> (i32, i32) {
    %c0_i32 = arith.constant 0 : i32
    %c0_i32_0 = arith.constant 0 : i32
    %c0_i32_1 = arith.constant 0 : i32
    return %c0_i32, %c0_i32_0 : i32, i32
  }
  func.func @transform_3(%arg0: i32) -> (i32, i32) {
    %c0_i32 = arith.constant 0 : i32
    %c0_i32_0 = arith.constant 0 : i32
    return %arg0, %c0_i32 : i32, i32
  }
}

module attributes {stable_mosaic.version = 11 : i64} {
  func.func @_mm_bias_act_kernel(%arg0: i32, %arg1: memref<8x8xbf16, #tpu.memory_space<vmem>>, %arg2: memref<8x32xbf16, #tpu.memory_space<vmem>>, %arg3: memref<1x32xf32, #tpu.memory_space<vmem>>, %arg4: memref<8x32xf32, #tpu.memory_space<vmem>>) attributes {dimension_semantics = [#tpu.dimension_semantics<parallel>], iteration_bounds = array<i64: 1>, scalar_prefetch = 0 : i64, scratch_operands = 0 : i64, tpu.core_type = #tpu.core_type<tc>, window_params = [{transform_indices = @transform_0, window_bounds = array<i64: 8, 8>}, {pipeline_mode = #tpu.pipeline_mode<synchronous>, transform_indices = @transform_1, window_bounds = array<i64: 8, 32>}, {pipeline_mode = #tpu.pipeline_mode<synchronous>, transform_indices = @transform_2, window_bounds = array<i64: 1, 32>}, {transform_indices = @transform_3, window_bounds = array<i64: 8, 32>}]} {
    %c0 = arith.constant 0 : index
    %c0_0 = arith.constant 0 : index
    %0 = vector.load %arg1[%c0, %c0_0] : memref<8x8xbf16, #tpu.memory_space<vmem>>, vector<8x8xbf16>
    %c0_1 = arith.constant 0 : index
    %c0_2 = arith.constant 0 : index
    %1 = vector.load %arg2[%c0_1, %c0_2] : memref<8x32xbf16, #tpu.memory_space<vmem>>, vector<8x32xbf16>
    %cst = arith.constant dense<0.000000e+00> : vector<8x32xf32>
    %2 = tpu.matmul %0, %1, %cst {dimension_numbers = #tpu.dot_dimension_numbers<[1], [0], [0], [1], [0, 0, 1, 1], [], []>} : vector<8x8xbf16>, vector<8x32xbf16>, vector<8x32xf32> -> vector<8x32xf32>
    %c0_3 = arith.constant 0 : index
    %c0_4 = arith.constant 0 : index
    %3 = vector.load %arg3[%c0_3, %c0_4] : memref<1x32xf32, #tpu.memory_space<vmem>>, vector<1x32xf32>
    %4 = vector.broadcast %3 : vector<1x32xf32> to vector<8x32xf32>
    %5 = arith.addf %2, %4 : vector<8x32xf32>
    %c0_5 = arith.constant 0 : index
    %c0_6 = arith.constant 0 : index
    %6 = vector.load %arg4[%c0_5, %c0_6] : memref<8x32xf32, #tpu.memory_space<vmem>>, vector<8x32xf32>
    tpu.vector_store %arg4[%c0_5, %c0_6], %5 {strides = array<i32>} : memref<8x32xf32, #tpu.memory_space<vmem>>, vector<8x32xf32>,
    return
  }
  func.func @transform_0(%arg0: i32) -> (i32, i32) {
    %c0_i32 = arith.constant 0 : i32
    %c0_i32_0 = arith.constant 0 : i32
    return %arg0, %c0_i32 : i32, i32
  }
  func.func @transform_1(%arg0: i32) -> (i32, i32) {
    %c0_i32 = arith.constant 0 : i32
    %c0_i32_0 = arith.constant 0 : i32
    %c0_i32_1 = arith.constant 0 : i32
    return %c0_i32, %c0_i32_0 : i32, i32
  }
  func.func @transform_2(%arg0: i32) -> (i32, i32) {
    %c0_i32 = arith.constant 0 : i32
    %c0_i32_0 = arith.constant 0 : i32
    %c0_i32_1 = arith.constant 0 : i32
    return %c0_i32, %c0_i32_0 : i32, i32
  }
  func.func @transform_3(%arg0: i32) -> (i32, i32) {
    %c0_i32 = arith.constant 0 : i32
    %c0_i32_0 = arith.constant 0 : i32
    return %arg0, %c0_i32 : i32, i32
  }
}

module attributes {stable_mosaic.version = 11 : i64} {
  func.func @_mm_bias_act_kernel(%arg0: i32, %arg1: memref<8x4xbf16, #tpu.memory_space<vmem>>, %arg2: memref<4x16xbf16, #tpu.memory_space<vmem>>, %arg3: memref<1x16xf32, #tpu.memory_space<vmem>>, %arg4: memref<8x16xf32, #tpu.memory_space<vmem>>) attributes {dimension_semantics = [#tpu.dimension_semantics<parallel>], iteration_bounds = array<i64: 1>, scalar_prefetch = 0 : i64, scratch_operands = 0 : i64, tpu.core_type = #tpu.core_type<tc>, window_params = [{transform_indices = @transform_0, window_bounds = array<i64: 8, 4>}, {pipeline_mode = #tpu.pipeline_mode<synchronous>, transform_indices = @transform_1, window_bounds = array<i64: 4, 16>}, {pipeline_mode = #tpu.pipeline_mode<synchronous>, transform_indices = @transform_2, window_bounds = array<i64: 1, 16>}, {transform_indices = @transform_3, window_bounds = array<i64: 8, 16>}]} {
    %c0 = arith.constant 0 : index
    %c0_0 = arith.constant 0 : index
    %0 = vector.load %arg1[%c0, %c0_0] : memref<8x4xbf16, #tpu.memory_space<vmem>>, vector<8x4xbf16>
    %c0_1 = arith.constant 0 : index
    %c0_2 = arith.constant 0 : index
    %1 = vector.load %arg2[%c0_1, %c0_2] : memref<4x16xbf16, #tpu.memory_space<vmem>>, vector<4x16xbf16>
    %cst = arith.constant dense<0.000000e+00> : vector<8x16xf32>
    %2 = tpu.matmul %0, %1, %cst {dimension_numbers = #tpu.dot_dimension_numbers<[1], [0], [0], [1], [0, 0, 1, 1], [], []>} : vector<8x4xbf16>, vector<4x16xbf16>, vector<8x16xf32> -> vector<8x16xf32>
    %c0_3 = arith.constant 0 : index
    %c0_4 = arith.constant 0 : index
    %3 = vector.load %arg3[%c0_3, %c0_4] : memref<1x16xf32, #tpu.memory_space<vmem>>, vector<1x16xf32>
    %4 = vector.broadcast %3 : vector<1x16xf32> to vector<8x16xf32>
    %5 = arith.addf %2, %4 : vector<8x16xf32>
    %c0_5 = arith.constant 0 : index
    %c0_6 = arith.constant 0 : index
    %6 = vector.load %arg4[%c0_5, %c0_6] : memref<8x16xf32, #tpu.memory_space<vmem>>, vector<8x16xf32>
    tpu.vector_store %arg4[%c0_5, %c0_6], %5 {strides = array<i32>} : memref<8x16xf32, #tpu.memory_space<vmem>>, vector<8x16xf32>,
    return
  }
  func.func @transform_0(%arg0: i32) -> (i32, i32) {
    %c0_i32 = arith.constant 0 : i32
    %c0_i32_0 = arith.constant 0 : i32
    return %arg0, %c0_i32 : i32, i32
  }
  func.func @transform_1(%arg0: i32) -> (i32, i32) {
    %c0_i32 = arith.constant 0 : i32
    %c0_i32_0 = arith.constant 0 : i32
    %c0_i32_1 = arith.constant 0 : i32
    return %c0_i32, %c0_i32_0 : i32, i32
  }
  func.func @transform_2(%arg0: i32) -> (i32, i32) {
    %c0_i32 = arith.constant 0 : i32
    %c0_i32_0 = arith.constant 0 : i32
    %c0_i32_1 = arith.constant 0 : i32
    return %c0_i32, %c0_i32_0 : i32, i32
  }
  func.func @transform_3(%arg0: i32) -> (i32, i32) {
    %c0_i32 = arith.constant 0 : i32
    %c0_i32_0 = arith.constant 0 : i32
    return %arg0, %c0_i32 : i32, i32
  }
}

module attributes {stable_mosaic.version = 11 : i64} {
  func.func @_mm_bias_act_kernel(%arg0: i32, %arg1: memref<32x216xbf16, #tpu.memory_space<vmem>>, %arg2: memref<216x16xbf16, #tpu.memory_space<vmem>>, %arg3: memref<1x16xf32, #tpu.memory_space<vmem>>, %arg4: memref<32x16xf32, #tpu.memory_space<vmem>>) attributes {dimension_semantics = [#tpu.dimension_semantics<parallel>], iteration_bounds = array<i64: 1>, scalar_prefetch = 0 : i64, scratch_operands = 0 : i64, tpu.core_type = #tpu.core_type<tc>, window_params = [{transform_indices = @transform_0, window_bounds = array<i64: 32, 216>}, {pipeline_mode = #tpu.pipeline_mode<synchronous>, transform_indices = @transform_1, window_bounds = array<i64: 216, 16>}, {pipeline_mode = #tpu.pipeline_mode<synchronous>, transform_indices = @transform_2, window_bounds = array<i64: 1, 16>}, {transform_indices = @transform_3, window_bounds = array<i64: 32, 16>}]} {
    %c0 = arith.constant 0 : index
    %c0_0 = arith.constant 0 : index
    %0 = vector.load %arg1[%c0, %c0_0] : memref<32x216xbf16, #tpu.memory_space<vmem>>, vector<32x216xbf16>
    %c0_1 = arith.constant 0 : index
    %c0_2 = arith.constant 0 : index
    %1 = vector.load %arg2[%c0_1, %c0_2] : memref<216x16xbf16, #tpu.memory_space<vmem>>, vector<216x16xbf16>
    %cst = arith.constant dense<0.000000e+00> : vector<32x16xf32>
    %2 = tpu.matmul %0, %1, %cst {dimension_numbers = #tpu.dot_dimension_numbers<[1], [0], [0], [1], [0, 0, 1, 1], [], []>} : vector<32x216xbf16>, vector<216x16xbf16>, vector<32x16xf32> -> vector<32x16xf32>
    %c0_3 = arith.constant 0 : index
    %c0_4 = arith.constant 0 : index
    %3 = vector.load %arg3[%c0_3, %c0_4] : memref<1x16xf32, #tpu.memory_space<vmem>>, vector<1x16xf32>
    %4 = vector.broadcast %3 : vector<1x16xf32> to vector<32x16xf32>
    %5 = arith.addf %2, %4 : vector<32x16xf32>
    %cst_5 = arith.constant 0.000000e+00 : f32
    %6 = vector.broadcast %cst_5 : f32 to vector<32x16xf32>
    %7 = arith.cmpf ogt, %5, %6 : vector<32x16xf32>
    %cst_6 = arith.constant 0.00999999977 : f32
    %8 = vector.broadcast %cst_6 : f32 to vector<32x16xf32>
    %9 = arith.mulf %8, %5 : vector<32x16xf32>
    %10 = arith.select %7, %5, %9 : vector<32x16xi1>, vector<32x16xf32>
    %c0_7 = arith.constant 0 : index
    %c0_8 = arith.constant 0 : index
    %11 = vector.load %arg4[%c0_7, %c0_8] : memref<32x16xf32, #tpu.memory_space<vmem>>, vector<32x16xf32>
    tpu.vector_store %arg4[%c0_7, %c0_8], %10 {strides = array<i32>} : memref<32x16xf32, #tpu.memory_space<vmem>>, vector<32x16xf32>,
    return
  }
  func.func @transform_0(%arg0: i32) -> (i32, i32) {
    %c0_i32 = arith.constant 0 : i32
    %c0_i32_0 = arith.constant 0 : i32
    return %arg0, %c0_i32 : i32, i32
  }
  func.func @transform_1(%arg0: i32) -> (i32, i32) {
    %c0_i32 = arith.constant 0 : i32
    %c0_i32_0 = arith.constant 0 : i32
    %c0_i32_1 = arith.constant 0 : i32
    return %c0_i32, %c0_i32_0 : i32, i32
  }
  func.func @transform_2(%arg0: i32) -> (i32, i32) {
    %c0_i32 = arith.constant 0 : i32
    %c0_i32_0 = arith.constant 0 : i32
    %c0_i32_1 = arith.constant 0 : i32
    return %c0_i32, %c0_i32_0 : i32, i32
  }
  func.func @transform_3(%arg0: i32) -> (i32, i32) {
    %c0_i32 = arith.constant 0 : i32
    %c0_i32_0 = arith.constant 0 : i32
    return %arg0, %c0_i32 : i32, i32
  }
}

module attributes {stable_mosaic.version = 11 : i64} {
  func.func @_mm_bias_act_kernel(%arg0: i32, %arg1: memref<256x432xbf16, #tpu.memory_space<vmem>>, %arg2: memref<432x8xbf16, #tpu.memory_space<vmem>>, %arg3: memref<1x8xf32, #tpu.memory_space<vmem>>, %arg4: memref<256x8xf32, #tpu.memory_space<vmem>>) attributes {dimension_semantics = [#tpu.dimension_semantics<parallel>], iteration_bounds = array<i64: 1>, scalar_prefetch = 0 : i64, scratch_operands = 0 : i64, tpu.core_type = #tpu.core_type<tc>, window_params = [{transform_indices = @transform_0, window_bounds = array<i64: 256, 432>}, {pipeline_mode = #tpu.pipeline_mode<synchronous>, transform_indices = @transform_1, window_bounds = array<i64: 432, 8>}, {pipeline_mode = #tpu.pipeline_mode<synchronous>, transform_indices = @transform_2, window_bounds = array<i64: 1, 8>}, {transform_indices = @transform_3, window_bounds = array<i64: 256, 8>}]} {
    %c0 = arith.constant 0 : index
    %c0_0 = arith.constant 0 : index
    %0 = vector.load %arg1[%c0, %c0_0] : memref<256x432xbf16, #tpu.memory_space<vmem>>, vector<256x432xbf16>
    %c0_1 = arith.constant 0 : index
    %c0_2 = arith.constant 0 : index
    %1 = vector.load %arg2[%c0_1, %c0_2] : memref<432x8xbf16, #tpu.memory_space<vmem>>, vector<432x8xbf16>
    %cst = arith.constant dense<0.000000e+00> : vector<256x8xf32>
    %2 = tpu.matmul %0, %1, %cst {dimension_numbers = #tpu.dot_dimension_numbers<[1], [0], [0], [1], [0, 0, 1, 1], [], []>} : vector<256x432xbf16>, vector<432x8xbf16>, vector<256x8xf32> -> vector<256x8xf32>
    %c0_3 = arith.constant 0 : index
    %c0_4 = arith.constant 0 : index
    %3 = vector.load %arg3[%c0_3, %c0_4] : memref<1x8xf32, #tpu.memory_space<vmem>>, vector<1x8xf32>
    %4 = vector.broadcast %3 : vector<1x8xf32> to vector<256x8xf32>
    %5 = arith.addf %2, %4 : vector<256x8xf32>
    %cst_5 = arith.constant 0.000000e+00 : f32
    %6 = vector.broadcast %cst_5 : f32 to vector<256x8xf32>
    %7 = arith.cmpf ogt, %5, %6 : vector<256x8xf32>
    %cst_6 = arith.constant 0.00999999977 : f32
    %8 = vector.broadcast %cst_6 : f32 to vector<256x8xf32>
    %9 = arith.mulf %8, %5 : vector<256x8xf32>
    %10 = arith.select %7, %5, %9 : vector<256x8xi1>, vector<256x8xf32>
    %c0_7 = arith.constant 0 : index
    %c0_8 = arith.constant 0 : index
    %11 = vector.load %arg4[%c0_7, %c0_8] : memref<256x8xf32, #tpu.memory_space<vmem>>, vector<256x8xf32>
    tpu.vector_store %arg4[%c0_7, %c0_8], %10 {strides = array<i32>} : memref<256x8xf32, #tpu.memory_space<vmem>>, vector<256x8xf32>,
    return
  }
  func.func @transform_0(%arg0: i32) -> (i32, i32) {
    %c0_i32 = arith.constant 0 : i32
    %c0_i32_0 = arith.constant 0 : i32
    return %arg0, %c0_i32 : i32, i32
  }
  func.func @transform_1(%arg0: i32) -> (i32, i32) {
    %c0_i32 = arith.constant 0 : i32
    %c0_i32_0 = arith.constant 0 : i32
    %c0_i32_1 = arith.constant 0 : i32
    return %c0_i32, %c0_i32_0 : i32, i32
  }
  func.func @transform_2(%arg0: i32) -> (i32, i32) {
    %c0_i32 = arith.constant 0 : i32
    %c0_i32_0 = arith.constant 0 : i32
    %c0_i32_1 = arith.constant 0 : i32
    return %c0_i32, %c0_i32_0 : i32, i32
  }
  func.func @transform_3(%arg0: i32) -> (i32, i32) {
    %c0_i32 = arith.constant 0 : i32
    %c0_i32_0 = arith.constant 0 : i32
    return %arg0, %c0_i32 : i32, i32
  }
}

module attributes {stable_mosaic.version = 11 : i64} {
  func.func @_mm_bias_act_kernel(%arg0: i32, %arg1: memref<256x216xbf16, #tpu.memory_space<vmem>>, %arg2: memref<216x8xbf16, #tpu.memory_space<vmem>>, %arg3: memref<1x8xf32, #tpu.memory_space<vmem>>, %arg4: memref<256x8xf32, #tpu.memory_space<vmem>>) attributes {dimension_semantics = [#tpu.dimension_semantics<parallel>], iteration_bounds = array<i64: 8>, scalar_prefetch = 0 : i64, scratch_operands = 0 : i64, tpu.core_type = #tpu.core_type<tc>, window_params = [{transform_indices = @transform_0, window_bounds = array<i64: 256, 216>}, {pipeline_mode = #tpu.pipeline_mode<synchronous>, transform_indices = @transform_1, window_bounds = array<i64: 216, 8>}, {pipeline_mode = #tpu.pipeline_mode<synchronous>, transform_indices = @transform_2, window_bounds = array<i64: 1, 8>}, {transform_indices = @transform_3, window_bounds = array<i64: 256, 8>}]} {
    %c0 = arith.constant 0 : index
    %c0_0 = arith.constant 0 : index
    %0 = vector.load %arg1[%c0, %c0_0] : memref<256x216xbf16, #tpu.memory_space<vmem>>, vector<256x216xbf16>
    %c0_1 = arith.constant 0 : index
    %c0_2 = arith.constant 0 : index
    %1 = vector.load %arg2[%c0_1, %c0_2] : memref<216x8xbf16, #tpu.memory_space<vmem>>, vector<216x8xbf16>
    %cst = arith.constant dense<0.000000e+00> : vector<256x8xf32>
    %2 = tpu.matmul %0, %1, %cst {dimension_numbers = #tpu.dot_dimension_numbers<[1], [0], [0], [1], [0, 0, 1, 1], [], []>} : vector<256x216xbf16>, vector<216x8xbf16>, vector<256x8xf32> -> vector<256x8xf32>
    %c0_3 = arith.constant 0 : index
    %c0_4 = arith.constant 0 : index
    %3 = vector.load %arg3[%c0_3, %c0_4] : memref<1x8xf32, #tpu.memory_space<vmem>>, vector<1x8xf32>
    %4 = vector.broadcast %3 : vector<1x8xf32> to vector<256x8xf32>
    %5 = arith.addf %2, %4 : vector<256x8xf32>
    %cst_5 = arith.constant 0.000000e+00 : f32
    %6 = vector.broadcast %cst_5 : f32 to vector<256x8xf32>
    %7 = arith.cmpf ogt, %5, %6 : vector<256x8xf32>
    %cst_6 = arith.constant 0.00999999977 : f32
    %8 = vector.broadcast %cst_6 : f32 to vector<256x8xf32>
    %9 = arith.mulf %8, %5 : vector<256x8xf32>
    %10 = arith.select %7, %5, %9 : vector<256x8xi1>, vector<256x8xf32>
    %c0_7 = arith.constant 0 : index
    %c0_8 = arith.constant 0 : index
    %11 = vector.load %arg4[%c0_7, %c0_8] : memref<256x8xf32, #tpu.memory_space<vmem>>, vector<256x8xf32>
    tpu.vector_store %arg4[%c0_7, %c0_8], %10 {strides = array<i32>} : memref<256x8xf32, #tpu.memory_space<vmem>>, vector<256x8xf32>,
    return
  }
  func.func @transform_0(%arg0: i32) -> (i32, i32) {
    %c0_i32 = arith.constant 0 : i32
    %c0_i32_0 = arith.constant 0 : i32
    return %arg0, %c0_i32 : i32, i32
  }
  func.func @transform_1(%arg0: i32) -> (i32, i32) {
    %c0_i32 = arith.constant 0 : i32
    %c0_i32_0 = arith.constant 0 : i32
    %c0_i32_1 = arith.constant 0 : i32
    return %c0_i32, %c0_i32_0 : i32, i32
  }
  func.func @transform_2(%arg0: i32) -> (i32, i32) {
    %c0_i32 = arith.constant 0 : i32
    %c0_i32_0 = arith.constant 0 : i32
    %c0_i32_1 = arith.constant 0 : i32
    return %c0_i32, %c0_i32_0 : i32, i32
  }
  func.func @transform_3(%arg0: i32) -> (i32, i32) {
    %c0_i32 = arith.constant 0 : i32
    %c0_i32_0 = arith.constant 0 : i32
    return %arg0, %c0_i32 : i32, i32
  }
}

module attributes {stable_mosaic.version = 11 : i64} {
  func.func @_mm_bias_act_kernel(%arg0: i32, %arg1: memref<256x216xbf16, #tpu.memory_space<vmem>>, %arg2: memref<216x1xbf16, #tpu.memory_space<vmem>>, %arg3: memref<1x1xf32, #tpu.memory_space<vmem>>, %arg4: memref<256x1xf32, #tpu.memory_space<vmem>>) attributes {dimension_semantics = [#tpu.dimension_semantics<parallel>], iteration_bounds = array<i64: 8>, scalar_prefetch = 0 : i64, scratch_operands = 0 : i64, tpu.core_type = #tpu.core_type<tc>, window_params = [{transform_indices = @transform_0, window_bounds = array<i64: 256, 216>}, {pipeline_mode = #tpu.pipeline_mode<synchronous>, transform_indices = @transform_1, window_bounds = array<i64: 216, 1>}, {pipeline_mode = #tpu.pipeline_mode<synchronous>, transform_indices = @transform_2, window_bounds = array<i64: 1, 1>}, {transform_indices = @transform_3, window_bounds = array<i64: 256, 1>}]} {
    %c0 = arith.constant 0 : index
    %c0_0 = arith.constant 0 : index
    %0 = vector.load %arg1[%c0, %c0_0] : memref<256x216xbf16, #tpu.memory_space<vmem>>, vector<256x216xbf16>
    %c0_1 = arith.constant 0 : index
    %c0_2 = arith.constant 0 : index
    %1 = vector.load %arg2[%c0_1, %c0_2] : memref<216x1xbf16, #tpu.memory_space<vmem>>, vector<216x1xbf16>
    %cst = arith.constant dense<0.000000e+00> : vector<256x1xf32>
    %2 = tpu.matmul %0, %1, %cst {dimension_numbers = #tpu.dot_dimension_numbers<[1], [0], [0], [1], [0, 0, 1, 1], [], []>} : vector<256x216xbf16>, vector<216x1xbf16>, vector<256x1xf32> -> vector<256x1xf32>
    %c0_3 = arith.constant 0 : index
    %c0_4 = arith.constant 0 : index
    %3 = vector.load %arg3[%c0_3, %c0_4] : memref<1x1xf32, #tpu.memory_space<vmem>>, vector<1x1xf32>
    %4 = vector.broadcast %3 : vector<1x1xf32> to vector<256x1xf32>
    %5 = arith.addf %2, %4 : vector<256x1xf32>
    %c0_5 = arith.constant 0 : index
    %c0_6 = arith.constant 0 : index
    %6 = vector.load %arg4[%c0_5, %c0_6] : memref<256x1xf32, #tpu.memory_space<vmem>>, vector<256x1xf32>
    tpu.vector_store %arg4[%c0_5, %c0_6], %5 {strides = array<i32>} : memref<256x1xf32, #tpu.memory_space<vmem>>, vector<256x1xf32>,
    return
  }
  func.func @transform_0(%arg0: i32) -> (i32, i32) {
    %c0_i32 = arith.constant 0 : i32
    %c0_i32_0 = arith.constant 0 : i32
    return %arg0, %c0_i32 : i32, i32
  }
  func.func @transform_1(%arg0: i32) -> (i32, i32) {
    %c0_i32 = arith.constant 0 : i32
    %c0_i32_0 = arith.constant 0 : i32
    %c0_i32_1 = arith.constant 0 : i32
    return %c0_i32, %c0_i32_0 : i32, i32
  }
  func.func @transform_2(%arg0: i32) -> (i32, i32) {
    %c0_i32 = arith.constant 0 : i32
    %c0_i32_0 = arith.constant 0 : i32
    %c0_i32_1 = arith.constant 0 : i32
    return %c0_i32, %c0_i32_0 : i32, i32
  }
  func.func @transform_3(%arg0: i32) -> (i32, i32) {
    %c0_i32 = arith.constant 0 : i32
    %c0_i32_0 = arith.constant 0 : i32
    return %arg0, %c0_i32 : i32, i32
  }
}

module attributes {stable_mosaic.version = 11 : i64} {
  func.func @_mm_bias_act_kernel(%arg0: i32, %arg1: memref<256x216xbf16, #tpu.memory_space<vmem>>, %arg2: memref<216x1xbf16, #tpu.memory_space<vmem>>, %arg3: memref<1x1xf32, #tpu.memory_space<vmem>>, %arg4: memref<256x1xf32, #tpu.memory_space<vmem>>) attributes {dimension_semantics = [#tpu.dimension_semantics<parallel>], iteration_bounds = array<i64: 1>, scalar_prefetch = 0 : i64, scratch_operands = 0 : i64, tpu.core_type = #tpu.core_type<tc>, window_params = [{transform_indices = @transform_0, window_bounds = array<i64: 256, 216>}, {pipeline_mode = #tpu.pipeline_mode<synchronous>, transform_indices = @transform_1, window_bounds = array<i64: 216, 1>}, {pipeline_mode = #tpu.pipeline_mode<synchronous>, transform_indices = @transform_2, window_bounds = array<i64: 1, 1>}, {transform_indices = @transform_3, window_bounds = array<i64: 256, 1>}]} {
    %c0 = arith.constant 0 : index
    %c0_0 = arith.constant 0 : index
    %0 = vector.load %arg1[%c0, %c0_0] : memref<256x216xbf16, #tpu.memory_space<vmem>>, vector<256x216xbf16>
    %c0_1 = arith.constant 0 : index
    %c0_2 = arith.constant 0 : index
    %1 = vector.load %arg2[%c0_1, %c0_2] : memref<216x1xbf16, #tpu.memory_space<vmem>>, vector<216x1xbf16>
    %cst = arith.constant dense<0.000000e+00> : vector<256x1xf32>
    %2 = tpu.matmul %0, %1, %cst {dimension_numbers = #tpu.dot_dimension_numbers<[1], [0], [0], [1], [0, 0, 1, 1], [], []>} : vector<256x216xbf16>, vector<216x1xbf16>, vector<256x1xf32> -> vector<256x1xf32>
    %c0_3 = arith.constant 0 : index
    %c0_4 = arith.constant 0 : index
    %3 = vector.load %arg3[%c0_3, %c0_4] : memref<1x1xf32, #tpu.memory_space<vmem>>, vector<1x1xf32>
    %4 = vector.broadcast %3 : vector<1x1xf32> to vector<256x1xf32>
    %5 = arith.addf %2, %4 : vector<256x1xf32>
    %c0_5 = arith.constant 0 : index
    %c0_6 = arith.constant 0 : index
    %6 = vector.load %arg4[%c0_5, %c0_6] : memref<256x1xf32, #tpu.memory_space<vmem>>, vector<256x1xf32>
    tpu.vector_store %arg4[%c0_5, %c0_6], %5 {strides = array<i32>} : memref<256x1xf32, #tpu.memory_space<vmem>>, vector<256x1xf32>,
    return
  }
  func.func @transform_0(%arg0: i32) -> (i32, i32) {
    %c0_i32 = arith.constant 0 : i32
    %c0_i32_0 = arith.constant 0 : i32
    return %arg0, %c0_i32 : i32, i32
  }
  func.func @transform_1(%arg0: i32) -> (i32, i32) {
    %c0_i32 = arith.constant 0 : i32
    %c0_i32_0 = arith.constant 0 : i32
    %c0_i32_1 = arith.constant 0 : i32
    return %c0_i32, %c0_i32_0 : i32, i32
  }
  func.func @transform_2(%arg0: i32) -> (i32, i32) {
    %c0_i32 = arith.constant 0 : i32
    %c0_i32_0 = arith.constant 0 : i32
    %c0_i32_1 = arith.constant 0 : i32
    return %c0_i32, %c0_i32_0 : i32, i32
  }
  func.func @transform_3(%arg0: i32) -> (i32, i32) {
    %c0_i32 = arith.constant 0 : i32
    %c0_i32_0 = arith.constant 0 : i32
    return %arg0, %c0_i32 : i32, i32
  }
}

module attributes {stable_mosaic.version = 11 : i64} {
  func.func @_mm_bias_act_kernel(%arg0: i32, %arg1: memref<32x8xbf16, #tpu.memory_space<vmem>>, %arg2: memref<8x1xbf16, #tpu.memory_space<vmem>>, %arg3: memref<1x1xf32, #tpu.memory_space<vmem>>, %arg4: memref<32x1xf32, #tpu.memory_space<vmem>>) attributes {dimension_semantics = [#tpu.dimension_semantics<parallel>], iteration_bounds = array<i64: 1>, scalar_prefetch = 0 : i64, scratch_operands = 0 : i64, tpu.core_type = #tpu.core_type<tc>, window_params = [{transform_indices = @transform_0, window_bounds = array<i64: 32, 8>}, {pipeline_mode = #tpu.pipeline_mode<synchronous>, transform_indices = @transform_1, window_bounds = array<i64: 8, 1>}, {pipeline_mode = #tpu.pipeline_mode<synchronous>, transform_indices = @transform_2, window_bounds = array<i64: 1, 1>}, {transform_indices = @transform_3, window_bounds = array<i64: 32, 1>}]} {
    %c0 = arith.constant 0 : index
    %c0_0 = arith.constant 0 : index
    %0 = vector.load %arg1[%c0, %c0_0] : memref<32x8xbf16, #tpu.memory_space<vmem>>, vector<32x8xbf16>
    %c0_1 = arith.constant 0 : index
    %c0_2 = arith.constant 0 : index
    %1 = vector.load %arg2[%c0_1, %c0_2] : memref<8x1xbf16, #tpu.memory_space<vmem>>, vector<8x1xbf16>
    %cst = arith.constant dense<0.000000e+00> : vector<32x1xf32>
    %2 = tpu.matmul %0, %1, %cst {dimension_numbers = #tpu.dot_dimension_numbers<[1], [0], [0], [1], [0, 0, 1, 1], [], []>} : vector<32x8xbf16>, vector<8x1xbf16>, vector<32x1xf32> -> vector<32x1xf32>
    %c0_3 = arith.constant 0 : index
    %c0_4 = arith.constant 0 : index
    %3 = vector.load %arg3[%c0_3, %c0_4] : memref<1x1xf32, #tpu.memory_space<vmem>>, vector<1x1xf32>
    %4 = vector.broadcast %3 : vector<1x1xf32> to vector<32x1xf32>
    %5 = arith.addf %2, %4 : vector<32x1xf32>
    %c0_5 = arith.constant 0 : index
    %c0_6 = arith.constant 0 : index
    %6 = vector.load %arg4[%c0_5, %c0_6] : memref<32x1xf32, #tpu.memory_space<vmem>>, vector<32x1xf32>
    tpu.vector_store %arg4[%c0_5, %c0_6], %5 {strides = array<i32>} : memref<32x1xf32, #tpu.memory_space<vmem>>, vector<32x1xf32>,
    return
  }
  func.func @transform_0(%arg0: i32) -> (i32, i32) {
    %c0_i32 = arith.constant 0 : i32
    %c0_i32_0 = arith.constant 0 : i32
    return %arg0, %c0_i32 : i32, i32
  }
  func.func @transform_1(%arg0: i32) -> (i32, i32) {
    %c0_i32 = arith.constant 0 : i32
    %c0_i32_0 = arith.constant 0 : i32
    %c0_i32_1 = arith.constant 0 : i32
    return %c0_i32, %c0_i32_0 : i32, i32
  }
  func.func @transform_2(%arg0: i32) -> (i32, i32) {
    %c0_i32 = arith.constant 0 : i32
    %c0_i32_0 = arith.constant 0 : i32
    %c0_i32_1 = arith.constant 0 : i32
    return %c0_i32, %c0_i32_0 : i32, i32
  }
  func.func @transform_3(%arg0: i32) -> (i32, i32) {
    %c0_i32 = arith.constant 0 : i32
    %c0_i32_0 = arith.constant 0 : i32
    return %arg0, %c0_i32 : i32, i32
  }
}

module attributes {stable_mosaic.version = 11 : i64} {
  func.func @_mm_bias_act_kernel(%arg0: i32, %arg1: memref<32x432xbf16, #tpu.memory_space<vmem>>, %arg2: memref<432x1xbf16, #tpu.memory_space<vmem>>, %arg3: memref<1x1xf32, #tpu.memory_space<vmem>>, %arg4: memref<32x1xf32, #tpu.memory_space<vmem>>) attributes {dimension_semantics = [#tpu.dimension_semantics<parallel>], iteration_bounds = array<i64: 1>, scalar_prefetch = 0 : i64, scratch_operands = 0 : i64, tpu.core_type = #tpu.core_type<tc>, window_params = [{transform_indices = @transform_0, window_bounds = array<i64: 32, 432>}, {pipeline_mode = #tpu.pipeline_mode<synchronous>, transform_indices = @transform_1, window_bounds = array<i64: 432, 1>}, {pipeline_mode = #tpu.pipeline_mode<synchronous>, transform_indices = @transform_2, window_bounds = array<i64: 1, 1>}, {transform_indices = @transform_3, window_bounds = array<i64: 32, 1>}]} {
    %c0 = arith.constant 0 : index
    %c0_0 = arith.constant 0 : index
    %0 = vector.load %arg1[%c0, %c0_0] : memref<32x432xbf16, #tpu.memory_space<vmem>>, vector<32x432xbf16>
    %c0_1 = arith.constant 0 : index
    %c0_2 = arith.constant 0 : index
    %1 = vector.load %arg2[%c0_1, %c0_2] : memref<432x1xbf16, #tpu.memory_space<vmem>>, vector<432x1xbf16>
    %cst = arith.constant dense<0.000000e+00> : vector<32x1xf32>
    %2 = tpu.matmul %0, %1, %cst {dimension_numbers = #tpu.dot_dimension_numbers<[1], [0], [0], [1], [0, 0, 1, 1], [], []>} : vector<32x432xbf16>, vector<432x1xbf16>, vector<32x1xf32> -> vector<32x1xf32>
    %c0_3 = arith.constant 0 : index
    %c0_4 = arith.constant 0 : index
    %3 = vector.load %arg3[%c0_3, %c0_4] : memref<1x1xf32, #tpu.memory_space<vmem>>, vector<1x1xf32>
    %4 = vector.broadcast %3 : vector<1x1xf32> to vector<32x1xf32>
    %5 = arith.addf %2, %4 : vector<32x1xf32>
    %c0_5 = arith.constant 0 : index
    %c0_6 = arith.constant 0 : index
    %6 = vector.load %arg4[%c0_5, %c0_6] : memref<32x1xf32, #tpu.memory_space<vmem>>, vector<32x1xf32>
    tpu.vector_store %arg4[%c0_5, %c0_6], %5 {strides = array<i32>} : memref<32x1xf32, #tpu.memory_space<vmem>>, vector<32x1xf32>,
    return
  }
  func.func @transform_0(%arg0: i32) -> (i32, i32) {
    %c0_i32 = arith.constant 0 : i32
    %c0_i32_0 = arith.constant 0 : i32
    return %arg0, %c0_i32 : i32, i32
  }
  func.func @transform_1(%arg0: i32) -> (i32, i32) {
    %c0_i32 = arith.constant 0 : i32
    %c0_i32_0 = arith.constant 0 : i32
    %c0_i32_1 = arith.constant 0 : i32
    return %c0_i32, %c0_i32_0 : i32, i32
  }
  func.func @transform_2(%arg0: i32) -> (i32, i32) {
    %c0_i32 = arith.constant 0 : i32
    %c0_i32_0 = arith.constant 0 : i32
    %c0_i32_1 = arith.constant 0 : i32
    return %c0_i32, %c0_i32_0 : i32, i32
  }
  func.func @transform_3(%arg0: i32) -> (i32, i32) {
    %c0_i32 = arith.constant 0 : i32
    %c0_i32_0 = arith.constant 0 : i32
    return %arg0, %c0_i32 : i32, i32
  }
}

</mosaic_0001>

<bundles_post_ra>
// kernel: seq2seq3d_forward.12
= control target key start
LH: loop header
LB: loop body
LE: loop exit
PB: predicated region body
PF: predicated region fallthrough
CT: control target
= control target key end

     0   :  { %vm115_vm0 = vcmask 1044480   ;;  %vm116_vm1 = vcmask 1045504   ;;  %v306_v2 = vmov 65535   ;;  %vm90_vm2 = vcmask 220160   ;;  %s453_s1 = inlined_call_operand.vmem [shape: bf16[27,8], index: 1, kind: input, shape index: {}]   ;;  %s454_s2 = inlined_call_operand.vmem [shape: f32[1,8], index: 2, kind: input, shape index: {}]   ;;  %s455_s0 = inlined_call_operand.vmem [shape: bf16[128,27], index: 0, kind: input, shape index: {}]   ;;  %s456_s3 = inlined_call_operand.vmem [shape: f32[128,8], index: 3, kind: output, shape index: {}]  }
   0x1   :  { %v278_v0 = vld [vmem:[%s453_s1 + $0x8] sm:$0xf]  ;;  %v297_v1 = vld [vmem:[%s453_s1 + $0x8] sm:$0x30]  ;;  %v117_v3 = vsel %vm115_vm0, 4294967295, %v306_v2  ;;  %v296_v7 = vld [vmem:[%s453_s1] sm:$0xff] }
   0x2   :  { %v279_v4 = vor.u32 %v297_v1, %v278_v0  ;;  %v118_v5 = vsel %vm116_vm1, %v117_v3, 0  ;;  %v288_v8 = vld [vmem:[%s455_s0] sm:$0xff]  ;;  %v290_v9 = vld [vmem:[%s455_s0 + $0x10] sm:$0xff]  ;;  %v289_v12 = vld [vmem:[%s455_s0 + $0x8] sm:$0xff]  ;;  %vm219_vm3 = vcmask 64512  }
   0x3   :  { %v292_v10 = vld [vmem:[%s455_s0 + $0x20] sm:$0xff]  ;;  %v294_v11 = vld [vmem:[%s455_s0 + $0x30] sm:$0xff]  ;;  %v291_v13 = vld [vmem:[%s455_s0 + $0x18] sm:$0xff] }
   0x4   :  { %v120_v6 = vand.u32 %v279_v4, %v118_v5  ;;  %v293_v14 = vld [vmem:[%s455_s0 + $0x28] sm:$0xff]  ;;  %v295_v15 = vld [vmem:[%s455_s0 + $0x38] sm:$0xff]  ;;  %v371_v16 = vld [vmem:[%s454_s2] ss:$0 sm:$0xff] }
   0x6   :  { %128 = vmatpush.bf16.msra.mxu0 %v120_v6  ;;  %298 = vmatpush.bf16.msra.mxu1 %v120_v6 }
   0x7   :  { %299 = vmatpush.bf16.msra.mxu2 %v120_v6  ;;  %300 = vmatpush.bf16.msra.mxu3 %v120_v6 }
   0xa   :  { %129 = vmatpush.bf16.msra.mxu0 %v296_v7  ;;  %301 = vmatpush.bf16.msra.mxu1 %v296_v7 }
   0xb   :  { %302 = vmatpush.bf16.msra.mxu2 %v296_v7  ;;  %303 = vmatpush.bf16.msra.mxu3 %v296_v7 }
   0xd   :  { %280 = vmatmul.msk.bf16.vlgmr.msra.gmra.mxu0 %vm90_vm2, %v288_v8  ;;  %282 = vmatmul.msk.bf16.vlgmr.msra.gmra.mxu1 %vm90_vm2, %v290_v9 }
   0xe   :  { %284 = vmatmul.msk.bf16.vlgmr.msra.gmra.mxu2 %vm90_vm2, %v292_v10  ;;  %286 = vmatmul.msk.bf16.vlgmr.msra.gmra.mxu3 %vm90_vm2, %v294_v11 }
  0x1d   :  { %281 = vmatmul.msk.bf16.gmra.mxu0 %vm90_vm2, %v289_v12  ;;  %283 = vmatmul.msk.bf16.gmra.mxu1 %vm90_vm2, %v291_v13 }
  0x1e   :  { %285 = vmatmul.msk.bf16.gmra.mxu2 %vm90_vm2, %v293_v14  ;;  %287 = vmatmul.msk.bf16.gmra.mxu3 %vm90_vm2, %v295_v15 }
  0x8a   :  { %v131_v17 = vpop.f32.mrf.mxu0  ;;  %v141_v18 = vpop.f32.mrf.mxu1 }
  0x8b   :  { %v132_v19 = vadd.f32 %v371_v16, %v131_v17  ;;  %v142_v20 = vadd.f32 %v371_v16, %v141_v18 }
  0x8d   :  { %vm171_vm4 = vcmp.gt.f32.partialorder %v132_v19, 0.0  ;;  %v187_v21 = vmul.f32 0.01, %v132_v19  ;;  %vm175_vm5 = vcmp.gt.f32.partialorder %v142_v20, 0.0  ;;  %v191_v22 = vmul.f32 0.01, %v142_v20 }
  0x8f   :  { %v203_v23 = vsel %vm171_vm4, %v132_v19, %v187_v21  ;;  %v207_v24 = vsel %vm175_vm5, %v142_v20, %v191_v22 }
  0x90   :  { %220 = vst.msk [vmem:[%s456_s3] sm:$0xff] %vm219_vm3, %v203_v23 }
  0x91   :  { %224 = vst.msk [vmem:[%s456_s3 + $0x20] sm:$0xff] %vm219_vm3, %v207_v24  ;;  %v151_v25 = vpop.f32.mrf.mxu2  ;;  %v161_v26 = vpop.f32.mrf.mxu3 }
  0x92   :  { %v152_v27 = vadd.f32 %v371_v16, %v151_v25  ;;  %v162_v28 = vadd.f32 %v371_v16, %v161_v26  ;;  %v133_v29 = vpop.f32.mrf.mxu0  ;;  %v143_v30 = vpop.f32.mrf.mxu1 }
  0x93   :  { %v134_v31 = vadd.f32 %v371_v16, %v133_v29  ;;  %v144_v32 = vadd.f32 %v371_v16, %v143_v30 }
  0x94   :  { %vm179_vm6 = vcmp.gt.f32.partialorder %v152_v27, 0.0  ;;  %v195_v33 = vmul.f32 0.01, %v152_v27  ;;  %vm183_vm7 = vcmp.gt.f32.partialorder %v162_v28, 0.0  ;;  %v199_v34 = vmul.f32 0.01, %v162_v28 }
  0x95   :  { %vm172_vm8 = vcmp.gt.f32.partialorder %v134_v31, 0.0  ;;  %v188_v35 = vmul.f32 0.01, %v134_v31  ;;  %vm176_vm9 = vcmp.gt.f32.partialorder %v144_v32, 0.0  ;;  %v192_v36 = vmul.f32 0.01, %v144_v32 }
  0x96   :  { %v211_v37 = vsel %vm179_vm6, %v152_v27, %v195_v33  ;;  %v215_v38 = vsel %vm183_vm7, %v162_v28, %v199_v34 }
  0x97   :  { %228 = vst.msk [vmem:[%s456_s3 + $0x40] sm:$0xff] %vm219_vm3, %v211_v37  ;;  %v204_v39 = vsel %vm172_vm8, %v134_v31, %v188_v35  ;;  %v208_v40 = vsel %vm176_vm9, %v144_v32, %v192_v36 }
  0x98   :  { %232 = vst.msk [vmem:[%s456_s3 + $0x60] sm:$0xff] %vm219_vm3, %v215_v38 }
  0x99   :  { %221 = vst.msk [vmem:[%s456_s3 + $0x8] sm:$0xff] %vm219_vm3, %v204_v39  ;;  %v153_v41 = vpop.f32.mrf.mxu2  ;;  %v163_v42 = vpop.f32.mrf.mxu3 }
  0x9a   :  { %225 = vst.msk [vmem:[%s456_s3 + $0x28] sm:$0xff] %vm219_vm3, %v208_v40  ;;  %v154_v43 = vadd.f32 %v371_v16, %v153_v41  ;;  %v164_v44 = vadd.f32 %v371_v16, %v163_v42  ;;  %v136_v45 = vpop.f32.mrf.mxu0  ;;  %v146_v46 = vpop.f32.mrf.mxu1 }
  0x9b   :  { %v137_v47 = vadd.f32 %v371_v16, %v136_v45  ;;  %v147_v48 = vadd.f32 %v371_v16, %v146_v46 }
  0x9c   :  { %vm180_vm10 = vcmp.gt.f32.partialorder %v154_v43, 0.0  ;;  %v196_v49 = vmul.f32 0.01, %v154_v43  ;;  %vm184_vm11 = vcmp.gt.f32.partialorder %v164_v44, 0.0  ;;  %v200_v50 = vmul.f32 0.01, %v164_v44 }
  0x9d   :  { %vm173_vm12 = vcmp.gt.f32.partialorder %v137_v47, 0.0  ;;  %v189_v51 = vmul.f32 0.01, %v137_v47  ;;  %vm177_vm13 = vcmp.gt.f32.partialorder %v147_v48, 0.0  ;;  %v193_v52 = vmul.f32 0.01, %v147_v48 }
  0x9e   :  { %v212_v53 = vsel %vm180_vm10, %v154_v43, %v196_v49  ;;  %v216_v54 = vsel %vm184_vm11, %v164_v44, %v200_v50 }
  0x9f   :  { %229 = vst.msk [vmem:[%s456_s3 + $0x48] sm:$0xff] %vm219_vm3, %v212_v53  ;;  %v205_v55 = vsel %vm173_vm12, %v137_v47, %v189_v51  ;;  %v209_v56 = vsel %vm177_vm13, %v147_v48, %v193_v52 }
  0xa0   :  { %233 = vst.msk [vmem:[%s456_s3 + $0x68] sm:$0xff] %vm219_vm3, %v216_v54 }
  0xa1   :  { %222 = vst.msk [vmem:[%s456_s3 + $0x10] sm:$0xff] %vm219_vm3, %v205_v55  ;;  %v156_v57 = vpop.f32.mrf.mxu2  ;;  %v166_v58 = vpop.f32.mrf.mxu3 }
  0xa2   :  { %226 = vst.msk [vmem:[%s456_s3 + $0x30] sm:$0xff] %vm219_vm3, %v209_v56  ;;  %v157_v59 = vadd.f32 %v371_v16, %v156_v57  ;;  %v167_v60 = vadd.f32 %v371_v16, %v166_v58  ;;  %v138_v61 = vpop.f32.mrf.mxu0  ;;  %v148_v62 = vpop.f32.mrf.mxu1 }
  0xa3   :  { %v139_v63 = vadd.f32 %v371_v16, %v138_v61  ;;  %v149_v0 = vadd.f32 %v371_v16, %v148_v62 }
  0xa4   :  { %vm181_vm14 = vcmp.gt.f32.partialorder %v157_v59, 0.0  ;;  %v197_v1 = vmul.f32 0.01, %v157_v59  ;;  %vm185_vm15 = vcmp.gt.f32.partialorder %v167_v60, 0.0  ;;  %v201_v2 = vmul.f32 0.01, %v167_v60 }
  0xa5   :  { %vm174_vm0 = vcmp.gt.f32.partialorder %v139_v63, 0.0  ;;  %v190_v3 = vmul.f32 0.01, %v139_v63  ;;  %vm178_vm1 = vcmp.gt.f32.partialorder %v149_v0, 0.0  ;;  %v194_v4 = vmul.f32 0.01, %v149_v0 }
  0xa6   :  { %v213_v5 = vsel %vm181_vm14, %v157_v59, %v197_v1  ;;  %v217_v6 = vsel %vm185_vm15, %v167_v60, %v201_v2 }
  0xa7   :  { %230 = vst.msk [vmem:[%s456_s3 + $0x50] sm:$0xff] %vm219_vm3, %v213_v5  ;;  %v206_v7 = vsel %vm174_vm0, %v139_v63, %v190_v3  ;;  %v210_v8 = vsel %vm178_vm1, %v149_v0, %v194_v4 }
  0xa8   :  { %234 = vst.msk [vmem:[%s456_s3 + $0x70] sm:$0xff] %vm219_vm3, %v217_v6 }
  0xa9   :  { %223 = vst.msk [vmem:[%s456_s3 + $0x18] sm:$0xff] %vm219_vm3, %v206_v7  ;;  %v158_v9 = vpop.f32.mrf.mxu2  ;;  %v168_v10 = vpop.f32.mrf.mxu3 }
  0xaa   :  { %227 = vst.msk [vmem:[%s456_s3 + $0x38] sm:$0xff] %vm219_vm3, %v210_v8  ;;  %v159_v11 = vadd.f32 %v371_v16, %v158_v9  ;;  %v169_v12 = vadd.f32 %v371_v16, %v168_v10 }
  0xac   :  { %vm182_vm2 = vcmp.gt.f32.partialorder %v159_v11, 0.0  ;;  %v198_v13 = vmul.f32 0.01, %v159_v11  ;;  %vm186_vm4 = vcmp.gt.f32.partialorder %v169_v12, 0.0  ;;  %v202_v14 = vmul.f32 0.01, %v169_v12 }
  0xae   :  { %v214_v15 = vsel %vm182_vm2, %v159_v11, %v198_v13  ;;  %v218_v17 = vsel %vm186_vm4, %v169_v12, %v202_v14 }
  0xaf   :  { %231 = vst.msk [vmem:[%s456_s3 + $0x58] sm:$0xff] %vm219_vm3, %v214_v15 }
  0xb0   :  { %235 = vst.msk [vmem:[%s456_s3 + $0x78] sm:$0xff] %vm219_vm3, %v218_v17 }

// kernel: seq2seq3d_forward.13
= control target key start
LH: loop header
LB: loop body
LE: loop exit
PB: predicated region body
PF: predicated region fallthrough
CT: control target
= control target key end

     0   :  { %vm142_vm0 = vcmask 1043456   ;;  %vm138_vm1 = vcmask 719872   ;;  %vm180_vm3 = vcmask 130048   ;;  %s347_s1 = inlined_call_operand.vmem [shape: bf16[216,16], index: 1, kind: input, shape index: {}]   ;;  %s348_s0 = inlined_call_operand.vmem [shape: bf16[16,216], index: 0, kind: input, shape index: {}]   ;;  %s349_s2 = inlined_call_operand.vmem [shape: f32[1,16], index: 2, kind: input, shape index: {}]   ;;  %s350_s3 = inlined_call_operand.vmem [shape: f32[16,16], index: 3, kind: output, shape index: {}]  }
   0x1   :  { %v257_v0 = vld [vmem:[%s347_s1 + $0x38] sm:$0xff]  ;;  %v43_v1 = vld [vmem:[%s347_s1 + $0x68] sm:$0xf]  ;;  %v256_v3 = vld [vmem:[%s347_s1 + $0x30] sm:$0xff] }
   0x2   :  { %v110_v2 = vunpack.c.l.b16 %v43_v1  ;;  %146 = vmatpush.bf16.msra.mxu0 %v257_v0  ;;  %v262_v6 = vld [vmem:[%s347_s1 + $0x60] sm:$0xff]  ;;  %v255_v7 = vld [vmem:[%s347_s1 + $0x28] sm:$0xff]  ;;  %v261_v8 = vld [vmem:[%s347_s1 + $0x58] sm:$0xff] }
   0x3   :  { %v254_v9 = vld [vmem:[%s347_s1 + $0x20] sm:$0xff]  ;;  %v260_v10 = vld [vmem:[%s347_s1 + $0x50] sm:$0xff]  ;;  %v253_v11 = vld [vmem:[%s347_s1 + $0x18] sm:$0xff] }
   0x4   :  { %v124_v4 = vpack.c.b16 %v110_v2, %v110_v2  ;;  %v259_v12 = vld [vmem:[%s347_s1 + $0x48] sm:$0xff]  ;;  %v252_v13 = vld [vmem:[%s347_s1 + $0x10] sm:$0xff]  ;;  %v258_v14 = vld [vmem:[%s347_s1 + $0x40] sm:$0xff] }
   0x5   :  { %v251_v15 = vld [vmem:[%s347_s1 + $0x8] sm:$0xff]  ;;  %v248_v16 = vld [vmem:[%s348_s0 + $0x4] sm:$0xf]  ;;  %v189_v20 = vld [vmem:[%s348_s0] sm:$0xf] }
   0x6   :  { %v144_v5 = vsel %vm142_vm0, %v124_v4, 0  ;;  %147 = vmatpush.bf16.msra.mxu0 %v256_v3  ;;  %v191_v17 = vld [vmem:[%s348_s0 + $0x8] sm:$0xf0]  ;;  %v250_v19 = vld [vmem:[%s347_s1] sm:$0xff]  ;;  %v249_v21 = vld [vmem:[%s348_s0 + $0x4] sm:$0xf0] }
   0x7   :  { %162 = vmatpush.bf16.msra.mxu1 %v144_v5  ;;  %v194_v18 = vor.u32 %v248_v16, %v191_v17  ;;  %v190_v22 = vor.u32 %v249_v21, %v189_v20  ;;  %v263_v23 = vld [vmem:[%s349_s2] ss:$0 sm:$0xff] }
   0xa   :  { %148 = vmatpush.bf16.msra.mxu0 %v255_v7 }
   0xb   :  { %163 = vmatpush.bf16.msra.mxu1 %v262_v6 }
   0xe   :  { %149 = vmatpush.bf16.msra.mxu0 %v254_v9 }
   0xf   :  { %164 = vmatpush.bf16.msra.mxu1 %v261_v8 }
  0x12   :  { %150 = vmatpush.bf16.msra.mxu0 %v253_v11 }
  0x13   :  { %165 = vmatpush.bf16.msra.mxu1 %v260_v10 }
  0x16   :  { %151 = vmatpush.bf16.msra.mxu0 %v252_v13 }
  0x17   :  { %166 = vmatpush.bf16.msra.mxu1 %v259_v12 }
  0x1a   :  { %152 = vmatpush.bf16.msra.mxu0 %v251_v15 }
  0x1b   :  { %167 = vmatpush.bf16.msra.mxu1 %v258_v14 }
  0x1e   :  { %247 = vmatmul.msk.bf16.vlgmr.msra.gmra.mxu1 %vm138_vm1, %v194_v18  ;;  %153 = vmatpush.bf16.msra.mxu0 %v250_v19 }
  0x21   :  { %154 = vmatmul.bf16.vlgmr.msra.gmra.mxu0 %v190_v22 }
  0x9b   :  { %v169_v24 = vpop.f32.mrf.mxu1 }
  0x9e   :  { %v155_v25 = vpop.f32.mrf.mxu0 }
  0x9f   :  { %v156_v26 = vadd.f32 %v263_v23, %v155_v25 }
  0xa1   :  { %v170_v27 = vadd.f32 %v169_v24, %v156_v26 }
  0xa3   :  { %vm174_vm2 = vcmp.gt.f32.partialorder %v170_v27, 0.0  ;;  %v176_v28 = vmul.f32 0.01, %v170_v27  ;;  %v171_v32 = vpop.f32.mrf.mxu1 }
  0xa5   :  { %v178_v29 = vsel %vm174_vm2, %v170_v27, %v176_v28 }
  0xa6   :  { %181 = vst.msk [vmem:[%s350_s3] sm:$0xff] %vm180_vm3, %v178_v29  ;;  %v157_v30 = vpop.f32.mrf.mxu0 }
  0xa7   :  { %v158_v31 = vadd.f32 %v263_v23, %v157_v30 }
  0xa9   :  { %v172_v33 = vadd.f32 %v171_v32, %v158_v31 }
  0xab   :  { %vm175_vm4 = vcmp.gt.f32.partialorder %v172_v33, 0.0  ;;  %v177_v34 = vmul.f32 0.01, %v172_v33 }
  0xad   :  { %v179_v35 = vsel %vm175_vm4, %v172_v33, %v177_v34 }
  0xae   :  { %182 = vst.msk [vmem:[%s350_s3 + $0x8] sm:$0xff] %vm180_vm3, %v179_v35 }

// kernel: seq2seq3d_forward.14
= control target key start
LH: loop header
LB: loop body
LE: loop exit
PB: predicated region body
PF: predicated region fallthrough
CT: control target
= control target key end

     0   :  { %vm34_vm0 = vcmask 130048   ;;  %vm52_vm1 = vcmask 195584   ;;  %s106_s1 = inlined_call_operand.vmem [shape: bf16[16,24], index: 1, kind: input, shape index: {}]   ;;  %s107_s0 = inlined_call_operand.vmem [shape: bf16[16,16], index: 0, kind: input, shape index: {}]   ;;  %s108_s2 = inlined_call_operand.vmem [shape: f32[1,24], index: 2, kind: input, shape index: {}]   ;;  %s109_s3 = inlined_call_operand.vmem [shape: f32[16,24], index: 3, kind: output, shape index: {}]  }
   0x1   :  { %v69_v0 = vld [vmem:[%s106_s1] sm:$0xff] }
   0x2   :  { %v68_v1 = vld [vmem:[%s107_s0] sm:$0xff]  ;;  %45 = vmatpush.bf16.msra.mxu0 %v69_v0 }
   0x3   :  { %v70_v2 = vld [vmem:[%s108_s2] ss:$0 sm:$0xff] }
   0x5   :  { %67 = vmatmul.msk.bf16.vlgmr.msra.gmra.mxu0 %vm34_vm0, %v68_v1 }
  0x82   :  { %v47_v3 = vpop.f32.mrf.mxu0 }
  0x83   :  { %v48_v4 = vadd.f32 %v70_v2, %v47_v3 }
  0x85   :  { %53 = vst.msk [vmem:[%s109_s3] sm:$0xff] %vm52_vm1, %v48_v4 }
  0x8a   :  { %v49_v5 = vpop.f32.mrf.mxu0 }
  0x8b   :  { %v50_v6 = vadd.f32 %v70_v2, %v49_v5 }
  0x8d   :  { %54 = vst.msk [vmem:[%s109_s3 + $0x8] sm:$0xff] %vm52_vm1, %v50_v6 }

// kernel: seq2seq3d_forward.15
= control target key start
LH: loop header
LB: loop body
LE: loop exit
PB: predicated region body
PF: predicated region fallthrough
CT: control target
= control target key end

     0   :  { %vm25_vm0 = vcmask 1043456   ;;  %vm21_vm1 = vcmask 64512   ;;  %vm42_vm2 = vcmask 261120   ;;  %s82_s1 = inlined_call_operand.vmem [shape: bf16[8,32], index: 1, kind: input, shape index: {}]   ;;  %s83_s0 = inlined_call_operand.vmem [shape: bf16[8,8], index: 0, kind: input, shape index: {}]   ;;  %s84_s2 = inlined_call_operand.vmem [shape: f32[1,32], index: 2, kind: input, shape index: {}]   ;;  %s85_s3 = inlined_call_operand.vmem [shape: f32[8,32], index: 3, kind: output, shape index: {}]  }
   0x1   :  { %v16_v0 = vld [vmem:[%s82_s1] sm:$0xf] }
   0x2   :  { %v27_v1 = vsel %vm25_vm0, %v16_v0, 0  ;;  %v15_v2 = vld [vmem:[%s83_s0] sm:$0xf] }
   0x3   :  { %36 = vmatpush.bf16.msra.mxu0 %v27_v1  ;;  %v49_v3 = vld [vmem:[%s84_s2] ss:$0 sm:$0xff] }
   0x6   :  { %48 = vmatmul.msk.bf16.vlgmr.msra.gmra.mxu0 %vm21_vm1, %v15_v2 }
  0x83   :  { %v38_v4 = vpop.f32.mrf.mxu0 }
  0x84   :  { %v39_v5 = vadd.f32 %v49_v3, %v38_v4 }
  0x86   :  { %43 = vst.msk [vmem:[%s85_s3] sm:$0xff] %vm42_vm2, %v39_v5 }
  0x8b   :  { %v40_v6 = vpop.f32.mrf.mxu0 }

// kernel: seq2seq3d_forward.16
= control target key start
LH: loop header
LB: loop body
LE: loop exit
PB: predicated region body
PF: predicated region fallthrough
CT: control target
= control target key end

     0   :  { %vm25_vm0 = vcmask 1041408   ;;  %vm21_vm1 = vcmask 31744   ;;  %vm42_vm2 = vcmask 130048   ;;  %s82_s1 = inlined_call_operand.vmem [shape: bf16[4,16], index: 1, kind: input, shape index: {}]   ;;  %s83_s0 = inlined_call_operand.vmem [shape: bf16[8,4], index: 0, kind: input, shape index: {}]   ;;  %s84_s2 = inlined_call_operand.vmem [shape: f32[1,16], index: 2, kind: input, shape index: {}]   ;;  %s85_s3 = inlined_call_operand.vmem [shape: f32[8,16], index: 3, kind: output, shape index: {}]  }
   0x1   :  { %v16_v0 = vld [vmem:[%s82_s1] sm:$0x3] }
   0x2   :  { %v27_v1 = vsel %vm25_vm0, %v16_v0, 0  ;;  %v15_v2 = vld [vmem:[%s83_s0] sm:$0xf] }
   0x3   :  { %36 = vmatpush.bf16.msra.mxu0 %v27_v1  ;;  %v49_v3 = vld [vmem:[%s84_s2] ss:$0 sm:$0xff] }
   0x6   :  { %48 = vmatmul.msk.bf16.vlgmr.msra.gmra.mxu0 %vm21_vm1, %v15_v2 }
  0x83   :  { %v38_v4 = vpop.f32.mrf.mxu0 }
  0x84   :  { %v39_v5 = vadd.f32 %v49_v3, %v38_v4 }
  0x86   :  { %43 = vst.msk [vmem:[%s85_s3] sm:$0xff] %vm42_vm2, %v39_v5 }
  0x8b   :  { %v40_v6 = vpop.f32.mrf.mxu0 }

// kernel: seq2seq3d_forward.17
= control target key start
LH: loop header
LB: loop body
LE: loop exit
PB: predicated region body
PF: predicated region fallthrough
CT: control target
= control target key end

     0   :  { %vm156_vm0 = vcmask 1043456   ;;  %vm149_vm1 = vcmask 719872   ;;  %vm210_vm3 = vcmask 130048   ;;  %s426_s1 = inlined_call_operand.vmem [shape: bf16[216,16], index: 1, kind: input, shape index: {}]   ;;  %s427_s2 = inlined_call_operand.vmem [shape: f32[1,16], index: 2, kind: input, shape index: {}]   ;;  %s428_s0 = inlined_call_operand.vmem [shape: bf16[32,216], index: 0, kind: input, shape index: {}]   ;;  %s429_s3 = inlined_call_operand.vmem [shape: f32[32,16], index: 3, kind: output, shape index: {}]  }
   0x1   :  { %v300_v0 = vld [vmem:[%s426_s1 + $0x38] sm:$0xff]  ;;  %v45_v1 = vld [vmem:[%s426_s1 + $0x68] sm:$0xf]  ;;  %v299_v3 = vld [vmem:[%s426_s1 + $0x30] sm:$0xff] }
   0x2   :  { %v121_v2 = vunpack.c.l.b16 %v45_v1  ;;  %160 = vmatpush.bf16.msra.mxu0 %v300_v0  ;;  %306 = vmatpush.bf16.msra.mxu2 %v300_v0  ;;  %v305_v6 = vld [vmem:[%s426_s1 + $0x60] sm:$0xff]  ;;  %v298_v7 = vld [vmem:[%s426_s1 + $0x28] sm:$0xff]  ;;  %v304_v8 = vld [vmem:[%s426_s1 + $0x58] sm:$0xff] }
   0x3   :  { %v297_v9 = vld [vmem:[%s426_s1 + $0x20] sm:$0xff]  ;;  %v303_v10 = vld [vmem:[%s426_s1 + $0x50] sm:$0xff]  ;;  %v296_v11 = vld [vmem:[%s426_s1 + $0x18] sm:$0xff] }
   0x4   :  { %v135_v4 = vpack.c.b16 %v121_v2, %v121_v2  ;;  %v302_v12 = vld [vmem:[%s426_s1 + $0x48] sm:$0xff]  ;;  %v295_v13 = vld [vmem:[%s426_s1 + $0x10] sm:$0xff]  ;;  %v301_v14 = vld [vmem:[%s426_s1 + $0x40] sm:$0xff] }
   0x5   :  { %v294_v15 = vld [vmem:[%s426_s1 + $0x8] sm:$0xff]  ;;  %v291_v16 = vld [vmem:[%s428_s0 + $0x14] sm:$0xf]  ;;  %v231_v17 = vld [vmem:[%s428_s0 + $0x18] sm:$0xf0] }
   0x6   :  { %v158_v5 = vsel %vm156_vm0, %v135_v4, 0  ;;  %161 = vmatpush.bf16.msra.mxu0 %v299_v3  ;;  %307 = vmatpush.bf16.msra.mxu2 %v299_v3  ;;  %v289_v18 = vld [vmem:[%s428_s0 + $0x4] sm:$0xf]  ;;  %v223_v19 = vld [vmem:[%s428_s0 + $0x8] sm:$0xf0]  ;;  %v234_v20 = vor.u32 %v291_v16, %v231_v17 }
   0x7   :  { %314 = vmatpush.bf16.msra.mxu3 %v158_v5  ;;  %181 = vmatpush.bf16.msra.mxu1 %v158_v5  ;;  %v293_v21 = vld [vmem:[%s426_s1] sm:$0xff]  ;;  %v290_v23 = vld [vmem:[%s428_s0 + $0x4] sm:$0xf0]  ;;  %v226_v24 = vor.u32 %v289_v18, %v223_v19  ;;  %v229_v25 = vld [vmem:[%s428_s0 + $0x10] sm:$0xf] }
   0x8   :  { %v221_v22 = vld [vmem:[%s428_s0] sm:$0xf]  ;;  %v292_v26 = vld [vmem:[%s428_s0 + $0x14] sm:$0xf0] }
   0x9   :  { %v222_v27 = vor.u32 %v290_v23, %v221_v22  ;;  %v230_v28 = vor.u32 %v292_v26, %v229_v25  ;;  %v320_v29 = vld [vmem:[%s427_s2] ss:$0 sm:$0xff] }
   0xa   :  { %162 = vmatpush.bf16.msra.mxu0 %v298_v7  ;;  %308 = vmatpush.bf16.msra.mxu2 %v298_v7 }
   0xb   :  { %315 = vmatpush.bf16.msra.mxu3 %v305_v6  ;;  %182 = vmatpush.bf16.msra.mxu1 %v305_v6 }
   0xe   :  { %163 = vmatpush.bf16.msra.mxu0 %v297_v9  ;;  %309 = vmatpush.bf16.msra.mxu2 %v297_v9 }
   0xf   :  { %316 = vmatpush.bf16.msra.mxu3 %v304_v8  ;;  %183 = vmatpush.bf16.msra.mxu1 %v304_v8 }
  0x12   :  { %164 = vmatpush.bf16.msra.mxu0 %v296_v11  ;;  %310 = vmatpush.bf16.msra.mxu2 %v296_v11 }
  0x13   :  { %317 = vmatpush.bf16.msra.mxu3 %v303_v10  ;;  %184 = vmatpush.bf16.msra.mxu1 %v303_v10 }
  0x16   :  { %165 = vmatpush.bf16.msra.mxu0 %v295_v13  ;;  %311 = vmatpush.bf16.msra.mxu2 %v295_v13 }
  0x17   :  { %318 = vmatpush.bf16.msra.mxu3 %v302_v12  ;;  %185 = vmatpush.bf16.msra.mxu1 %v302_v12 }
  0x1a   :  { %166 = vmatpush.bf16.msra.mxu0 %v294_v15  ;;  %312 = vmatpush.bf16.msra.mxu2 %v294_v15 }
  0x1b   :  { %319 = vmatpush.bf16.msra.mxu3 %v301_v14  ;;  %186 = vmatpush.bf16.msra.mxu1 %v301_v14 }
  0x1e   :  { %288 = vmatmul.msk.bf16.vlgmr.msra.gmra.mxu3 %vm149_vm1, %v234_v20  ;;  %167 = vmatpush.bf16.msra.mxu0 %v293_v21 }
  0x1f   :  { %287 = vmatmul.msk.bf16.vlgmr.msra.gmra.mxu1 %vm149_vm1, %v226_v24  ;;  %313 = vmatpush.bf16.msra.mxu2 %v293_v21 }
  0x21   :  { %168 = vmatmul.bf16.vlgmr.msra.gmra.mxu0 %v222_v27 }
  0x22   :  { %173 = vmatmul.bf16.vlgmr.msra.gmra.mxu2 %v230_v28 }
  0x9c   :  { %v188_v31 = vpop.f32.mrf.mxu1 }
  0x9e   :  { %v169_v30 = vpop.f32.mrf.mxu0 }
  0x9f   :  { %v170_v32 = vadd.f32 %v320_v29, %v169_v30 }
  0xa1   :  { %v189_v33 = vadd.f32 %v188_v31, %v170_v32  ;;  %v193_v36 = vpop.f32.mrf.mxu3 }
  0xa3   :  { %vm198_vm2 = vcmp.gt.f32.partialorder %v189_v33, 0.0  ;;  %v202_v34 = vmul.f32 0.01, %v189_v33 }
  0xa4   :  { %v190_v42 = vpop.f32.mrf.mxu1 }
  0xa5   :  { %v206_v35 = vsel %vm198_vm2, %v189_v33, %v202_v34  ;;  %v174_v37 = vpop.f32.mrf.mxu2 }
  0xa6   :  { %211 = vst.msk [vmem:[%s429_s3] sm:$0xff] %vm210_vm3, %v206_v35  ;;  %v175_v38 = vadd.f32 %v320_v29, %v174_v37  ;;  %v171_v39 = vpop.f32.mrf.mxu0 }
  0xa7   :  { %v172_v40 = vadd.f32 %v320_v29, %v171_v39 }
  0xa8   :  { %v194_v41 = vadd.f32 %v193_v36, %v175_v38 }
  0xa9   :  { %v191_v43 = vadd.f32 %v190_v42, %v172_v40  ;;  %v195_v50 = vpop.f32.mrf.mxu3 }
  0xaa   :  { %vm200_vm4 = vcmp.gt.f32.partialorder %v194_v41, 0.0  ;;  %v204_v44 = vmul.f32 0.01, %v194_v41 }
  0xab   :  { %vm199_vm5 = vcmp.gt.f32.partialorder %v191_v43, 0.0  ;;  %v203_v45 = vmul.f32 0.01, %v191_v43 }
  0xac   :  { %v208_v46 = vsel %vm200_vm4, %v194_v41, %v204_v44 }
  0xad   :  { %213 = vst.msk [vmem:[%s429_s3 + $0x10] sm:$0xff] %vm210_vm3, %v208_v46  ;;  %v207_v47 = vsel %vm199_vm5, %v191_v43, %v203_v45  ;;  %v176_v48 = vpop.f32.mrf.mxu2 }
  0xae   :  { %212 = vst.msk [vmem:[%s429_s3 + $0x8] sm:$0xff] %vm210_vm3, %v207_v47  ;;  %v177_v49 = vadd.f32 %v320_v29, %v176_v48 }
  0xb0   :  { %v196_v51 = vadd.f32 %v195_v50, %v177_v49 }
  0xb2   :  { %vm201_vm6 = vcmp.gt.f32.partialorder %v196_v51, 0.0  ;;  %v205_v52 = vmul.f32 0.01, %v196_v51 }
  0xb4   :  { %v209_v53 = vsel %vm201_vm6, %v196_v51, %v205_v52 }
  0xb5   :  { %214 = vst.msk [vmem:[%s429_s3 + $0x18] sm:$0xff] %vm210_vm3, %v209_v53 }

// kernel: seq2seq3d_forward.19
= control target key start
LH: loop header
LB: loop body
LE: loop exit
PB: predicated region body
PF: predicated region fallthrough
CT: control target
= control target key end

     0   :  { %vm603_vm0 = vcmask 392192   ;;  %vm1104_vm2 = vcmask 64512   ;;  %s2279_s1 = inlined_call_operand.vmem [shape: bf16[432,8], index: 1, kind: input, shape index: {}]   ;;  %s2280_s0 = inlined_call_operand.vmem [shape: bf16[256,432], index: 0, kind: input, shape index: {}]   ;;  %s2281_s2 = inlined_call_operand.vmem [shape: f32[1,8], index: 2, kind: input, shape index: {}]   ;;  %s2282_s3 = inlined_call_operand.vmem [shape: f32[256,8], index: 3, kind: output, shape index: {}]  }
   0x1   :  { %v1592_v0 = vld [vmem:[%s2279_s1 + $0x38] sm:$0xff]  ;;  %v1591_v3 = vld [vmem:[%s2279_s1 + $0x30] sm:$0xff]  ;;  %v1590_v7 = vld [vmem:[%s2279_s1 + $0x28] sm:$0xff] }
   0x2   :  { %v1600_v1 = vld [vmem:[%s2279_s1 + $0x78] sm:$0xff]  ;;  %652 = vmatpush.bf16.msra.mxu0 %v1592_v0  ;;  %v1599_v4 = vld [vmem:[%s2279_s1 + $0x70] sm:$0xff]  ;;  %v1598_v8 = vld [vmem:[%s2279_s1 + $0x68] sm:$0xff] }
   0x3   :  { %v1608_v2 = vld [vmem:[%s2279_s1 + $0xb8] sm:$0xff]  ;;  %741 = vmatpush.bf16.msra.mxu1 %v1600_v1  ;;  %v1607_v5 = vld [vmem:[%s2279_s1 + $0xb0] sm:$0xff]  ;;  %v1606_v9 = vld [vmem:[%s2279_s1 + $0xa8] sm:$0xff] }
   0x4   :  { %830 = vmatpush.bf16.msra.mxu2 %v1608_v2  ;;  %v1611_v6 = vld [vmem:[%s2279_s1 + $0xd0] sm:$0xff]  ;;  %v1610_v10 = vld [vmem:[%s2279_s1 + $0xc8] sm:$0xff]  ;;  %v1589_v11 = vld [vmem:[%s2279_s1 + $0x20] sm:$0xff] }
   0x5   :  { %924 = vmatpush.bf16.msra.mxu3 %v1611_v6  ;;  %v1597_v12 = vld [vmem:[%s2279_s1 + $0x60] sm:$0xff]  ;;  %v1522_v15 = vld [vmem:[%s2280_s0 + $0xc] sm:$0xf]  ;;  %v1153_v16 = vld [vmem:[%s2280_s0 + $0x18] sm:$0xf0] }
   0x6   :  { %653 = vmatpush.bf16.msra.mxu0 %v1591_v3  ;;  %v1605_v13 = vld [vmem:[%s2279_s1 + $0xa0] sm:$0xff]  ;;  %v1588_v17 = vld [vmem:[%s2279_s1 + $0x18] sm:$0xff]  ;;  %v1156_v20 = vor.u32 %v1522_v15, %v1153_v16  ;;  %v1587_v21 = vld [vmem:[%s2279_s1 + $0x10] sm:$0xff] }
   0x7   :  { %742 = vmatpush.bf16.msra.mxu1 %v1599_v4  ;;  %v1609_v14 = vld [vmem:[%s2279_s1 + $0xc0] sm:$0xff]  ;;  %v1596_v18 = vld [vmem:[%s2279_s1 + $0x58] sm:$0xff]  ;;  %v1595_v22 = vld [vmem:[%s2279_s1 + $0x50] sm:$0xff] }
   0x8   :  { %831 = vmatpush.bf16.msra.mxu2 %v1607_v5  ;;  %v1604_v19 = vld [vmem:[%s2279_s1 + $0x98] sm:$0xff]  ;;  %v1603_v23 = vld [vmem:[%s2279_s1 + $0x90] sm:$0xff]  ;;  %v1586_v24 = vld [vmem:[%s2279_s1 + $0x8] sm:$0xff] }
   0x9   :  { %925 = vmatpush.bf16.msra.mxu3 %v1610_v10  ;;  %v1594_v25 = vld [vmem:[%s2279_s1 + $0x48] sm:$0xff]  ;;  %v1585_v27 = vld [vmem:[%s2279_s1] sm:$0xff]  ;;  %v1523_v30 = vld [vmem:[%s2280_s0 + $0xc] sm:$0xf0] }
   0xa   :  { %654 = vmatpush.bf16.msra.mxu0 %v1590_v7  ;;  %v1602_v26 = vld [vmem:[%s2279_s1 + $0x88] sm:$0xff]  ;;  %v1593_v28 = vld [vmem:[%s2279_s1 + $0x40] sm:$0xff]  ;;  %v1145_v32 = vld [vmem:[%s2280_s0 + $0x10] sm:$0xf0] }
   0xb   :  { %743 = vmatpush.bf16.msra.mxu1 %v1598_v8  ;;  %v1143_v29 = vld [vmem:[%s2280_s0] sm:$0xf]  ;;  %v1521_v31 = vld [vmem:[%s2280_s0 + $0x4] sm:$0xf]  ;;  %v1151_v34 = vld [vmem:[%s2280_s0 + $0x8] sm:$0xf] }
   0xc   :  { %832 = vmatpush.bf16.msra.mxu2 %v1606_v9  ;;  %v1601_v33 = vld [vmem:[%s2279_s1 + $0x80] sm:$0xff]  ;;  %v1524_v35 = vld [vmem:[%s2280_s0 + $0x14] sm:$0xf0]  ;;  %v1526_v36 = vld [vmem:[%s2280_s0 + $0x2c] sm:$0xf]  ;;  %v1144_v38 = vor.u32 %v1523_v30, %v1143_v29  ;;  %v1148_v39 = vor.u32 %v1521_v31, %v1145_v32 }
   0xd   :  { %926 = vmatpush.bf16.msra.mxu3 %v1609_v14  ;;  %v1169_v37 = vld [vmem:[%s2280_s0 + $0x38] sm:$0xf0]  ;;  %v1152_v40 = vor.u32 %v1524_v35, %v1151_v34  ;;  %v1159_v42 = vld [vmem:[%s2280_s0 + $0x20] sm:$0xf]  ;;  %v1527_v43 = vld [vmem:[%s2280_s0 + $0x2c] sm:$0xf0] }
   0xe   :  { %655 = vmatpush.bf16.msra.mxu0 %v1589_v11  ;;  %v1172_v41 = vor.u32 %v1526_v36, %v1169_v37  ;;  %v1525_v44 = vld [vmem:[%s2280_s0 + $0x24] sm:$0xf]  ;;  %v1161_v45 = vld [vmem:[%s2280_s0 + $0x30] sm:$0xf0]  ;;  %v1167_v46 = vld [vmem:[%s2280_s0 + $0x28] sm:$0xf]  ;;  %v1160_v50 = vor.u32 %v1527_v43, %v1159_v42 }
   0xf   :  { %744 = vmatpush.bf16.msra.mxu1 %v1597_v12  ;;  %v1528_v47 = vld [vmem:[%s2280_s0 + $0x34] sm:$0xf0]  ;;  %v1530_v48 = vld [vmem:[%s2280_s0 + $0x4c] sm:$0xf]  ;;  %v1185_v49 = vld [vmem:[%s2280_s0 + $0x58] sm:$0xf0]  ;;  %v1164_v51 = vor.u32 %v1525_v44, %v1161_v45 }
  0x10   :  { %833 = vmatpush.bf16.msra.mxu2 %v1605_v13  ;;  %1505 = vmatmul.msk.bf16.vlgmr.msra.gmra.mxu3 %vm603_vm0, %v1156_v20  ;;  %v1168_v52 = vor.u32 %v1528_v47, %v1167_v46  ;;  %v1188_v53 = vor.u32 %v1530_v48, %v1185_v49  ;;  %v1175_v54 = vld [vmem:[%s2280_s0 + $0x40] sm:$0xf]  ;;  %v1531_v55 = vld [vmem:[%s2280_s0 + $0x4c] sm:$0xf0]  ;;  %v1529_v56 = vld [vmem:[%s2280_s0 + $0x44] sm:$0xf] }
  0x11   :  { %v1177_v57 = vld [vmem:[%s2280_s0 + $0x50] sm:$0xf0]  ;;  %v1183_v58 = vld [vmem:[%s2280_s0 + $0x48] sm:$0xf]  ;;  %v1532_v59 = vld [vmem:[%s2280_s0 + $0x54] sm:$0xf0]  ;;  %v1176_v62 = vor.u32 %v1531_v55, %v1175_v54 }
  0x12   :  { %656 = vmatpush.bf16.msra.mxu0 %v1588_v17  ;;  %v1534_v60 = vld [vmem:[%s2280_s0 + $0x6c] sm:$0xf]  ;;  %v1201_v61 = vld [vmem:[%s2280_s0 + $0x78] sm:$0xf0]  ;;  %v1180_v63 = vor.u32 %v1529_v56, %v1177_v57  ;;  %v1184_v0 = vor.u32 %v1532_v59, %v1183_v58  ;;  %v1191_v2 = vld [vmem:[%s2280_s0 + $0x60] sm:$0xf] }
  0x13   :  { %745 = vmatpush.bf16.msra.mxu1 %v1596_v18  ;;  %v1204_v1 = vor.u32 %v1534_v60, %v1201_v61  ;;  %v1535_v3 = vld [vmem:[%s2280_s0 + $0x6c] sm:$0xf0]  ;;  %v1533_v4 = vld [vmem:[%s2280_s0 + $0x64] sm:$0xf]  ;;  %v1193_v5 = vld [vmem:[%s2280_s0 + $0x70] sm:$0xf0] }
  0x14   :  { %834 = vmatpush.bf16.msra.mxu2 %v1604_v19  ;;  %v1199_v6 = vld [vmem:[%s2280_s0 + $0x68] sm:$0xf]  ;;  %v1536_v7 = vld [vmem:[%s2280_s0 + $0x74] sm:$0xf0]  ;;  %v1538_v8 = vld [vmem:[%s2280_s0 + $0x8c] sm:$0xf]  ;;  %v1192_v10 = vor.u32 %v1535_v3, %v1191_v2  ;;  %v1196_v11 = vor.u32 %v1533_v4, %v1193_v5 }
  0x15   :  { %v1217_v9 = vld [vmem:[%s2280_s0 + $0x98] sm:$0xf0]  ;;  %v1200_v12 = vor.u32 %v1536_v7, %v1199_v6  ;;  %v1207_v14 = vld [vmem:[%s2280_s0 + $0x80] sm:$0xf]  ;;  %v1539_v15 = vld [vmem:[%s2280_s0 + $0x8c] sm:$0xf0] }
  0x16   :  { %657 = vmatpush.bf16.msra.mxu0 %v1587_v21  ;;  %v1220_v13 = vor.u32 %v1538_v8, %v1217_v9  ;;  %v1537_v16 = vld [vmem:[%s2280_s0 + $0x84] sm:$0xf]  ;;  %v1209_v17 = vld [vmem:[%s2280_s0 + $0x90] sm:$0xf0]  ;;  %v1215_v18 = vld [vmem:[%s2280_s0 + $0x88] sm:$0xf] }
  0x17   :  { %746 = vmatpush.bf16.msra.mxu1 %v1595_v22  ;;  %v1540_v19 = vld [vmem:[%s2280_s0 + $0x94] sm:$0xf0]  ;;  %v1542_v20 = vld [vmem:[%s2280_s0 + $0xac] sm:$0xf]  ;;  %v1233_v21 = vld [vmem:[%s2280_s0 + $0xb8] sm:$0xf0]  ;;  %v1208_v22 = vor.u32 %v1539_v15, %v1207_v14 }
  0x18   :  { %835 = vmatpush.bf16.msra.mxu2 %v1603_v23  ;;  %v1212_v23 = vor.u32 %v1537_v16, %v1209_v17  ;;  %v1225_v29 = vld [vmem:[%s2280_s0 + $0xb0] sm:$0xf0]  ;;  %v1231_v30 = vld [vmem:[%s2280_s0 + $0xa8] sm:$0xf]  ;;  %v1544_v31 = vld [vmem:[%s2280_s0 + $0xb4] sm:$0xf0] }
  0x19   :  { %v1546_v32 = vld [vmem:[%s2280_s0 + $0xcc] sm:$0xf]  ;;  %v1232_v36 = vor.u32 %v1544_v31, %v1231_v30  ;;  %v1247_v42 = vld [vmem:[%s2280_s0 + $0xc8] sm:$0xf]  ;;  %v1548_v43 = vld [vmem:[%s2280_s0 + $0xd4] sm:$0xf0] }
  0x1a   :  { %658 = vmatpush.bf16.msra.mxu0 %v1586_v24  ;;  %v1216_v24 = vor.u32 %v1540_v19, %v1215_v18  ;;  %v1550_v44 = vld [vmem:[%s2280_s0 + $0xec] sm:$0xf]  ;;  %v1265_v45 = vld [vmem:[%s2280_s0 + $0xf8] sm:$0xf0]  ;;  %v1248_v48 = vor.u32 %v1548_v43, %v1247_v42  ;;  %v1263_v54 = vld [vmem:[%s2280_s0 + $0xe8] sm:$0xf] }
  0x1b   :  { %747 = vmatpush.bf16.msra.mxu1 %v1594_v25  ;;  %v1236_v25 = vor.u32 %v1542_v20, %v1233_v21  ;;  %v1268_v49 = vor.u32 %v1550_v44, %v1265_v45  ;;  %v1552_v55 = vld [vmem:[%s2280_s0 + $0xf4] sm:$0xf0]  ;;  %v1554_v56 = vld [vmem:[%s2280_s0 + $0x10c] sm:$0xf]  ;;  %v1281_v57 = vld [vmem:[%s2280_s0 + $0x118] sm:$0xf0] }
  0x1c   :  { %836 = vmatpush.bf16.msra.mxu2 %v1602_v26  ;;  %v1223_v26 = vld [vmem:[%s2280_s0 + $0xa0] sm:$0xf]  ;;  %v1264_v60 = vor.u32 %v1552_v55, %v1263_v54  ;;  %v1284_v61 = vor.u32 %v1554_v56, %v1281_v57  ;;  %v1273_v2 = vld [vmem:[%s2280_s0 + $0x110] sm:$0xf0]  ;;  %v1279_v4 = vld [vmem:[%s2280_s0 + $0x108] sm:$0xf] }
  0x1d   :  { %v1936_v3 = vld [vmem:[%s2281_s2] ss:$0 sm:$0xff]  ;;  %v1556_v5 = vld [vmem:[%s2280_s0 + $0x114] sm:$0xf0]  ;;  %v1558_v6 = vld [vmem:[%s2280_s0 + $0x12c] sm:$0xf] }
  0x1e   :  { %659 = vmatpush.bf16.msra.mxu0 %v1585_v27  ;;  %v1543_v27 = vld [vmem:[%s2280_s0 + $0xac] sm:$0xf0]  ;;  %v1297_v7 = vld [vmem:[%s2280_s0 + $0x138] sm:$0xf0]  ;;  %v1560_v30 = vld [vmem:[%s2280_s0 + $0x134] sm:$0xf0] }
  0x1f   :  { %748 = vmatpush.bf16.msra.mxu1 %v1593_v28  ;;  %v1541_v28 = vld [vmem:[%s2280_s0 + $0xa4] sm:$0xf]  ;;  %v1224_v34 = vor.u32 %v1543_v27, %v1223_v26  ;;  %v1300_v15 = vor.u32 %v1558_v6, %v1297_v7  ;;  %v1303_v56 = vld [vmem:[%s2280_s0 + $0x140] sm:$0xf]  ;;  %v1563_v57 = vld [vmem:[%s2280_s0 + $0x14c] sm:$0xf0] }
  0x20   :  { %837 = vmatpush.bf16.msra.mxu2 %v1601_v33  ;;  %1506 = vmatmul.msk.bf16.gmra.mxu3 %vm603_vm0, %v1172_v41  ;;  %v1249_v33 = vld [vmem:[%s2280_s0 + $0xd8] sm:$0xf0]  ;;  %v1228_v35 = vor.u32 %v1541_v28, %v1225_v29  ;;  %v1241_v41 = vld [vmem:[%s2280_s0 + $0xd0] sm:$0xf0]  ;;  %v1557_v26 = vld [vmem:[%s2280_s0 + $0x124] sm:$0xf] }
  0x21   :  { %660 = vmatmul.bf16.vlgmr.msra.gmra.mxu0 %v1144_v38  ;;  %v1252_v37 = vor.u32 %v1546_v32, %v1249_v33  ;;  %v1239_v38 = vld [vmem:[%s2280_s0 + $0xc0] sm:$0xf]  ;;  %v1289_v28 = vld [vmem:[%s2280_s0 + $0x130] sm:$0xf0]  ;;  %v1295_v29 = vld [vmem:[%s2280_s0 + $0x128] sm:$0xf] }
  0x22   :  { %749 = vmatmul.bf16.vlgmr.msra.gmra.mxu1 %v1148_v39  ;;  %v1547_v39 = vld [vmem:[%s2280_s0 + $0xcc] sm:$0xf0]  ;;  %v1562_v33 = vld [vmem:[%s2280_s0 + $0x14c] sm:$0xf] }
  0x23   :  { %838 = vmatmul.bf16.vlgmr.msra.gmra.mxu2 %v1152_v40  ;;  %v1545_v40 = vld [vmem:[%s2280_s0 + $0xc4] sm:$0xf]  ;;  %v1240_v46 = vor.u32 %v1547_v39, %v1239_v38 }
  0x24   :  { %v1244_v47 = vor.u32 %v1545_v40, %v1241_v41  ;;  %v1296_v41 = vor.u32 %v1560_v30, %v1295_v29  ;;  %v1321_v29 = vld [vmem:[%s2280_s0 + $0x170] sm:$0xf0]  ;;  %v1327_v30 = vld [vmem:[%s2280_s0 + $0x168] sm:$0xf] }
  0x30   :  { %1507 = vmatmul.msk.bf16.gmra.mxu3 %vm603_vm0, %v1188_v53  ;;  %v1257_v53 = vld [vmem:[%s2280_s0 + $0xf0] sm:$0xf0] }
  0x31   :  { %665 = vmatmul.bf16.gmra.mxu0 %v1160_v50  ;;  %v1255_v50 = vld [vmem:[%s2280_s0 + $0xe0] sm:$0xf] }
  0x32   :  { %754 = vmatmul.bf16.gmra.mxu1 %v1164_v51  ;;  %v1551_v51 = vld [vmem:[%s2280_s0 + $0xec] sm:$0xf0] }
  0x33   :  { %843 = vmatmul.bf16.gmra.mxu2 %v1168_v52  ;;  %v1549_v52 = vld [vmem:[%s2280_s0 + $0xe4] sm:$0xf]  ;;  %v1256_v58 = vor.u32 %v1551_v51, %v1255_v50 }
  0x34   :  { %v1260_v59 = vor.u32 %v1549_v52, %v1257_v53 }
  0x40   :  { %1508 = vmatmul.msk.bf16.gmra.mxu3 %vm603_vm0, %v1204_v1  ;;  %v1553_v1 = vld [vmem:[%s2280_s0 + $0x104] sm:$0xf] }
  0x41   :  { %670 = vmatmul.bf16.gmra.mxu0 %v1176_v62  ;;  %v1276_v9 = vor.u32 %v1553_v1, %v1273_v2  ;;  %v1566_v1 = vld [vmem:[%s2280_s0 + $0x16c] sm:$0xf]  ;;  %v1329_v2 = vld [vmem:[%s2280_s0 + $0x178] sm:$0xf0] }
  0x42   :  { %759 = vmatmul.bf16.gmra.mxu1 %v1180_v63  ;;  %v1271_v63 = vld [vmem:[%s2280_s0 + $0x100] sm:$0xf] }
  0x43   :  { %848 = vmatmul.bf16.gmra.mxu2 %v1184_v0  ;;  %v1555_v0 = vld [vmem:[%s2280_s0 + $0x10c] sm:$0xf0] }
  0x44   :  { %v1272_v8 = vor.u32 %v1555_v0, %v1271_v63 }
  0x50   :  { %1509 = vmatmul.msk.bf16.gmra.mxu3 %vm603_vm0, %v1220_v13 }
  0x51   :  { %675 = vmatmul.bf16.gmra.mxu0 %v1192_v10 }
  0x52   :  { %764 = vmatmul.bf16.gmra.mxu1 %v1196_v11 }
  0x53   :  { %853 = vmatmul.bf16.gmra.mxu2 %v1200_v12  ;;  %v1280_v12 = vor.u32 %v1556_v5, %v1279_v4  ;;  %v1304_v5 = vor.u32 %v1563_v57, %v1303_v56  ;;  %v1335_v57 = vld [vmem:[%s2280_s0 + $0x180] sm:$0xf] }
  0x60   :  { %1510 = vmatmul.msk.bf16.gmra.mxu3 %vm603_vm0, %v1236_v25  ;;  %v1559_v25 = vld [vmem:[%s2280_s0 + $0x12c] sm:$0xf0] }
  0x61   :  { %680 = vmatmul.bf16.gmra.mxu0 %v1208_v22 }
  0x62   :  { %769 = vmatmul.bf16.gmra.mxu1 %v1212_v23 }
  0x63   :  { %858 = vmatmul.bf16.gmra.mxu2 %v1216_v24  ;;  %v1287_v24 = vld [vmem:[%s2280_s0 + $0x120] sm:$0xf] }
  0x70   :  { %1511 = vmatmul.msk.bf16.gmra.mxu3 %vm603_vm0, %v1252_v37  ;;  %v1292_v37 = vor.u32 %v1557_v26, %v1289_v28  ;;  %v1567_v26 = vld [vmem:[%s2280_s0 + $0x16c] sm:$0xf0] }
  0x71   :  { %685 = vmatmul.bf16.gmra.mxu0 %v1224_v34  ;;  %v1313_v34 = vld [vmem:[%s2280_s0 + $0x158] sm:$0xf0] }
  0x72   :  { %774 = vmatmul.bf16.gmra.mxu1 %v1228_v35  ;;  %v1316_v44 = vor.u32 %v1562_v33, %v1313_v34  ;;  %v1570_v34 = vld [vmem:[%s2280_s0 + $0x18c] sm:$0xf] }
  0x73   :  { %863 = vmatmul.bf16.gmra.mxu2 %v1232_v36  ;;  %v1288_v36 = vor.u32 %v1559_v25, %v1287_v24  ;;  %v1319_v25 = vld [vmem:[%s2280_s0 + $0x160] sm:$0xf] }
  0x80   :  { %1512 = vmatmul.msk.bf16.gmra.mxu3 %vm603_vm0, %v1268_v49 }
  0x81   :  { %690 = vmatmul.bf16.gmra.mxu0 %v1240_v46 }
  0x82   :  { %779 = vmatmul.bf16.gmra.mxu1 %v1244_v47 }
  0x83   :  { %868 = vmatmul.bf16.gmra.mxu2 %v1248_v48 }
  0x90   :  { %1513 = vmatmul.msk.bf16.gmra.mxu3 %vm603_vm0, %v1284_v61  ;;  %v1311_v61 = vld [vmem:[%s2280_s0 + $0x148] sm:$0xf] }
  0x91   :  { %695 = vmatmul.bf16.gmra.mxu0 %v1256_v58  ;;  %v1561_v58 = vld [vmem:[%s2280_s0 + $0x144] sm:$0xf] }
  0x92   :  { %784 = vmatmul.bf16.gmra.mxu1 %v1260_v59 }
  0x93   :  { %873 = vmatmul.bf16.gmra.mxu2 %v1264_v60  ;;  %v928_v62 = vpop.f32.mrf.mxu3  ;;  %v1305_v60 = vld [vmem:[%s2280_s0 + $0x150] sm:$0xf0] }
  0x94   :  { %v1308_v6 = vor.u32 %v1561_v58, %v1305_v60  ;;  %v1571_v58 = vld [vmem:[%s2280_s0 + $0x18c] sm:$0xf0] }
  0x9b   :  { %v930_v14 = vpop.f32.mrf.mxu3 }
  0x9e   :  { %v661_v10 = vpop.f32.mrf.mxu0 }
  0x9f   :  { %v750_v11 = vpop.f32.mrf.mxu1  ;;  %v662_v13 = vadd.f32 %v1936_v3, %v661_v10 }
  0xa0   :  { %1514 = vmatmul.msk.bf16.gmra.mxu3 %vm603_vm0, %v1300_v15 }
  0xa1   :  { %700 = vmatmul.bf16.gmra.mxu0 %v1272_v8  ;;  %v751_v16 = vadd.f32 %v750_v11, %v662_v13  ;;  %v1332_v13 = vor.u32 %v1566_v1, %v1329_v2  ;;  %v1574_v2 = vld [vmem:[%s2280_s0 + $0x1ac] sm:$0xf] }
  0xa2   :  { %789 = vmatmul.bf16.gmra.mxu1 %v1276_v9 }
  0xa3   :  { %878 = vmatmul.bf16.gmra.mxu2 %v1280_v12  ;;  %v933_v21 = vpop.f32.mrf.mxu3 }
  0xa6   :  { %v839_v17 = vpop.f32.mrf.mxu2  ;;  %v663_v19 = vpop.f32.mrf.mxu0 }
  0xa7   :  { %v840_v18 = vadd.f32 %v839_v17, %v751_v16  ;;  %v752_v20 = vpop.f32.mrf.mxu1  ;;  %v664_v23 = vadd.f32 %v1936_v3, %v663_v19 }
  0xa9   :  { %v929_v22 = vadd.f32 %v928_v62, %v840_v18  ;;  %v753_v32 = vadd.f32 %v752_v20, %v664_v23  ;;  %v1564_v62 = vld [vmem:[%s2280_s0 + $0x154] sm:$0xf0] }
  0xaa   :  { %v1312_v10 = vor.u32 %v1564_v62, %v1311_v61  ;;  %v1337_v61 = vld [vmem:[%s2280_s0 + $0x190] sm:$0xf0]  ;;  %v1343_v62 = vld [vmem:[%s2280_s0 + $0x188] sm:$0xf] }
  0xab   :  { %vm1008_vm1 = vcmp.gt.f32.partialorder %v929_v22, 0.0  ;;  %v1040_v27 = vmul.f32 0.01, %v929_v22  ;;  %v935_v43 = vpop.f32.mrf.mxu3 }
  0xad   :  { %v1072_v31 = vsel %vm1008_vm1, %v929_v22, %v1040_v27  ;;  %v1565_v27 = vld [vmem:[%s2280_s0 + $0x164] sm:$0xf] }
  0xae   :  { %1105 = vst.msk [vmem:[%s2282_s3] sm:$0xff] %vm1104_vm2, %v1072_v31  ;;  %v841_v35 = vpop.f32.mrf.mxu2  ;;  %v666_v39 = vpop.f32.mrf.mxu0  ;;  %v1568_v31 = vld [vmem:[%s2280_s0 + $0x174] sm:$0xf0] }
  0xaf   :  { %v842_v38 = vadd.f32 %v841_v35, %v753_v32  ;;  %v755_v40 = vpop.f32.mrf.mxu1  ;;  %v667_v42 = vadd.f32 %v1936_v3, %v666_v39  ;;  %v1345_v35 = vld [vmem:[%s2280_s0 + $0x198] sm:$0xf0] }
  0xb0   :  { %1515 = vmatmul.msk.bf16.gmra.mxu3 %vm603_vm0, %v1316_v44 }
  0xb1   :  { %v931_v45 = vadd.f32 %v930_v14, %v842_v38  ;;  %705 = vmatmul.bf16.gmra.mxu0 %v1288_v36  ;;  %v756_v47 = vadd.f32 %v755_v40, %v667_v42  ;;  %v1324_v38 = vor.u32 %v1565_v27, %v1321_v29  ;;  %v1328_v42 = vor.u32 %v1568_v31, %v1327_v30  ;;  %v1575_v27 = vld [vmem:[%s2280_s0 + $0x1ac] sm:$0xf0]  ;;  %v1353_v30 = vld [vmem:[%s2280_s0 + $0x1b0] sm:$0xf0]  ;;  %v1359_v31 = vld [vmem:[%s2280_s0 + $0x1a8] sm:$0xf] }
  0xb2   :  { %794 = vmatmul.bf16.gmra.mxu1 %v1292_v37  ;;  %v1320_v37 = vor.u32 %v1567_v26, %v1319_v25  ;;  %v1351_v26 = vld [vmem:[%s2280_s0 + $0x1a0] sm:$0xf] }
  0xb3   :  { %vm1009_vm3 = vcmp.gt.f32.partialorder %v931_v45, 0.0  ;;  %v1041_v46 = vmul.f32 0.01, %v931_v45  ;;  %883 = vmatmul.bf16.gmra.mxu2 %v1296_v41  ;;  %v938_v53 = vpop.f32.mrf.mxu3 }
  0xb5   :  { %v1073_v48 = vsel %vm1009_vm3, %v931_v45, %v1041_v46  ;;  %v1348_v45 = vor.u32 %v1570_v34, %v1345_v35  ;;  %v1578_v35 = vld [vmem:[%s2280_s0 + $0x1cc] sm:$0xf] }
  0xb6   :  { %1106 = vst.msk [vmem:[%s2282_s3 + $0x8] sm:$0xff] %vm1104_vm2, %v1073_v48  ;;  %v844_v49 = vpop.f32.mrf.mxu2  ;;  %v668_v51 = vpop.f32.mrf.mxu0 }
  0xb7   :  { %v845_v50 = vadd.f32 %v844_v49, %v756_v47  ;;  %v757_v52 = vpop.f32.mrf.mxu1  ;;  %v669_v55 = vadd.f32 %v1936_v3, %v668_v51 }
  0xb9   :  { %v934_v54 = vadd.f32 %v933_v21, %v845_v50  ;;  %v758_v0 = vadd.f32 %v757_v52, %v669_v55 }
  0xbb   :  { %vm1010_vm4 = vcmp.gt.f32.partialorder %v934_v54, 0.0  ;;  %v1042_v59 = vmul.f32 0.01, %v934_v54  ;;  %v940_v12 = vpop.f32.mrf.mxu3 }
  0xbd   :  { %v1074_v63 = vsel %vm1010_vm4, %v934_v54, %v1042_v59  ;;  %v1569_v59 = vld [vmem:[%s2280_s0 + $0x184] sm:$0xf] }
  0xbe   :  { %1107 = vst.msk [vmem:[%s2282_s3 + $0x10] sm:$0xff] %vm1104_vm2, %v1074_v63  ;;  %v846_v4 = vpop.f32.mrf.mxu2  ;;  %v671_v8 = vpop.f32.mrf.mxu0  ;;  %v1572_v63 = vld [vmem:[%s2280_s0 + $0x194] sm:$0xf0] }
  0xbf   :  { %v847_v7 = vadd.f32 %v846_v4, %v758_v0  ;;  %v760_v9 = vpop.f32.mrf.mxu1  ;;  %v672_v11 = vadd.f32 %v1936_v3, %v671_v8  ;;  %v1361_v4 = vld [vmem:[%s2280_s0 + $0x1b8] sm:$0xf0] }
  0xc0   :  { %1516 = vmatmul.msk.bf16.gmra.mxu3 %vm603_vm0, %v1332_v13 }
  0xc1   :  { %v936_v14 = vadd.f32 %v935_v43, %v847_v7  ;;  %710 = vmatmul.bf16.gmra.mxu0 %v1304_v5  ;;  %v761_v16 = vadd.f32 %v760_v9, %v672_v11  ;;  %v1340_v7 = vor.u32 %v1569_v59, %v1337_v61  ;;  %v1344_v11 = vor.u32 %v1572_v63, %v1343_v62  ;;  %v1579_v59 = vld [vmem:[%s2280_s0 + $0x1cc] sm:$0xf0]  ;;  %v1369_v62 = vld [vmem:[%s2280_s0 + $0x1d0] sm:$0xf0]  ;;  %v1375_v63 = vld [vmem:[%s2280_s0 + $0x1c8] sm:$0xf] }
  0xc2   :  { %799 = vmatmul.bf16.gmra.mxu1 %v1308_v6  ;;  %v1336_v6 = vor.u32 %v1571_v58, %v1335_v57  ;;  %v1367_v58 = vld [vmem:[%s2280_s0 + $0x1c0] sm:$0xf] }
  0xc3   :  { %vm1011_vm5 = vcmp.gt.f32.partialorder %v936_v14, 0.0  ;;  %v1043_v15 = vmul.f32 0.01, %v936_v14  ;;  %888 = vmatmul.bf16.gmra.mxu2 %v1312_v10  ;;  %v943_v22 = vpop.f32.mrf.mxu3 }
  0xc5   :  { %v1075_v17 = vsel %vm1011_vm5, %v936_v14, %v1043_v15  ;;  %v1364_v14 = vor.u32 %v1574_v2, %v1361_v4  ;;  %v1582_v4 = vld [vmem:[%s2280_s0 + $0x1ec] sm:$0xf] }
  0xc6   :  { %1108 = vst.msk [vmem:[%s2282_s3 + $0x18] sm:$0xff] %vm1104_vm2, %v1075_v17  ;;  %v849_v18 = vpop.f32.mrf.mxu2  ;;  %v673_v20 = vpop.f32.mrf.mxu0 }
  0xc7   :  { %v850_v19 = vadd.f32 %v849_v18, %v761_v16  ;;  %v762_v21 = vpop.f32.mrf.mxu1  ;;  %v674_v24 = vadd.f32 %v1936_v3, %v673_v20 }
  0xc9   :  { %v939_v23 = vadd.f32 %v938_v53, %v850_v19  ;;  %v763_v33 = vadd.f32 %v762_v21, %v674_v24 }
  0xcb   :  { %vm1012_vm6 = vcmp.gt.f32.partialorder %v939_v23, 0.0  ;;  %v1044_v28 = vmul.f32 0.01, %v939_v23  ;;  %v945_v44 = vpop.f32.mrf.mxu3 }
  0xcd   :  { %v1076_v32 = vsel %vm1012_vm6, %v939_v23, %v1044_v28  ;;  %v1573_v28 = vld [vmem:[%s2280_s0 + $0x1a4] sm:$0xf] }
  0xce   :  { %1109 = vst.msk [vmem:[%s2282_s3 + $0x20] sm:$0xff] %vm1104_vm2, %v1076_v32  ;;  %v851_v36 = vpop.f32.mrf.mxu2  ;;  %v676_v40 = vpop.f32.mrf.mxu0  ;;  %v1576_v32 = vld [vmem:[%s2280_s0 + $0x1b4] sm:$0xf0] }
  0xcf   :  { %v852_v39 = vadd.f32 %v851_v36, %v763_v33  ;;  %v765_v41 = vpop.f32.mrf.mxu1  ;;  %v677_v43 = vadd.f32 %v1936_v3, %v676_v40  ;;  %v1377_v36 = vld [vmem:[%s2280_s0 + $0x1d8] sm:$0xf0] }
  0xd0   :  { %1517 = vmatmul.msk.bf16.gmra.mxu3 %vm603_vm0, %v1348_v45 }
  0xd1   :  { %v941_v46 = vadd.f32 %v940_v12, %v852_v39  ;;  %715 = vmatmul.bf16.gmra.mxu0 %v1320_v37  ;;  %v766_v48 = vadd.f32 %v765_v41, %v677_v43  ;;  %v1356_v39 = vor.u32 %v1573_v28, %v1353_v30  ;;  %v1360_v43 = vor.u32 %v1576_v32, %v1359_v31  ;;  %v1583_v28 = vld [vmem:[%s2280_s0 + $0x1ec] sm:$0xf0]  ;;  %v1385_v31 = vld [vmem:[%s2280_s0 + $0x1f0] sm:$0xf0]  ;;  %v1391_v32 = vld [vmem:[%s2280_s0 + $0x1e8] sm:$0xf] }
  0xd2   :  { %804 = vmatmul.bf16.gmra.mxu1 %v1324_v38  ;;  %v1352_v38 = vor.u32 %v1575_v27, %v1351_v26  ;;  %v1383_v27 = vld [vmem:[%s2280_s0 + $0x1e0] sm:$0xf] }
  0xd3   :  { %vm1013_vm7 = vcmp.gt.f32.partialorder %v941_v46, 0.0  ;;  %v1045_v47 = vmul.f32 0.01, %v941_v46  ;;  %893 = vmatmul.bf16.gmra.mxu2 %v1328_v42  ;;  %v948_v54 = vpop.f32.mrf.mxu3 }
  0xd5   :  { %v1077_v49 = vsel %vm1013_vm7, %v941_v46, %v1045_v47  ;;  %v1380_v46 = vor.u32 %v1578_v35, %v1377_v36 }
  0xd6   :  { %1110 = vst.msk [vmem:[%s2282_s3 + $0x28] sm:$0xff] %vm1104_vm2, %v1077_v49  ;;  %v854_v50 = vpop.f32.mrf.mxu2  ;;  %v678_v52 = vpop.f32.mrf.mxu0 }
  0xd7   :  { %v855_v51 = vadd.f32 %v854_v50, %v766_v48  ;;  %v767_v53 = vpop.f32.mrf.mxu1  ;;  %v679_v56 = vadd.f32 %v1936_v3, %v678_v52 }
  0xd9   :  { %v944_v55 = vadd.f32 %v943_v22, %v855_v51  ;;  %v768_v1 = vadd.f32 %v767_v53, %v679_v56 }
  0xdb   :  { %vm1014_vm8 = vcmp.gt.f32.partialorder %v944_v55, 0.0  ;;  %v1046_v60 = vmul.f32 0.01, %v944_v55  ;;  %v950_v13 = vpop.f32.mrf.mxu3 }
  0xdd   :  { %v1078_v0 = vsel %vm1014_vm8, %v944_v55, %v1046_v60  ;;  %v1577_v60 = vld [vmem:[%s2280_s0 + $0x1c4] sm:$0xf] }
  0xde   :  { %1111 = vst.msk [vmem:[%s2282_s3 + $0x30] sm:$0xff] %vm1104_vm2, %v1078_v0  ;;  %v856_v5 = vpop.f32.mrf.mxu2  ;;  %v681_v9 = vpop.f32.mrf.mxu0  ;;  %v1580_v0 = vld [vmem:[%s2280_s0 + $0x1d4] sm:$0xf0] }
  0xdf   :  { %v857_v8 = vadd.f32 %v856_v5, %v768_v1  ;;  %v770_v10 = vpop.f32.mrf.mxu1  ;;  %v682_v12 = vadd.f32 %v1936_v3, %v681_v9  ;;  %v1393_v5 = vld [vmem:[%s2280_s0 + $0x1f8] sm:$0xf0] }
  0xe0   :  { %1518 = vmatmul.msk.bf16.gmra.mxu3 %vm603_vm0, %v1364_v14 }
  0xe1   :  { %v946_v15 = vadd.f32 %v945_v44, %v857_v8  ;;  %720 = vmatmul.bf16.gmra.mxu0 %v1336_v6  ;;  %v771_v17 = vadd.f32 %v770_v10, %v682_v12  ;;  %v1372_v8 = vor.u32 %v1577_v60, %v1369_v62  ;;  %v1376_v12 = vor.u32 %v1580_v0, %v1375_v63 }
  0xe2   :  { %809 = vmatmul.bf16.gmra.mxu1 %v1340_v7  ;;  %v1368_v7 = vor.u32 %v1579_v59, %v1367_v58 }
  0xe3   :  { %vm1015_vm9 = vcmp.gt.f32.partialorder %v946_v15, 0.0  ;;  %v1047_v16 = vmul.f32 0.01, %v946_v15  ;;  %898 = vmatmul.bf16.gmra.mxu2 %v1344_v11  ;;  %v953_v23 = vpop.f32.mrf.mxu3 }
  0xe5   :  { %v1079_v18 = vsel %vm1015_vm9, %v946_v15, %v1047_v16  ;;  %v1396_v15 = vor.u32 %v1582_v4, %v1393_v5 }
  0xe6   :  { %1112 = vst.msk [vmem:[%s2282_s3 + $0x38] sm:$0xff] %vm1104_vm2, %v1079_v18  ;;  %v859_v19 = vpop.f32.mrf.mxu2  ;;  %v683_v21 = vpop.f32.mrf.mxu0 }
  0xe7   :  { %v860_v20 = vadd.f32 %v859_v19, %v771_v17  ;;  %v772_v22 = vpop.f32.mrf.mxu1  ;;  %v684_v25 = vadd.f32 %v1936_v3, %v683_v21 }
  0xe9   :  { %v949_v24 = vadd.f32 %v948_v54, %v860_v20  ;;  %v773_v34 = vadd.f32 %v772_v22, %v684_v25 }
  0xeb   :  { %vm1016_vm10 = vcmp.gt.f32.partialorder %v949_v24, 0.0  ;;  %v1048_v29 = vmul.f32 0.01, %v949_v24  ;;  %v955_v45 = vpop.f32.mrf.mxu3 }
  0xed   :  { %v1080_v33 = vsel %vm1016_vm10, %v949_v24, %v1048_v29  ;;  %v1581_v29 = vld [vmem:[%s2280_s0 + $0x1e4] sm:$0xf] }
  0xee   :  { %1113 = vst.msk [vmem:[%s2282_s3 + $0x40] sm:$0xff] %vm1104_vm2, %v1080_v33  ;;  %v861_v37 = vpop.f32.mrf.mxu2  ;;  %v686_v41 = vpop.f32.mrf.mxu0  ;;  %v1584_v33 = vld [vmem:[%s2280_s0 + $0x1f4] sm:$0xf0] }
  0xef   :  { %v862_v40 = vadd.f32 %v861_v37, %v773_v34  ;;  %v775_v42 = vpop.f32.mrf.mxu1  ;;  %v687_v44 = vadd.f32 %v1936_v3, %v686_v41  ;;  %v1384_v37 = vor.u32 %v1583_v28, %v1383_v27 }
  0xf0   :  { %1519 = vmatmul.msk.bf16.gmra.mxu3 %vm603_vm0, %v1380_v46 }
  0xf1   :  { %v951_v47 = vadd.f32 %v950_v13, %v862_v40  ;;  %725 = vmatmul.bf16.gmra.mxu0 %v1352_v38  ;;  %v776_v49 = vadd.f32 %v775_v42, %v687_v44  ;;  %v1388_v38 = vor.u32 %v1581_v29, %v1385_v31  ;;  %v1392_v42 = vor.u32 %v1584_v33, %v1391_v32 }
  0xf2   :  { %814 = vmatmul.bf16.gmra.mxu1 %v1356_v39 }
  0xf3   :  { %vm1017_vm11 = vcmp.gt.f32.partialorder %v951_v47, 0.0  ;;  %v1049_v48 = vmul.f32 0.01, %v951_v47  ;;  %903 = vmatmul.bf16.gmra.mxu2 %v1360_v43  ;;  %v958_v55 = vpop.f32.mrf.mxu3 }
  0xf5   :  { %v1081_v50 = vsel %vm1017_vm11, %v951_v47, %v1049_v48 }
  0xf6   :  { %1114 = vst.msk [vmem:[%s2282_s3 + $0x48] sm:$0xff] %vm1104_vm2, %v1081_v50  ;;  %v864_v51 = vpop.f32.mrf.mxu2  ;;  %v688_v53 = vpop.f32.mrf.mxu0 }
  0xf7   :  { %v865_v52 = vadd.f32 %v864_v51, %v776_v49  ;;  %v777_v54 = vpop.f32.mrf.mxu1  ;;  %v689_v57 = vadd.f32 %v1936_v3, %v688_v53 }
  0xf9   :  { %v954_v56 = vadd.f32 %v953_v23, %v865_v52  ;;  %v778_v2 = vadd.f32 %v777_v54, %v689_v57 }
  0xfb   :  { %vm1018_vm12 = vcmp.gt.f32.partialorder %v954_v56, 0.0  ;;  %v1050_v61 = vmul.f32 0.01, %v954_v56  ;;  %v960_v14 = vpop.f32.mrf.mxu3 }
  0xfd   :  { %v1082_v1 = vsel %vm1018_vm12, %v954_v56, %v1050_v61 }
  0xfe   :  { %1115 = vst.msk [vmem:[%s2282_s3 + $0x50] sm:$0xff] %vm1104_vm2, %v1082_v1  ;;  %v866_v6 = vpop.f32.mrf.mxu2  ;;  %v691_v10 = vpop.f32.mrf.mxu0 }
  0xff   :  { %v867_v9 = vadd.f32 %v866_v6, %v778_v2  ;;  %v780_v11 = vpop.f32.mrf.mxu1  ;;  %v692_v13 = vadd.f32 %v1936_v3, %v691_v10 }
 0x100   :  { %1520 = vmatmul.msk.bf16.gmra.mxu3 %vm603_vm0, %v1396_v15 }
 0x101   :  { %v956_v16 = vadd.f32 %v955_v45, %v867_v9  ;;  %730 = vmatmul.bf16.gmra.mxu0 %v1368_v7  ;;  %v781_v18 = vadd.f32 %v780_v11, %v692_v13 }
 0x102   :  { %819 = vmatmul.bf16.gmra.mxu1 %v1372_v8 }
 0x103   :  { %vm1019_vm13 = vcmp.gt.f32.partialorder %v956_v16, 0.0  ;;  %v1051_v17 = vmul.f32 0.01, %v956_v16  ;;  %908 = vmatmul.bf16.gmra.mxu2 %v1376_v12  ;;  %v963_v24 = vpop.f32.mrf.mxu3 }
 0x105   :  { %v1083_v19 = vsel %vm1019_vm13, %v956_v16, %v1051_v17 }
 0x106   :  { %1116 = vst.msk [vmem:[%s2282_s3 + $0x58] sm:$0xff] %vm1104_vm2, %v1083_v19  ;;  %v869_v20 = vpop.f32.mrf.mxu2  ;;  %v693_v22 = vpop.f32.mrf.mxu0 }
 0x107   :  { %v870_v21 = vadd.f32 %v869_v20, %v781_v18  ;;  %v782_v23 = vpop.f32.mrf.mxu1  ;;  %v694_v26 = vadd.f32 %v1936_v3, %v693_v22 }
 0x109   :  { %v959_v25 = vadd.f32 %v958_v55, %v870_v21  ;;  %v783_v35 = vadd.f32 %v782_v23, %v694_v26 }
 0x10b   :  { %vm1020_vm14 = vcmp.gt.f32.partialorder %v959_v25, 0.0  ;;  %v1052_v30 = vmul.f32 0.01, %v959_v25  ;;  %v965_v44 = vpop.f32.mrf.mxu3 }
 0x10d   :  { %v1084_v34 = vsel %vm1020_vm14, %v959_v25, %v1052_v30 }
 0x10e   :  { %1117 = vst.msk [vmem:[%s2282_s3 + $0x60] sm:$0xff] %vm1104_vm2, %v1084_v34  ;;  %v871_v36 = vpop.f32.mrf.mxu2  ;;  %v696_v40 = vpop.f32.mrf.mxu0 }
 0x10f   :  { %v872_v39 = vadd.f32 %v871_v36, %v783_v35  ;;  %v785_v41 = vpop.f32.mrf.mxu1  ;;  %v697_v43 = vadd.f32 %v1936_v3, %v696_v40 }
 0x111   :  { %v961_v45 = vadd.f32 %v960_v14, %v872_v39  ;;  %735 = vmatmul.bf16.gmra.mxu0 %v1384_v37  ;;  %v786_v47 = vadd.f32 %v785_v41, %v697_v43 }
 0x112   :  { %824 = vmatmul.bf16.gmra.mxu1 %v1388_v38 }
 0x113   :  { %vm1021_vm15 = vcmp.gt.f32.partialorder %v961_v45, 0.0  ;;  %v1053_v46 = vmul.f32 0.01, %v961_v45  ;;  %913 = vmatmul.bf16.gmra.mxu2 %v1392_v42  ;;  %v968_v53 = vpop.f32.mrf.mxu3 }
 0x115   :  { %v1085_v48 = vsel %vm1021_vm15, %v961_v45, %v1053_v46 }
 0x116   :  { %1118 = vst.msk [vmem:[%s2282_s3 + $0x68] sm:$0xff] %vm1104_vm2, %v1085_v48  ;;  %v874_v49 = vpop.f32.mrf.mxu2  ;;  %v698_v51 = vpop.f32.mrf.mxu0 }
 0x117   :  { %v875_v50 = vadd.f32 %v874_v49, %v786_v47  ;;  %v787_v52 = vpop.f32.mrf.mxu1  ;;  %v699_v55 = vadd.f32 %v1936_v3, %v698_v51 }
 0x119   :  { %v964_v54 = vadd.f32 %v963_v24, %v875_v50  ;;  %v788_v58 = vadd.f32 %v787_v52, %v699_v55 }
 0x11b   :  { %vm1022_vm0 = vcmp.gt.f32.partialorder %v964_v54, 0.0  ;;  %v1054_v56 = vmul.f32 0.01, %v964_v54  ;;  %v970_v0 = vpop.f32.mrf.mxu3 }
 0x11d   :  { %v1086_v57 = vsel %vm1022_vm0, %v964_v54, %v1054_v56 }
 0x11e   :  { %1119 = vst.msk [vmem:[%s2282_s3 + $0x70] sm:$0xff] %vm1104_vm2, %v1086_v57  ;;  %v876_v59 = vpop.f32.mrf.mxu2  ;;  %v701_v61 = vpop.f32.mrf.mxu0 }
 0x11f   :  { %v877_v60 = vadd.f32 %v876_v59, %v788_v58  ;;  %v790_v62 = vpop.f32.mrf.mxu1  ;;  %v702_v63 = vadd.f32 %v1936_v3, %v701_v61 }
 0x121   :  { %v966_v1 = vadd.f32 %v965_v44, %v877_v60  ;;  %v791_v4 = vadd.f32 %v790_v62, %v702_v63 }
 0x123   :  { %vm1023_vm1 = vcmp.gt.f32.partialorder %v966_v1, 0.0  ;;  %v1055_v2 = vmul.f32 0.01, %v966_v1  ;;  %v973_v10 = vpop.f32.mrf.mxu3 }
 0x125   :  { %v1087_v5 = vsel %vm1023_vm1, %v966_v1, %v1055_v2 }
 0x126   :  { %1120 = vst.msk [vmem:[%s2282_s3 + $0x78] sm:$0xff] %vm1104_vm2, %v1087_v5  ;;  %v879_v6 = vpop.f32.mrf.mxu2  ;;  %v703_v8 = vpop.f32.mrf.mxu0 }
 0x127   :  { %v880_v7 = vadd.f32 %v879_v6, %v791_v4  ;;  %v792_v9 = vpop.f32.mrf.mxu1  ;;  %v704_v12 = vadd.f32 %v1936_v3, %v703_v8 }
 0x129   :  { %v969_v11 = vadd.f32 %v968_v53, %v880_v7  ;;  %v793_v15 = vadd.f32 %v792_v9, %v704_v12 }
 0x12b   :  { %vm1024_vm3 = vcmp.gt.f32.partialorder %v969_v11, 0.0  ;;  %v1056_v13 = vmul.f32 0.01, %v969_v11  ;;  %v975_v21 = vpop.f32.mrf.mxu3 }
 0x12d   :  { %v1088_v14 = vsel %vm1024_vm3, %v969_v11, %v1056_v13 }
 0x12e   :  { %1121 = vst.msk [vmem:[%s2282_s3 + $0x80] sm:$0xff] %vm1104_vm2, %v1088_v14  ;;  %v881_v16 = vpop.f32.mrf.mxu2  ;;  %v706_v18 = vpop.f32.mrf.mxu0 }
 0x12f   :  { %v882_v17 = vadd.f32 %v881_v16, %v793_v15  ;;  %v795_v19 = vpop.f32.mrf.mxu1  ;;  %v707_v20 = vadd.f32 %v1936_v3, %v706_v18 }
 0x131   :  { %v971_v22 = vadd.f32 %v970_v0, %v882_v17  ;;  %v796_v24 = vadd.f32 %v795_v19, %v707_v20 }
 0x133   :  { %vm1025_vm4 = vcmp.gt.f32.partialorder %v971_v22, 0.0  ;;  %v1057_v23 = vmul.f32 0.01, %v971_v22  ;;  %v978_v30 = vpop.f32.mrf.mxu3 }
 0x135   :  { %v1089_v25 = vsel %vm1025_vm4, %v971_v22, %v1057_v23 }
 0x136   :  { %1122 = vst.msk [vmem:[%s2282_s3 + $0x88] sm:$0xff] %vm1104_vm2, %v1089_v25  ;;  %v884_v26 = vpop.f32.mrf.mxu2  ;;  %v708_v28 = vpop.f32.mrf.mxu0 }
 0x137   :  { %v885_v27 = vadd.f32 %v884_v26, %v796_v24  ;;  %v797_v29 = vpop.f32.mrf.mxu1  ;;  %v709_v32 = vadd.f32 %v1936_v3, %v708_v28 }
 0x139   :  { %v974_v31 = vadd.f32 %v973_v10, %v885_v27  ;;  %v798_v35 = vadd.f32 %v797_v29, %v709_v32 }
 0x13b   :  { %vm1026_vm5 = vcmp.gt.f32.partialorder %v974_v31, 0.0  ;;  %v1058_v33 = vmul.f32 0.01, %v974_v31  ;;  %v980_v41 = vpop.f32.mrf.mxu3 }
 0x13d   :  { %v1090_v34 = vsel %vm1026_vm5, %v974_v31, %v1058_v33 }
 0x13e   :  { %1123 = vst.msk [vmem:[%s2282_s3 + $0x90] sm:$0xff] %vm1104_vm2, %v1090_v34  ;;  %v886_v36 = vpop.f32.mrf.mxu2  ;;  %v711_v38 = vpop.f32.mrf.mxu0 }
 0x13f   :  { %v887_v37 = vadd.f32 %v886_v36, %v798_v35  ;;  %v800_v39 = vpop.f32.mrf.mxu1  ;;  %v712_v40 = vadd.f32 %v1936_v3, %v711_v38 }
 0x141   :  { %v976_v42 = vadd.f32 %v975_v21, %v887_v37  ;;  %v801_v44 = vadd.f32 %v800_v39, %v712_v40 }
 0x143   :  { %vm1027_vm6 = vcmp.gt.f32.partialorder %v976_v42, 0.0  ;;  %v1059_v43 = vmul.f32 0.01, %v976_v42  ;;  %v983_v50 = vpop.f32.mrf.mxu3 }
 0x145   :  { %v1091_v45 = vsel %vm1027_vm6, %v976_v42, %v1059_v43 }
 0x146   :  { %1124 = vst.msk [vmem:[%s2282_s3 + $0x98] sm:$0xff] %vm1104_vm2, %v1091_v45  ;;  %v889_v46 = vpop.f32.mrf.mxu2  ;;  %v713_v48 = vpop.f32.mrf.mxu0 }
 0x147   :  { %v890_v47 = vadd.f32 %v889_v46, %v801_v44  ;;  %v802_v49 = vpop.f32.mrf.mxu1  ;;  %v714_v52 = vadd.f32 %v1936_v3, %v713_v48 }
 0x149   :  { %v979_v51 = vadd.f32 %v978_v30, %v890_v47  ;;  %v803_v55 = vadd.f32 %v802_v49, %v714_v52 }
 0x14b   :  { %vm1028_vm7 = vcmp.gt.f32.partialorder %v979_v51, 0.0  ;;  %v1060_v53 = vmul.f32 0.01, %v979_v51  ;;  %v985_v61 = vpop.f32.mrf.mxu3 }
 0x14d   :  { %v1092_v54 = vsel %vm1028_vm7, %v979_v51, %v1060_v53 }
 0x14e   :  { %1125 = vst.msk [vmem:[%s2282_s3 + $0xa0] sm:$0xff] %vm1104_vm2, %v1092_v54  ;;  %v891_v56 = vpop.f32.mrf.mxu2  ;;  %v716_v58 = vpop.f32.mrf.mxu0 }
 0x14f   :  { %v892_v57 = vadd.f32 %v891_v56, %v803_v55  ;;  %v805_v59 = vpop.f32.mrf.mxu1  ;;  %v717_v60 = vadd.f32 %v1936_v3, %v716_v58 }
 0x151   :  { %v981_v62 = vadd.f32 %v980_v41, %v892_v57  ;;  %v806_v0 = vadd.f32 %v805_v59, %v717_v60 }
 0x153   :  { %vm1029_vm8 = vcmp.gt.f32.partialorder %v981_v62, 0.0  ;;  %v1061_v63 = vmul.f32 0.01, %v981_v62  ;;  %v988_v9 = vpop.f32.mrf.mxu3 }
 0x155   :  { %v1093_v1 = vsel %vm1029_vm8, %v981_v62, %v1061_v63 }
 0x156   :  { %1126 = vst.msk [vmem:[%s2282_s3 + $0xa8] sm:$0xff] %vm1104_vm2, %v1093_v1  ;;  %v894_v2 = vpop.f32.mrf.mxu2  ;;  %v718_v5 = vpop.f32.mrf.mxu0 }
 0x157   :  { %v895_v4 = vadd.f32 %v894_v2, %v806_v0  ;;  %v807_v6 = vpop.f32.mrf.mxu1  ;;  %v719_v8 = vadd.f32 %v1936_v3, %v718_v5 }
 0x159   :  { %v984_v7 = vadd.f32 %v983_v50, %v895_v4  ;;  %v808_v12 = vadd.f32 %v807_v6, %v719_v8 }
 0x15b   :  { %vm1030_vm9 = vcmp.gt.f32.partialorder %v984_v7, 0.0  ;;  %v1062_v10 = vmul.f32 0.01, %v984_v7  ;;  %v990_v21 = vpop.f32.mrf.mxu3 }
 0x15d   :  { %v1094_v11 = vsel %vm1030_vm9, %v984_v7, %v1062_v10 }
 0x15e   :  { %1127 = vst.msk [vmem:[%s2282_s3 + $0xb0] sm:$0xff] %vm1104_vm2, %v1094_v11  ;;  %v896_v13 = vpop.f32.mrf.mxu2  ;;  %v721_v15 = vpop.f32.mrf.mxu0 }
 0x15f   :  { %v897_v14 = vadd.f32 %v896_v13, %v808_v12  ;;  %v810_v16 = vpop.f32.mrf.mxu1  ;;  %v722_v17 = vadd.f32 %v1936_v3, %v721_v15 }
 0x161   :  { %v986_v18 = vadd.f32 %v985_v61, %v897_v14  ;;  %v811_v20 = vadd.f32 %v810_v16, %v722_v17 }
 0x163   :  { %vm1031_vm10 = vcmp.gt.f32.partialorder %v986_v18, 0.0  ;;  %v1063_v19 = vmul.f32 0.01, %v986_v18  ;;  %v993_v33 = vpop.f32.mrf.mxu3 }
 0x165   :  { %v1095_v22 = vsel %vm1031_vm10, %v986_v18, %v1063_v19 }
 0x166   :  { %1128 = vst.msk [vmem:[%s2282_s3 + $0xb8] sm:$0xff] %vm1104_vm2, %v1095_v22  ;;  %v899_v23 = vpop.f32.mrf.mxu2  ;;  %v723_v25 = vpop.f32.mrf.mxu0 }
 0x167   :  { %v900_v24 = vadd.f32 %v899_v23, %v811_v20  ;;  %v812_v26 = vpop.f32.mrf.mxu1  ;;  %v724_v28 = vadd.f32 %v1936_v3, %v723_v25 }
 0x169   :  { %v989_v27 = vadd.f32 %v988_v9, %v900_v24  ;;  %v813_v31 = vadd.f32 %v812_v26, %v724_v28 }
 0x16b   :  { %vm1032_vm11 = vcmp.gt.f32.partialorder %v989_v27, 0.0  ;;  %v1064_v29 = vmul.f32 0.01, %v989_v27  ;;  %v995_v46 = vpop.f32.mrf.mxu3 }
 0x16d   :  { %v1096_v30 = vsel %vm1032_vm11, %v989_v27, %v1064_v29 }
 0x16e   :  { %1129 = vst.msk [vmem:[%s2282_s3 + $0xc0] sm:$0xff] %vm1104_vm2, %v1096_v30  ;;  %v901_v32 = vpop.f32.mrf.mxu2  ;;  %v726_v35 = vpop.f32.mrf.mxu0 }
 0x16f   :  { %v902_v34 = vadd.f32 %v901_v32, %v813_v31  ;;  %v815_v36 = vpop.f32.mrf.mxu1  ;;  %v727_v37 = vadd.f32 %v1936_v3, %v726_v35 }
 0x171   :  { %v991_v38 = vadd.f32 %v990_v21, %v902_v34  ;;  %v816_v40 = vadd.f32 %v815_v36, %v727_v37 }
 0x173   :  { %vm1033_vm12 = vcmp.gt.f32.partialorder %v991_v38, 0.0  ;;  %v1065_v39 = vmul.f32 0.01, %v991_v38  ;;  %v998_v58 = vpop.f32.mrf.mxu3 }
 0x175   :  { %v1097_v41 = vsel %vm1033_vm12, %v991_v38, %v1065_v39 }
 0x176   :  { %1130 = vst.msk [vmem:[%s2282_s3 + $0xc8] sm:$0xff] %vm1104_vm2, %v1097_v41  ;;  %v904_v42 = vpop.f32.mrf.mxu2  ;;  %v728_v44 = vpop.f32.mrf.mxu0 }
 0x177   :  { %v905_v43 = vadd.f32 %v904_v42, %v816_v40  ;;  %v817_v45 = vpop.f32.mrf.mxu1  ;;  %v729_v48 = vadd.f32 %v1936_v3, %v728_v44 }
 0x179   :  { %v994_v47 = vadd.f32 %v993_v33, %v905_v43  ;;  %v818_v51 = vadd.f32 %v817_v45, %v729_v48 }
 0x17b   :  { %vm1034_vm13 = vcmp.gt.f32.partialorder %v994_v47, 0.0  ;;  %v1066_v49 = vmul.f32 0.01, %v994_v47  ;;  %v1000_v6 = vpop.f32.mrf.mxu3 }
 0x17d   :  { %v1098_v50 = vsel %vm1034_vm13, %v994_v47, %v1066_v49 }
 0x17e   :  { %1131 = vst.msk [vmem:[%s2282_s3 + $0xd0] sm:$0xff] %vm1104_vm2, %v1098_v50  ;;  %v906_v52 = vpop.f32.mrf.mxu2  ;;  %v731_v54 = vpop.f32.mrf.mxu0 }
 0x17f   :  { %v907_v53 = vadd.f32 %v906_v52, %v818_v51  ;;  %v820_v55 = vpop.f32.mrf.mxu1  ;;  %v732_v56 = vadd.f32 %v1936_v3, %v731_v54 }
 0x181   :  { %v996_v57 = vadd.f32 %v995_v46, %v907_v53  ;;  %v821_v60 = vadd.f32 %v820_v55, %v732_v56 }
 0x183   :  { %vm1035_vm14 = vcmp.gt.f32.partialorder %v996_v57, 0.0  ;;  %v1067_v59 = vmul.f32 0.01, %v996_v57  ;;  %v1003_v18 = vpop.f32.mrf.mxu3 }
 0x185   :  { %v1099_v61 = vsel %vm1035_vm14, %v996_v57, %v1067_v59 }
 0x186   :  { %1132 = vst.msk [vmem:[%s2282_s3 + $0xd8] sm:$0xff] %vm1104_vm2, %v1099_v61  ;;  %v909_v62 = vpop.f32.mrf.mxu2  ;;  %v733_v0 = vpop.f32.mrf.mxu0 }
 0x187   :  { %v910_v63 = vadd.f32 %v909_v62, %v821_v60  ;;  %v822_v1 = vpop.f32.mrf.mxu1  ;;  %v734_v4 = vadd.f32 %v1936_v3, %v733_v0 }
 0x189   :  { %v999_v2 = vadd.f32 %v998_v58, %v910_v63  ;;  %v823_v8 = vadd.f32 %v822_v1, %v734_v4 }
 0x18b   :  { %vm1036_vm15 = vcmp.gt.f32.partialorder %v999_v2, 0.0  ;;  %v1068_v5 = vmul.f32 0.01, %v999_v2  ;;  %v1005_v30 = vpop.f32.mrf.mxu3 }
 0x18d   :  { %v1100_v7 = vsel %vm1036_vm15, %v999_v2, %v1068_v5 }
 0x18e   :  { %1133 = vst.msk [vmem:[%s2282_s3 + $0xe0] sm:$0xff] %vm1104_vm2, %v1100_v7  ;;  %v911_v9 = vpop.f32.mrf.mxu2  ;;  %v736_v11 = vpop.f32.mrf.mxu0 }
 0x18f   :  { %v912_v10 = vadd.f32 %v911_v9, %v823_v8  ;;  %v737_v12 = vadd.f32 %v1936_v3, %v736_v11  ;;  %v825_v14 = vpop.f32.mrf.mxu1 }
 0x191   :  { %v1001_v13 = vadd.f32 %v1000_v6, %v912_v10  ;;  %v826_v16 = vadd.f32 %v825_v14, %v737_v12 }
 0x193   :  { %vm1037_vm0 = vcmp.gt.f32.partialorder %v1001_v13, 0.0  ;;  %v1069_v15 = vmul.f32 0.01, %v1001_v13 }
 0x195   :  { %v1101_v17 = vsel %vm1037_vm0, %v1001_v13, %v1069_v15 }
 0x196   :  { %1134 = vst.msk [vmem:[%s2282_s3 + $0xe8] sm:$0xff] %vm1104_vm2, %v1101_v17  ;;  %v914_v19 = vpop.f32.mrf.mxu2  ;;  %v738_v21 = vpop.f32.mrf.mxu0 }
 0x197   :  { %v915_v20 = vadd.f32 %v914_v19, %v826_v16  ;;  %v739_v23 = vadd.f32 %v1936_v3, %v738_v21  ;;  %v827_v25 = vpop.f32.mrf.mxu1 }
 0x199   :  { %v1004_v22 = vadd.f32 %v1003_v18, %v915_v20  ;;  %v828_v27 = vadd.f32 %v827_v25, %v739_v23 }
 0x19b   :  { %vm1038_vm1 = vcmp.gt.f32.partialorder %v1004_v22, 0.0  ;;  %v1070_v24 = vmul.f32 0.01, %v1004_v22 }
 0x19d   :  { %v1102_v26 = vsel %vm1038_vm1, %v1004_v22, %v1070_v24 }
 0x19e   :  { %1135 = vst.msk [vmem:[%s2282_s3 + $0xf0] sm:$0xff] %vm1104_vm2, %v1102_v26  ;;  %v916_v28 = vpop.f32.mrf.mxu2 }
 0x19f   :  { %v917_v29 = vadd.f32 %v916_v28, %v828_v27 }
 0x1a1   :  { %v1006_v31 = vadd.f32 %v1005_v30, %v917_v29 }
 0x1a3   :  { %vm1039_vm3 = vcmp.gt.f32.partialorder %v1006_v31, 0.0  ;;  %v1071_v32 = vmul.f32 0.01, %v1006_v31 }
 0x1a5   :  { %v1103_v33 = vsel %vm1039_vm3, %v1006_v31, %v1071_v32 }
 0x1a6   :  { %1136 = vst.msk [vmem:[%s2282_s3 + $0xf8] sm:$0xff] %vm1104_vm2, %v1103_v33 }

// kernel: seq2seq3d_forward.21
= control target key start
LH: loop header
LB: loop body
LE: loop exit
PB: predicated region body
PF: predicated region fallthrough
CT: control target
= control target key end

     0   :  { %s1187_s12 = smov 0   ;;  %s1444_s0 = inlined_call_operand.vmem [shape: bf16[2048,216], index: 0, kind: input, shape index: {}]   ;;  %s1445_s1 = inlined_call_operand.vmem [shape: bf16[216,8], index: 1, kind: input, shape index: {}]   ;;  %s1446_s2 = inlined_call_operand.vmem [shape: f32[1,8], index: 2, kind: input, shape index: {}]   ;;  %s1447_s3 = inlined_call_operand.vmem [shape: f32[2048,8], index: 3, kind: output, shape index: {}]  }
   0x1 LB: > { %s882_s13 = sadd.s32 4294967295, %s1165_s12   ;;  %p886_p0 = scmp.ge.s32.totalorder %s1165_s12, 1  ;;  %s1165_s12 = sphi %s1187_s12, %s13_s12  }
   0x2   : > { %p139_p1 = scmp.lt.s32.totalorder %s1165_s12, 9 }
   0x4   : > { %p140_p2 = pnand %p886_p0, %p139_p1 }
   0x5   : > { %s887_s20 = sshll.u32 (!%p140_p2), %s882_s13, 5 }
   0x6   : > { %143 = sbr.rel (%p140_p2) target bundleno = 308 (0x134), region = 32  ;;  %p165_p3 = scmp.lt.s32.totalorder (!%p140_p2), %s887_s20, 255 }
   0xb   : > { %v1130_v0 = vld [vmem:[%s1445_s1 + $0x38] sm:$0xff]  ;;  %v236_v1 = vld [vmem:[%s1445_s1 + $0x68] sm:$0xf]  ;;  %vm515_vm0 = vcmask 1043456   ;;  %v1129_v3 = vld [vmem:[%s1445_s1 + $0x30] sm:$0xff]  ;;  %s1449_s20 = smov (!%p165_p3, %s887_s20), 255 }
   0xc   : > { %v438_v2 = vunpack.c.l.b16 %v236_v1  ;;  %519 = vmatpush.bf16.msra.mxu0 %v1130_v0  ;;  %1136 = vmatpush.bf16.msra.mxu2 %v1130_v0  ;;  %v1135_v6 = vld [vmem:[%s1445_s1 + $0x60] sm:$0xff]  ;;  %v1128_v7 = vld [vmem:[%s1445_s1 + $0x28] sm:$0xff]  ;;  %v1134_v8 = vld [vmem:[%s1445_s1 + $0x58] sm:$0xff]  ;;  %s1090_s6 = sshll.u32 %s1449_s20, 3  ;;  %vm466_vm1 = vcmask 719872   ;;  %vm793_vm3 = vcmask 64512  }
   0xd   : > { %v1127_v9 = vld [vmem:[%s1445_s1 + $0x20] sm:$0xff]  ;;  %v1133_v10 = vld [vmem:[%s1445_s1 + $0x50] sm:$0xff]  ;;  %v1126_v11 = vld [vmem:[%s1445_s1 + $0x18] sm:$0xff]  ;;  %s1236_s14 = scalar_lea.vmem %s1444_s0, %s1090_s6  ;;  %s1338_s26 = scalar_lea.vmem %s1447_s3, %s1090_s6 }
   0xe   : > { %v452_v4 = vpack.c.b16 %v438_v2, %v438_v2  ;;  %v1132_v12 = vld [vmem:[%s1445_s1 + $0x48] sm:$0xff]  ;;  %v1125_v13 = vld [vmem:[%s1445_s1 + $0x10] sm:$0xff]  ;;  %v1131_v14 = vld [vmem:[%s1445_s1 + $0x40] sm:$0xff] }
   0xf   : > { %v1124_v15 = vld [vmem:[%s1445_s1 + $0x8] sm:$0xff]  ;;  %v1091_v16 = vld [vmem:[%s1236_s14 + $0x4] sm:$0xf]  ;;  %v1109_v18 = vld [vmem:[%s1236_s14 + $0x94] sm:$0xf] }
  0x10   : > { %v517_v5 = vsel %vm515_vm0, %v452_v4, 0  ;;  %520 = vmatpush.bf16.msra.mxu0 %v1129_v3  ;;  %1137 = vmatpush.bf16.msra.mxu2 %v1129_v3  ;;  %v896_v17 = vld [vmem:[%s1236_s14 + $0x8] sm:$0xf0]  ;;  %v968_v19 = vld [vmem:[%s1236_s14 + $0x98] sm:$0xf0]  ;;  %v1123_v21 = vld [vmem:[%s1445_s1] sm:$0xff] }
  0x11   : > { %610 = vmatpush.bf16.msra.mxu1 %v517_v5  ;;  %1144 = vmatpush.bf16.msra.mxu3 %v517_v5  ;;  %v899_v20 = vor.u32 %v1091_v16, %v896_v17  ;;  %v894_v22 = vld [vmem:[%s1236_s14] sm:$0xf]  ;;  %v1092_v23 = vld [vmem:[%s1236_s14 + $0x4] sm:$0xf0]  ;;  %v971_v24 = vor.u32 %v1109_v18, %v968_v19  ;;  %v1093_v29 = vld [vmem:[%s1236_s14 + $0x14] sm:$0xf] }
  0x12   : > { %v958_v25 = vld [vmem:[%s1236_s14 + $0x80] sm:$0xf]  ;;  %v1108_v26 = vld [vmem:[%s1236_s14 + $0x84] sm:$0xf0]  ;;  %v895_v27 = vor.u32 %v1092_v23, %v894_v22  ;;  %v904_v30 = vld [vmem:[%s1236_s14 + $0x18] sm:$0xf0] }
  0x13   : > { %v959_v28 = vor.u32 %v1108_v26, %v958_v25  ;;  %v1111_v31 = vld [vmem:[%s1236_s14 + $0xa4] sm:$0xf]  ;;  %v976_v32 = vld [vmem:[%s1236_s14 + $0xa8] sm:$0xf0]  ;;  %v907_v33 = vor.u32 %v1093_v29, %v904_v30  ;;  %v902_v34 = vld [vmem:[%s1236_s14 + $0x10] sm:$0xf] }
  0x14   : > { %521 = vmatpush.bf16.msra.mxu0 %v1128_v7  ;;  %1138 = vmatpush.bf16.msra.mxu2 %v1128_v7  ;;  %v1094_v35 = vld [vmem:[%s1236_s14 + $0x14] sm:$0xf0]  ;;  %v979_v36 = vor.u32 %v1111_v31, %v976_v32  ;;  %v966_v37 = vld [vmem:[%s1236_s14 + $0x90] sm:$0xf]  ;;  %v1095_v41 = vld [vmem:[%s1236_s14 + $0x24] sm:$0xf] }
  0x15   : > { %611 = vmatpush.bf16.msra.mxu1 %v1135_v6  ;;  %1145 = vmatpush.bf16.msra.mxu3 %v1135_v6  ;;  %v1110_v38 = vld [vmem:[%s1236_s14 + $0x94] sm:$0xf0]  ;;  %v903_v39 = vor.u32 %v1094_v35, %v902_v34  ;;  %v912_v42 = vld [vmem:[%s1236_s14 + $0x28] sm:$0xf0]  ;;  %v1113_v43 = vld [vmem:[%s1236_s14 + $0xb4] sm:$0xf] }
  0x16   : > { %v967_v40 = vor.u32 %v1110_v38, %v966_v37  ;;  %v984_v44 = vld [vmem:[%s1236_s14 + $0xb8] sm:$0xf0]  ;;  %v915_v45 = vor.u32 %v1095_v41, %v912_v42  ;;  %v910_v46 = vld [vmem:[%s1236_s14 + $0x20] sm:$0xf]  ;;  %v1096_v47 = vld [vmem:[%s1236_s14 + $0x24] sm:$0xf0] }
  0x17   : > { %v987_v48 = vor.u32 %v1113_v43, %v984_v44  ;;  %v974_v49 = vld [vmem:[%s1236_s14 + $0xa0] sm:$0xf]  ;;  %v1112_v50 = vld [vmem:[%s1236_s14 + $0xa4] sm:$0xf0]  ;;  %v911_v51 = vor.u32 %v1096_v47, %v910_v46  ;;  %v1097_v53 = vld [vmem:[%s1236_s14 + $0x34] sm:$0xf] }
  0x18   : > { %522 = vmatpush.bf16.msra.mxu0 %v1127_v9  ;;  %1139 = vmatpush.bf16.msra.mxu2 %v1127_v9  ;;  %v975_v52 = vor.u32 %v1112_v50, %v974_v49  ;;  %v920_v54 = vld [vmem:[%s1236_s14 + $0x38] sm:$0xf0]  ;;  %v1115_v55 = vld [vmem:[%s1236_s14 + $0xc4] sm:$0xf]  ;;  %v992_v56 = vld [vmem:[%s1236_s14 + $0xc8] sm:$0xf0] }
  0x19   : > { %612 = vmatpush.bf16.msra.mxu1 %v1134_v8  ;;  %1146 = vmatpush.bf16.msra.mxu3 %v1134_v8  ;;  %v923_v57 = vor.u32 %v1097_v53, %v920_v54  ;;  %v918_v58 = vld [vmem:[%s1236_s14 + $0x30] sm:$0xf]  ;;  %v1098_v59 = vld [vmem:[%s1236_s14 + $0x34] sm:$0xf0]  ;;  %v995_v60 = vor.u32 %v1115_v55, %v992_v56  ;;  %v1099_v1 = vld [vmem:[%s1236_s14 + $0x44] sm:$0xf] }
  0x1a   : > { %v982_v61 = vld [vmem:[%s1236_s14 + $0xb0] sm:$0xf]  ;;  %v1114_v62 = vld [vmem:[%s1236_s14 + $0xb4] sm:$0xf0]  ;;  %v919_v63 = vor.u32 %v1098_v59, %v918_v58  ;;  %v928_v2 = vld [vmem:[%s1236_s14 + $0x48] sm:$0xf0] }
  0x1b   : > { %v983_v0 = vor.u32 %v1114_v62, %v982_v61  ;;  %v1117_v3 = vld [vmem:[%s1236_s14 + $0xd4] sm:$0xf]  ;;  %v1000_v4 = vld [vmem:[%s1236_s14 + $0xd8] sm:$0xf0]  ;;  %v931_v5 = vor.u32 %v1099_v1, %v928_v2  ;;  %v926_v6 = vld [vmem:[%s1236_s14 + $0x40] sm:$0xf] }
  0x1c   : > { %523 = vmatpush.bf16.msra.mxu0 %v1126_v11  ;;  %1140 = vmatpush.bf16.msra.mxu2 %v1126_v11  ;;  %v1100_v7 = vld [vmem:[%s1236_s14 + $0x44] sm:$0xf0]  ;;  %v1003_v8 = vor.u32 %v1117_v3, %v1000_v4  ;;  %v990_v9 = vld [vmem:[%s1236_s14 + $0xc0] sm:$0xf]  ;;  %v1008_v16 = vld [vmem:[%s1236_s14 + $0xe8] sm:$0xf0] }
  0x1d   : > { %613 = vmatpush.bf16.msra.mxu1 %v1133_v10  ;;  %1147 = vmatpush.bf16.msra.mxu3 %v1133_v10  ;;  %v1116_v10 = vld [vmem:[%s1236_s14 + $0xc4] sm:$0xf0]  ;;  %v927_v11 = vor.u32 %v1100_v7, %v926_v6  ;;  %v934_v18 = vld [vmem:[%s1236_s14 + $0x50] sm:$0xf]  ;;  %v1102_v19 = vld [vmem:[%s1236_s14 + $0x54] sm:$0xf0] }
  0x1e   : > { %v1118_v22 = vld [vmem:[%s1236_s14 + $0xd4] sm:$0xf0]  ;;  %v935_v23 = vor.u32 %v1102_v19, %v934_v18  ;;  %v1103_v25 = vld [vmem:[%s1236_s14 + $0x64] sm:$0xf]  ;;  %v944_v26 = vld [vmem:[%s1236_s14 + $0x68] sm:$0xf0] }
  0x1f   : > { %v947_v29 = vor.u32 %v1103_v25, %v944_v26  ;;  %v942_v30 = vld [vmem:[%s1236_s14 + $0x60] sm:$0xf]  ;;  %v1104_v31 = vld [vmem:[%s1236_s14 + $0x64] sm:$0xf0]  ;;  %v1105_v37 = vld [vmem:[%s1236_s14 + $0x74] sm:$0xf] }
  0x20   : > { %524 = vmatpush.bf16.msra.mxu0 %v1125_v13  ;;  %1141 = vmatpush.bf16.msra.mxu2 %v1125_v13  ;;  %v1101_v13 = vld [vmem:[%s1236_s14 + $0x54] sm:$0xf]  ;;  %v1120_v34 = vld [vmem:[%s1236_s14 + $0xe4] sm:$0xf0]  ;;  %v943_v35 = vor.u32 %v1104_v31, %v942_v30  ;;  %v952_v38 = vld [vmem:[%s1236_s14 + $0x78] sm:$0xf0] }
  0x21   : > { %614 = vmatpush.bf16.msra.mxu1 %v1132_v12  ;;  %1148 = vmatpush.bf16.msra.mxu3 %v1132_v12  ;;  %v991_v12 = vor.u32 %v1116_v10, %v990_v9  ;;  %v1106_v41 = vld [vmem:[%s1236_s14 + $0x74] sm:$0xf0]  ;;  %v1014_v42 = vld [vmem:[%s1236_s14 + $0xf0] sm:$0xf]  ;;  %v1107_v46 = vld [vmem:[%s1236_s14 + $0x84] sm:$0xf] }
  0x22   : > { %v1122_v43 = vld [vmem:[%s1236_s14 + $0xf4] sm:$0xf0]  ;;  %v960_v47 = vld [vmem:[%s1236_s14 + $0x88] sm:$0xf0]  ;;  %v1329_v50 = vld [vmem:[%s1446_s2] ss:$0 sm:$0xff] }
  0x24   : > { %525 = vmatpush.bf16.msra.mxu0 %v1124_v15  ;;  %1142 = vmatpush.bf16.msra.mxu2 %v1124_v15  ;;  %v1119_v15 = vld [vmem:[%s1236_s14 + $0xe4] sm:$0xf] }
  0x25   : > { %615 = vmatpush.bf16.msra.mxu1 %v1131_v14  ;;  %1149 = vmatpush.bf16.msra.mxu3 %v1131_v14  ;;  %v936_v14 = vld [vmem:[%s1236_s14 + $0x58] sm:$0xf0] }
  0x26   : > { %v939_v17 = vor.u32 %v1101_v13, %v936_v14 }
  0x28   : > { %1072 = vmatmul.msk.bf16.vlgmr.msra.gmra.mxu1 %vm466_vm1, %v899_v20  ;;  %526 = vmatpush.bf16.msra.mxu0 %v1123_v21  ;;  %v1011_v20 = vor.u32 %v1119_v15, %v1008_v16 }
  0x29   : > { %1081 = vmatmul.msk.bf16.vlgmr.msra.gmra.mxu3 %vm466_vm1, %v971_v24  ;;  %1143 = vmatpush.bf16.msra.mxu2 %v1123_v21  ;;  %v998_v21 = vld [vmem:[%s1236_s14 + $0xd0] sm:$0xf] }
  0x2a   : > { %v999_v24 = vor.u32 %v1118_v22, %v998_v21 }
  0x2b   : > { %527 = vmatmul.bf16.vlgmr.msra.gmra.mxu0 %v895_v27  ;;  %v1121_v27 = vld [vmem:[%s1236_s14 + $0xf4] sm:$0xf] }
  0x2c   : > { %567 = vmatmul.bf16.vlgmr.msra.gmra.mxu2 %v959_v28  ;;  %v1016_v28 = vld [vmem:[%s1236_s14 + $0xf8] sm:$0xf0] }
  0x2d   : > { %v1019_v32 = vor.u32 %v1121_v27, %v1016_v28 }
  0x38   : > { %1073 = vmatmul.msk.bf16.gmra.mxu1 %vm466_vm1, %v907_v33  ;;  %v1006_v33 = vld [vmem:[%s1236_s14 + $0xe0] sm:$0xf] }
  0x39   : > { %1082 = vmatmul.msk.bf16.gmra.mxu3 %vm466_vm1, %v979_v36  ;;  %v1007_v36 = vor.u32 %v1120_v34, %v1006_v33 }
  0x3b   : > { %532 = vmatmul.bf16.gmra.mxu0 %v903_v39  ;;  %v955_v39 = vor.u32 %v1105_v37, %v952_v38 }
  0x3c   : > { %572 = vmatmul.bf16.gmra.mxu2 %v967_v40  ;;  %v950_v40 = vld [vmem:[%s1236_s14 + $0x70] sm:$0xf] }
  0x3d   : > { %v951_v44 = vor.u32 %v1106_v41, %v950_v40 }
  0x48   : > { %1074 = vmatmul.msk.bf16.gmra.mxu1 %vm466_vm1, %v915_v45  ;;  %v1015_v45 = vor.u32 %v1122_v43, %v1014_v42 }
  0x49   : > { %1083 = vmatmul.msk.bf16.gmra.mxu3 %vm466_vm1, %v987_v48  ;;  %v963_v48 = vor.u32 %v1107_v46, %v960_v47 }
  0x4b   : > { %537 = vmatmul.bf16.gmra.mxu0 %v911_v51 }
  0x4c   : > { %577 = vmatmul.bf16.gmra.mxu2 %v975_v52 }
  0x58   : > { %1075 = vmatmul.msk.bf16.gmra.mxu1 %vm466_vm1, %v923_v57 }
  0x59   : > { %1084 = vmatmul.msk.bf16.gmra.mxu3 %vm466_vm1, %v995_v60 }
  0x5b   : > { %542 = vmatmul.bf16.gmra.mxu0 %v919_v63 }
  0x5c   : > { %582 = vmatmul.bf16.gmra.mxu2 %v983_v0 }
  0x68   : > { %1076 = vmatmul.msk.bf16.gmra.mxu1 %vm466_vm1, %v931_v5 }
  0x69   : > { %1085 = vmatmul.msk.bf16.gmra.mxu3 %vm466_vm1, %v1003_v8 }
  0x6b   : > { %547 = vmatmul.bf16.gmra.mxu0 %v927_v11 }
  0x6c   : > { %587 = vmatmul.bf16.gmra.mxu2 %v991_v12 }
  0x78   : > { %1077 = vmatmul.msk.bf16.gmra.mxu1 %vm466_vm1, %v939_v17 }
  0x79   : > { %1086 = vmatmul.msk.bf16.gmra.mxu3 %vm466_vm1, %v1011_v20 }
  0x7b   : > { %552 = vmatmul.bf16.gmra.mxu0 %v935_v23 }
  0x7c   : > { %592 = vmatmul.bf16.gmra.mxu2 %v999_v24 }
  0x88   : > { %1078 = vmatmul.msk.bf16.gmra.mxu1 %vm466_vm1, %v947_v29 }
  0x89   : > { %1087 = vmatmul.msk.bf16.gmra.mxu3 %vm466_vm1, %v1019_v32 }
  0x8b   : > { %557 = vmatmul.bf16.gmra.mxu0 %v943_v35 }
  0x8c   : > { %597 = vmatmul.bf16.gmra.mxu2 %v1007_v36 }
  0x98   : > { %1079 = vmatmul.msk.bf16.gmra.mxu1 %vm466_vm1, %v955_v39 }
  0x9b   : > { %562 = vmatmul.bf16.gmra.mxu0 %v951_v44 }
  0x9c   : > { %602 = vmatmul.bf16.gmra.mxu2 %v1015_v45 }
  0xa5   : > { %v617_v49 = vpop.f32.mrf.mxu1 }
  0xa8   : > { %1080 = vmatmul.msk.bf16.gmra.mxu1 %vm466_vm1, %v963_v48  ;;  %v528_v51 = vpop.f32.mrf.mxu0 }
  0xa9   : > { %v529_v52 = vadd.f32 %v1329_v50, %v528_v51 }
  0xab   : > { %v618_v53 = vadd.f32 %v617_v49, %v529_v52 }
  0xac   : > { %v662_v54 = vpop.f32.mrf.mxu3 }
  0xad   : > { %v619_v55 = vpop.f32.mrf.mxu1  ;;  %vm697_vm2 = vcmp.gt.f32.partialorder %v618_v53, 0.0  ;;  %v729_v56 = vmul.f32 0.01, %v618_v53 }
  0xaf   : > { %v761_v57 = vsel %vm697_vm2, %v618_v53, %v729_v56  ;;  %v1340_v58 = vpop.f32.mrf.mxu2 }
  0xb0   : > { %794 = vst.msk [vmem:[%s1338_s26] sm:$0xff] %vm793_vm3, %v761_v57  ;;  %v530_v59 = vpop.f32.mrf.mxu0 }
  0xb1   : > { %v531_v60 = vadd.f32 %v1329_v50, %v530_v59 }
  0xb3   : > { %v620_v61 = vadd.f32 %v619_v55, %v531_v60 }
  0xb4   : > { %v664_v62 = vpop.f32.mrf.mxu3 }
  0xb5   : > { %v622_v63 = vpop.f32.mrf.mxu1  ;;  %vm698_vm4 = vcmp.gt.f32.partialorder %v620_v61, 0.0  ;;  %v730_v0 = vmul.f32 0.01, %v620_v61 }
  0xb7   : > { %v762_v1 = vsel %vm698_vm4, %v620_v61, %v730_v0  ;;  %v1345_v2 = vpop.f32.mrf.mxu2 }
  0xb8   : > { %795 = vst.msk [vmem:[%s1338_s26 + $0x8] sm:$0xff] %vm793_vm3, %v762_v1  ;;  %v533_v3 = vpop.f32.mrf.mxu0 }
  0xb9   : > { %v534_v4 = vadd.f32 %v1329_v50, %v533_v3 }
  0xbb   : > { %v623_v5 = vadd.f32 %v622_v63, %v534_v4 }
  0xbc   : > { %v667_v6 = vpop.f32.mrf.mxu3 }
  0xbd   : > { %v624_v7 = vpop.f32.mrf.mxu1  ;;  %vm699_vm5 = vcmp.gt.f32.partialorder %v623_v5, 0.0  ;;  %v731_v8 = vmul.f32 0.01, %v623_v5 }
  0xbf   : > { %v763_v9 = vsel %vm699_vm5, %v623_v5, %v731_v8  ;;  %v573_v10 = vpop.f32.mrf.mxu2 }
  0xc0   : > { %796 = vst.msk [vmem:[%s1338_s26 + $0x10] sm:$0xff] %vm793_vm3, %v763_v9  ;;  %v574_v11 = vadd.f32 %v1329_v50, %v573_v10  ;;  %v535_v12 = vpop.f32.mrf.mxu0 }
  0xc1   : > { %v536_v13 = vadd.f32 %v1329_v50, %v535_v12 }
  0xc2   : > { %v663_v14 = vadd.f32 %v662_v54, %v574_v11 }
  0xc3   : > { %v625_v15 = vadd.f32 %v624_v7, %v536_v13 }
  0xc4   : > { %vm715_vm6 = vcmp.gt.f32.partialorder %v663_v14, 0.0  ;;  %v747_v16 = vmul.f32 0.01, %v663_v14  ;;  %v669_v19 = vpop.f32.mrf.mxu3 }
  0xc5   : > { %v627_v17 = vpop.f32.mrf.mxu1  ;;  %vm700_vm7 = vcmp.gt.f32.partialorder %v625_v15, 0.0  ;;  %v732_v18 = vmul.f32 0.01, %v625_v15 }
  0xc6   : > { %v779_v20 = vsel %vm715_vm6, %v663_v14, %v747_v16 }
  0xc7   : > { %812 = vst.msk [vmem:[%s1338_s26 + $0x90] sm:$0xff] %vm793_vm3, %v779_v20  ;;  %v764_v21 = vsel %vm700_vm7, %v625_v15, %v732_v18  ;;  %v575_v22 = vpop.f32.mrf.mxu2 }
  0xc8   : > { %797 = vst.msk [vmem:[%s1338_s26 + $0x18] sm:$0xff] %vm793_vm3, %v764_v21  ;;  %v576_v23 = vadd.f32 %v1329_v50, %v575_v22  ;;  %v538_v24 = vpop.f32.mrf.mxu0 }
  0xc9   : > { %v539_v25 = vadd.f32 %v1329_v50, %v538_v24 }
  0xca   : > { %v665_v26 = vadd.f32 %v664_v62, %v576_v23 }
  0xcb   : > { %v628_v27 = vadd.f32 %v627_v17, %v539_v25 }
  0xcc   : > { %vm716_vm8 = vcmp.gt.f32.partialorder %v665_v26, 0.0  ;;  %v748_v28 = vmul.f32 0.01, %v665_v26  ;;  %v672_v34 = vpop.f32.mrf.mxu3 }
  0xcd   : > { %v629_v29 = vpop.f32.mrf.mxu1  ;;  %vm701_vm9 = vcmp.gt.f32.partialorder %v628_v27, 0.0  ;;  %v733_v30 = vmul.f32 0.01, %v628_v27 }
  0xce   : > { %v780_v31 = vsel %vm716_vm8, %v665_v26, %v748_v28 }
  0xcf   : > { %813 = vst.msk [vmem:[%s1338_s26 + $0x98] sm:$0xff] %vm793_vm3, %v780_v31  ;;  %v765_v32 = vsel %vm701_vm9, %v628_v27, %v733_v30  ;;  %v578_v33 = vpop.f32.mrf.mxu2 }
  0xd0   : > { %798 = vst.msk [vmem:[%s1338_s26 + $0x20] sm:$0xff] %vm793_vm3, %v765_v32  ;;  %v579_v35 = vadd.f32 %v1329_v50, %v578_v33  ;;  %v540_v36 = vpop.f32.mrf.mxu0 }
  0xd1   : > { %v541_v37 = vadd.f32 %v1329_v50, %v540_v36 }
  0xd2   : > { %v668_v38 = vadd.f32 %v667_v6, %v579_v35 }
  0xd3   : > { %v630_v39 = vadd.f32 %v629_v29, %v541_v37 }
  0xd4   : > { %vm717_vm10 = vcmp.gt.f32.partialorder %v668_v38, 0.0  ;;  %v749_v40 = vmul.f32 0.01, %v668_v38  ;;  %v674_v49 = vpop.f32.mrf.mxu3 }
  0xd5   : > { %v632_v41 = vpop.f32.mrf.mxu1  ;;  %vm702_vm11 = vcmp.gt.f32.partialorder %v630_v39, 0.0  ;;  %v734_v42 = vmul.f32 0.01, %v630_v39 }
  0xd6   : > { %v781_v43 = vsel %vm717_vm10, %v668_v38, %v749_v40 }
  0xd7   : > { %814 = vst.msk [vmem:[%s1338_s26 + $0xa0] sm:$0xff] %vm793_vm3, %v781_v43  ;;  %v766_v44 = vsel %vm702_vm11, %v630_v39, %v734_v42  ;;  %v580_v45 = vpop.f32.mrf.mxu2 }
  0xd8   : > { %799 = vst.msk [vmem:[%s1338_s26 + $0x28] sm:$0xff] %vm793_vm3, %v766_v44  ;;  %v581_v46 = vadd.f32 %v1329_v50, %v580_v45  ;;  %v543_v47 = vpop.f32.mrf.mxu0 }
  0xd9   : > { %v544_v48 = vadd.f32 %v1329_v50, %v543_v47 }
  0xda   : > { %v670_v51 = vadd.f32 %v669_v19, %v581_v46 }
  0xdb   : > { %v633_v52 = vadd.f32 %v632_v41, %v544_v48 }
  0xdc   : > { %vm718_vm12 = vcmp.gt.f32.partialorder %v670_v51, 0.0  ;;  %v750_v53 = vmul.f32 0.01, %v670_v51  ;;  %v677_v1 = vpop.f32.mrf.mxu3 }
  0xdd   : > { %v634_v54 = vpop.f32.mrf.mxu1  ;;  %vm703_vm13 = vcmp.gt.f32.partialorder %v633_v52, 0.0  ;;  %v735_v55 = vmul.f32 0.01, %v633_v52 }
  0xde   : > { %v782_v56 = vsel %vm718_vm12, %v670_v51, %v750_v53 }
  0xdf   : > { %815 = vst.msk [vmem:[%s1338_s26 + $0xa8] sm:$0xff] %vm793_vm3, %v782_v56  ;;  %v767_v57 = vsel %vm703_vm13, %v633_v52, %v735_v55  ;;  %v583_v59 = vpop.f32.mrf.mxu2 }
  0xe0   : > { %800 = vst.msk [vmem:[%s1338_s26 + $0x30] sm:$0xff] %vm793_vm3, %v767_v57  ;;  %v584_v60 = vadd.f32 %v1329_v50, %v583_v59  ;;  %v545_v61 = vpop.f32.mrf.mxu0 }
  0xe1   : > { %v546_v62 = vadd.f32 %v1329_v50, %v545_v61 }
  0xe2   : > { %v673_v63 = vadd.f32 %v672_v34, %v584_v60 }
  0xe3   : > { %v635_v0 = vadd.f32 %v634_v54, %v546_v62 }
  0xe4   : > { %vm719_vm14 = vcmp.gt.f32.partialorder %v673_v63, 0.0  ;;  %v751_v3 = vmul.f32 0.01, %v673_v63  ;;  %v679_v17 = vpop.f32.mrf.mxu3 }
  0xe5   : > { %v637_v4 = vpop.f32.mrf.mxu1  ;;  %vm704_vm15 = vcmp.gt.f32.partialorder %v635_v0, 0.0  ;;  %v736_v5 = vmul.f32 0.01, %v635_v0 }
  0xe6   : > { %v783_v6 = vsel %vm719_vm14, %v673_v63, %v751_v3 }
  0xe7   : > { %816 = vst.msk [vmem:[%s1338_s26 + $0xb0] sm:$0xff] %vm793_vm3, %v783_v6  ;;  %v768_v7 = vsel %vm704_vm15, %v635_v0, %v736_v5  ;;  %v585_v8 = vpop.f32.mrf.mxu2 }
  0xe8   : > { %801 = vst.msk [vmem:[%s1338_s26 + $0x38] sm:$0xff] %vm793_vm3, %v768_v7  ;;  %v586_v9 = vadd.f32 %v1329_v50, %v585_v8  ;;  %v548_v10 = vpop.f32.mrf.mxu0 }
  0xe9   : > { %v549_v11 = vadd.f32 %v1329_v50, %v548_v10 }
  0xea   : > { %v675_v12 = vadd.f32 %v674_v49, %v586_v9 }
  0xeb   : > { %v638_v13 = vadd.f32 %v637_v4, %v549_v11 }
  0xec   : > { %vm720_vm0 = vcmp.gt.f32.partialorder %v675_v12, 0.0  ;;  %v752_v14 = vmul.f32 0.01, %v675_v12  ;;  %v682_v32 = vpop.f32.mrf.mxu3 }
  0xed   : > { %v639_v15 = vpop.f32.mrf.mxu1  ;;  %vm705_vm1 = vcmp.gt.f32.partialorder %v638_v13, 0.0  ;;  %v737_v16 = vmul.f32 0.01, %v638_v13 }
  0xee   : > { %v784_v18 = vsel %vm720_vm0, %v675_v12, %v752_v14 }
  0xef   : > { %817 = vst.msk [vmem:[%s1338_s26 + $0xb8] sm:$0xff] %vm793_vm3, %v784_v18  ;;  %v769_v19 = vsel %vm705_vm1, %v638_v13, %v737_v16  ;;  %v588_v20 = vpop.f32.mrf.mxu2 }
  0xf0   : > { %802 = vst.msk [vmem:[%s1338_s26 + $0x40] sm:$0xff] %vm793_vm3, %v769_v19  ;;  %v589_v21 = vadd.f32 %v1329_v50, %v588_v20  ;;  %v550_v22 = vpop.f32.mrf.mxu0 }
  0xf1   : > { %v551_v23 = vadd.f32 %v1329_v50, %v550_v22 }
  0xf2   : > { %v678_v24 = vadd.f32 %v677_v1, %v589_v21 }
  0xf3   : > { %v640_v25 = vadd.f32 %v639_v15, %v551_v23 }
  0xf4   : > { %vm721_vm2 = vcmp.gt.f32.partialorder %v678_v24, 0.0  ;;  %v753_v26 = vmul.f32 0.01, %v678_v24  ;;  %v684_v47 = vpop.f32.mrf.mxu3 }
  0xf5   : > { %v642_v27 = vpop.f32.mrf.mxu1  ;;  %vm706_vm4 = vcmp.gt.f32.partialorder %v640_v25, 0.0  ;;  %v738_v28 = vmul.f32 0.01, %v640_v25 }
  0xf6   : > { %v785_v29 = vsel %vm721_vm2, %v678_v24, %v753_v26 }
  0xf7   : > { %818 = vst.msk [vmem:[%s1338_s26 + $0xc0] sm:$0xff] %vm793_vm3, %v785_v29  ;;  %v770_v30 = vsel %vm706_vm4, %v640_v25, %v738_v28  ;;  %v590_v31 = vpop.f32.mrf.mxu2 }
  0xf8   : > { %803 = vst.msk [vmem:[%s1338_s26 + $0x48] sm:$0xff] %vm793_vm3, %v770_v30  ;;  %v591_v33 = vadd.f32 %v1329_v50, %v590_v31  ;;  %v553_v34 = vpop.f32.mrf.mxu0 }
  0xf9   : > { %v554_v35 = vadd.f32 %v1329_v50, %v553_v34 }
  0xfa   : > { %v680_v36 = vadd.f32 %v679_v17, %v591_v33 }
  0xfb   : > { %v643_v37 = vadd.f32 %v642_v27, %v554_v35  ;;  %v569_v35 = vadd.f32 %v1329_v50, %v1340_v58 }
  0xfc   : > { %vm722_vm5 = vcmp.gt.f32.partialorder %v680_v36, 0.0  ;;  %v754_v38 = vmul.f32 0.01, %v680_v36  ;;  %v687_v63 = vpop.f32.mrf.mxu3 }
  0xfd   : > { %v644_v39 = vpop.f32.mrf.mxu1  ;;  %vm707_vm6 = vcmp.gt.f32.partialorder %v643_v37, 0.0  ;;  %v739_v40 = vmul.f32 0.01, %v643_v37 }
  0xfe   : > { %v786_v41 = vsel %vm722_vm5, %v680_v36, %v754_v38 }
  0xff   : > { %819 = vst.msk [vmem:[%s1338_s26 + $0xc8] sm:$0xff] %vm793_vm3, %v786_v41  ;;  %v771_v42 = vsel %vm707_vm6, %v643_v37, %v739_v40  ;;  %v593_v43 = vpop.f32.mrf.mxu2 }
 0x100   : > { %804 = vst.msk [vmem:[%s1338_s26 + $0x50] sm:$0xff] %vm793_vm3, %v771_v42  ;;  %v594_v44 = vadd.f32 %v1329_v50, %v593_v43  ;;  %v555_v45 = vpop.f32.mrf.mxu0 }
 0x101   : > { %v556_v46 = vadd.f32 %v1329_v50, %v555_v45 }
 0x102   : > { %v683_v48 = vadd.f32 %v682_v32, %v594_v44 }
 0x103   : > { %v645_v49 = vadd.f32 %v644_v39, %v556_v46 }
 0x104   : > { %vm723_vm7 = vcmp.gt.f32.partialorder %v683_v48, 0.0  ;;  %v755_v51 = vmul.f32 0.01, %v683_v48  ;;  %v689_v15 = vpop.f32.mrf.mxu3 }
 0x105   : > { %v647_v52 = vpop.f32.mrf.mxu1  ;;  %vm708_vm8 = vcmp.gt.f32.partialorder %v645_v49, 0.0  ;;  %v740_v53 = vmul.f32 0.01, %v645_v49 }
 0x106   : > { %v787_v54 = vsel %vm723_vm7, %v683_v48, %v755_v51  ;;  %v571_v48 = vadd.f32 %v1329_v50, %v1345_v2 }
 0x107   : > { %820 = vst.msk [vmem:[%s1338_s26 + $0xd0] sm:$0xff] %vm793_vm3, %v787_v54  ;;  %v772_v55 = vsel %vm708_vm8, %v645_v49, %v740_v53  ;;  %v595_v56 = vpop.f32.mrf.mxu2 }
 0x108   : > { %805 = vst.msk [vmem:[%s1338_s26 + $0x58] sm:$0xff] %vm793_vm3, %v772_v55  ;;  %v596_v57 = vadd.f32 %v1329_v50, %v595_v56  ;;  %v558_v59 = vpop.f32.mrf.mxu0 }
 0x109   : > { %v559_v60 = vadd.f32 %v1329_v50, %v558_v59 }
 0x10a   : > { %v685_v61 = vadd.f32 %v684_v47, %v596_v57 }
 0x10b   : > { %v648_v62 = vadd.f32 %v647_v52, %v559_v60 }
 0x10c   : > { %vm724_vm9 = vcmp.gt.f32.partialorder %v685_v61, 0.0  ;;  %v756_v0 = vmul.f32 0.01, %v685_v61  ;;  %v692_v29 = vpop.f32.mrf.mxu3 }
 0x10d   : > { %v649_v1 = vpop.f32.mrf.mxu1  ;;  %vm709_vm10 = vcmp.gt.f32.partialorder %v648_v62, 0.0  ;;  %v741_v3 = vmul.f32 0.01, %v648_v62 }
 0x10e   : > { %v788_v4 = vsel %vm724_vm9, %v685_v61, %v756_v0 }
 0x10f   : > { %821 = vst.msk [vmem:[%s1338_s26 + $0xd8] sm:$0xff] %vm793_vm3, %v788_v4  ;;  %v773_v5 = vsel %vm709_vm10, %v648_v62, %v741_v3  ;;  %v598_v6 = vpop.f32.mrf.mxu2 }
 0x110   : > { %806 = vst.msk [vmem:[%s1338_s26 + $0x60] sm:$0xff] %vm793_vm3, %v773_v5  ;;  %v599_v7 = vadd.f32 %v1329_v50, %v598_v6  ;;  %v560_v8 = vpop.f32.mrf.mxu0 }
 0x111   : > { %v561_v9 = vadd.f32 %v1329_v50, %v560_v8 }
 0x112   : > { %v688_v10 = vadd.f32 %v687_v63, %v599_v7 }
 0x113   : > { %v650_v11 = vadd.f32 %v649_v1, %v561_v9 }
 0x114   : > { %vm725_vm11 = vcmp.gt.f32.partialorder %v688_v10, 0.0  ;;  %v757_v12 = vmul.f32 0.01, %v688_v10  ;;  %v694_v46 = vpop.f32.mrf.mxu3 }
 0x115   : > { %v652_v13 = vpop.f32.mrf.mxu1  ;;  %vm710_vm12 = vcmp.gt.f32.partialorder %v650_v11, 0.0  ;;  %v742_v14 = vmul.f32 0.01, %v650_v11 }
 0x116   : > { %v789_v16 = vsel %vm725_vm11, %v688_v10, %v757_v12 }
 0x117   : > { %822 = vst.msk [vmem:[%s1338_s26 + $0xe0] sm:$0xff] %vm793_vm3, %v789_v16  ;;  %v774_v17 = vsel %vm710_vm12, %v650_v11, %v742_v14  ;;  %v600_v18 = vpop.f32.mrf.mxu2 }
 0x118   : > { %807 = vst.msk [vmem:[%s1338_s26 + $0x68] sm:$0xff] %vm793_vm3, %v774_v17  ;;  %v601_v19 = vadd.f32 %v1329_v50, %v600_v18  ;;  %v563_v20 = vpop.f32.mrf.mxu0 }
 0x119   : > { %v564_v21 = vadd.f32 %v1329_v50, %v563_v20 }
 0x11a   : > { %v690_v22 = vadd.f32 %v689_v15, %v601_v19 }
 0x11b   : > { %v653_v23 = vadd.f32 %v652_v13, %v564_v21 }
 0x11c   : > { %vm726_vm13 = vcmp.gt.f32.partialorder %v690_v22, 0.0  ;;  %v758_v24 = vmul.f32 0.01, %v690_v22 }
 0x11d   : > { %v654_v25 = vpop.f32.mrf.mxu1  ;;  %vm711_vm14 = vcmp.gt.f32.partialorder %v653_v23, 0.0  ;;  %v743_v26 = vmul.f32 0.01, %v653_v23 }
 0x11e   : > { %v790_v27 = vsel %vm726_vm13, %v690_v22, %v758_v24 }
 0x11f   : > { %823 = vst.msk [vmem:[%s1338_s26 + $0xe8] sm:$0xff] %vm793_vm3, %v790_v27  ;;  %v775_v28 = vsel %vm711_vm14, %v653_v23, %v743_v26  ;;  %v603_v30 = vpop.f32.mrf.mxu2 }
 0x120   : > { %808 = vst.msk [vmem:[%s1338_s26 + $0x70] sm:$0xff] %vm793_vm3, %v775_v28  ;;  %v604_v31 = vadd.f32 %v1329_v50, %v603_v30  ;;  %v565_v32 = vpop.f32.mrf.mxu0 }
 0x121   : > { %v566_v33 = vadd.f32 %v1329_v50, %v565_v32 }
 0x122   : > { %v693_v34 = vadd.f32 %v692_v29, %v604_v31 }
 0x123   : > { %v655_v36 = vadd.f32 %v654_v25, %v566_v33 }
 0x124   : > { %vm727_vm15 = vcmp.gt.f32.partialorder %v693_v34, 0.0  ;;  %v759_v37 = vmul.f32 0.01, %v693_v34 }
 0x125   : > { %v657_v38 = vpop.f32.mrf.mxu1  ;;  %vm712_vm0 = vcmp.gt.f32.partialorder %v655_v36, 0.0  ;;  %v744_v39 = vmul.f32 0.01, %v655_v36 }
 0x126   : > { %v658_v40 = vadd.f32 %v657_v38, %v569_v35  ;;  %v791_v41 = vsel %vm727_vm15, %v693_v34, %v759_v37 }
 0x127   : > { %824 = vst.msk [vmem:[%s1338_s26 + $0xf0] sm:$0xff] %vm793_vm3, %v791_v41  ;;  %v776_v42 = vsel %vm712_vm0, %v655_v36, %v744_v39  ;;  %v605_v44 = vpop.f32.mrf.mxu2 }
 0x128   : > { %vm713_vm1 = vcmp.gt.f32.partialorder %v658_v40, 0.0  ;;  %v745_v43 = vmul.f32 0.01, %v658_v40  ;;  %809 = vst.msk [vmem:[%s1338_s26 + $0x78] sm:$0xff] %vm793_vm3, %v776_v42  ;;  %v606_v58 = vadd.f32 %v1329_v50, %v605_v44 }
 0x12a   : > { %v777_v45 = vsel %vm713_vm1, %v658_v40, %v745_v43  ;;  %v695_v47 = vadd.f32 %v694_v46, %v606_v58 }
 0x12b   : > { %810 = vst.msk [vmem:[%s1338_s26 + $0x80] sm:$0xff] %vm793_vm3, %v777_v45 }
 0x12c   : > { %vm728_vm2 = vcmp.gt.f32.partialorder %v695_v47, 0.0  ;;  %v760_v49 = vmul.f32 0.01, %v695_v47 }
 0x12d   : > { %v659_v51 = vpop.f32.mrf.mxu1 }
 0x12e   : > { %v660_v52 = vadd.f32 %v659_v51, %v571_v48  ;;  %v792_v53 = vsel %vm728_vm2, %v695_v47, %v760_v49 }
 0x12f   : > { %825 = vst.msk [vmem:[%s1338_s26 + $0xf8] sm:$0xff] %vm793_vm3, %v792_v53 }
 0x130   : > { %vm714_vm4 = vcmp.gt.f32.partialorder %v660_v52, 0.0  ;;  %v746_v54 = vmul.f32 0.01, %v660_v52 }
 0x132   : > { %v778_v55 = vsel %vm714_vm4, %v660_v52, %v746_v54 }
 0x133   : > { %811 = vst.msk [vmem:[%s1338_s26 + $0x88] sm:$0xff] %vm793_vm3, %v778_v55 }
 0x134 PF: > { %s13_s12 = sadd.s32 1, %s1165_s12  }
 0x135   : > { %p10_p4 = scmp.ge.s32.totalorder %s13_s12, 10  }
 0x137   :  { %12 = sbr.rel (!%p10_p4) target bundleno = 1 (0x1), region = 62 }

// kernel: seq2seq3d_forward.22
= control target key start
LH: loop header
LB: loop body
LE: loop exit
PB: predicated region body
PF: predicated region fallthrough
CT: control target
= control target key end

     0   :  { %s1096_s14 = smov 0   ;;  %s1350_s0 = inlined_call_operand.vmem [shape: bf16[2048,216], index: 0, kind: input, shape index: {}]   ;;  %s1351_s1 = inlined_call_operand.vmem [shape: bf16[216,1], index: 1, kind: input, shape index: {}]   ;;  %s1352_s2 = inlined_call_operand.<no memory space> [shape: f32[1,1], index: 2, kind: input, shape index: {}]   ;;  %s1353_s3 = inlined_call_operand.vmem [shape: f32[2048,1], index: 3, kind: output, shape index: {}]  }
   0x1   :  { %v8_v0 = vstv %s1352_s2 }
   0x2   :  { %9 = vst [vmem:[#allocation2] sm:$0x1] %v8_v0 }
   0x3 LB: > { %s788_s15 = sadd.s32 4294967295, %s1071_s14   ;;  %p792_p0 = scmp.ge.s32.totalorder %s1071_s14, 1  ;;  %s1071_s14 = sphi %s1096_s14, %s15_s14  }
   0x4   : > { %p141_p1 = scmp.lt.s32.totalorder %s1071_s14, 9 }
   0x6   : > { %p142_p2 = pnand %p792_p0, %p141_p1 }
   0x7   : > { %s793_s21 = sshll.u32 (!%p142_p2), %s788_s15, 5 }
   0x8   : > { %145 = sbr.rel (%p142_p2) target bundleno = 307 (0x133), region = 32  ;;  %p167_p3 = scmp.lt.s32.totalorder (!%p142_p2), %s793_s21, 255 }
   0xd   : > { %v1036_v1 = vld [vmem:[%s1351_s1 + $0x38] sm:$0xff]  ;;  %v238_v2 = vld [vmem:[%s1351_s1 + $0x68] sm:$0xf]  ;;  %vm517_vm0 = vcmask 1043456   ;;  %v1035_v4 = vld [vmem:[%s1351_s1 + $0x30] sm:$0xff]  ;;  %s1355_s21 = smov (!%p167_p3, %s793_s21), 255 }
   0xe   : > { %v440_v3 = vunpack.c.l.b16 %v238_v2  ;;  %521 = vmatpush.bf16.msra.mxu0 %v1036_v1  ;;  %1042 = vmatpush.bf16.msra.mxu2 %v1036_v1  ;;  %v1041_v7 = vld [vmem:[%s1351_s1 + $0x60] sm:$0xff]  ;;  %v1034_v8 = vld [vmem:[%s1351_s1 + $0x28] sm:$0xff]  ;;  %v1040_v9 = vld [vmem:[%s1351_s1 + $0x58] sm:$0xff]  ;;  %s996_s7 = sshll.u32 %s1355_s21, 3  ;;  %vm468_vm1 = vcmask 719872   ;;  %vm699_vm2 = vcmask 7168  }
   0xf   : > { %v1033_v10 = vld [vmem:[%s1351_s1 + $0x20] sm:$0xff]  ;;  %v1039_v11 = vld [vmem:[%s1351_s1 + $0x50] sm:$0xff]  ;;  %v1032_v12 = vld [vmem:[%s1351_s1 + $0x18] sm:$0xff]  ;;  %s1145_s15 = scalar_lea.vmem %s1350_s0, %s996_s7  ;;  %s1244_s24 = scalar_lea.vmem %s1353_s3, %s996_s7 }
  0x10   : > { %v454_v5 = vpack.c.b16 %v440_v3, %v440_v3  ;;  %v1038_v13 = vld [vmem:[%s1351_s1 + $0x48] sm:$0xff]  ;;  %v1031_v14 = vld [vmem:[%s1351_s1 + $0x10] sm:$0xff]  ;;  %v1037_v15 = vld [vmem:[%s1351_s1 + $0x40] sm:$0xff] }
  0x11   : > { %v1030_v16 = vld [vmem:[%s1351_s1 + $0x8] sm:$0xff]  ;;  %v997_v17 = vld [vmem:[%s1145_s15 + $0x4] sm:$0xf]  ;;  %v1015_v19 = vld [vmem:[%s1145_s15 + $0x94] sm:$0xf] }
  0x12   : > { %v519_v6 = vsel %vm517_vm0, %v454_v5, 0  ;;  %522 = vmatpush.bf16.msra.mxu0 %v1035_v4  ;;  %1043 = vmatpush.bf16.msra.mxu2 %v1035_v4  ;;  %v802_v18 = vld [vmem:[%s1145_s15 + $0x8] sm:$0xf0]  ;;  %v874_v20 = vld [vmem:[%s1145_s15 + $0x98] sm:$0xf0]  ;;  %v1029_v22 = vld [vmem:[%s1351_s1] sm:$0xff] }
  0x13   : > { %612 = vmatpush.bf16.msra.mxu1 %v519_v6  ;;  %1050 = vmatpush.bf16.msra.mxu3 %v519_v6  ;;  %v805_v21 = vor.u32 %v997_v17, %v802_v18  ;;  %v800_v23 = vld [vmem:[%s1145_s15] sm:$0xf]  ;;  %v998_v24 = vld [vmem:[%s1145_s15 + $0x4] sm:$0xf0]  ;;  %v877_v25 = vor.u32 %v1015_v19, %v874_v20  ;;  %v999_v30 = vld [vmem:[%s1145_s15 + $0x14] sm:$0xf] }
  0x14   : > { %v864_v26 = vld [vmem:[%s1145_s15 + $0x80] sm:$0xf]  ;;  %v1014_v27 = vld [vmem:[%s1145_s15 + $0x84] sm:$0xf0]  ;;  %v801_v28 = vor.u32 %v998_v24, %v800_v23  ;;  %v810_v31 = vld [vmem:[%s1145_s15 + $0x18] sm:$0xf0] }
  0x15   : > { %v865_v29 = vor.u32 %v1014_v27, %v864_v26  ;;  %v1017_v32 = vld [vmem:[%s1145_s15 + $0xa4] sm:$0xf]  ;;  %v882_v33 = vld [vmem:[%s1145_s15 + $0xa8] sm:$0xf0]  ;;  %v813_v34 = vor.u32 %v999_v30, %v810_v31  ;;  %v808_v35 = vld [vmem:[%s1145_s15 + $0x10] sm:$0xf] }
  0x16   : > { %523 = vmatpush.bf16.msra.mxu0 %v1034_v8  ;;  %1044 = vmatpush.bf16.msra.mxu2 %v1034_v8  ;;  %v1000_v36 = vld [vmem:[%s1145_s15 + $0x14] sm:$0xf0]  ;;  %v885_v37 = vor.u32 %v1017_v32, %v882_v33  ;;  %v872_v38 = vld [vmem:[%s1145_s15 + $0x90] sm:$0xf]  ;;  %v1001_v42 = vld [vmem:[%s1145_s15 + $0x24] sm:$0xf] }
  0x17   : > { %613 = vmatpush.bf16.msra.mxu1 %v1041_v7  ;;  %1051 = vmatpush.bf16.msra.mxu3 %v1041_v7  ;;  %v1016_v39 = vld [vmem:[%s1145_s15 + $0x94] sm:$0xf0]  ;;  %v809_v40 = vor.u32 %v1000_v36, %v808_v35  ;;  %v818_v43 = vld [vmem:[%s1145_s15 + $0x28] sm:$0xf0]  ;;  %v1019_v44 = vld [vmem:[%s1145_s15 + $0xb4] sm:$0xf] }
  0x18   : > { %v873_v41 = vor.u32 %v1016_v39, %v872_v38  ;;  %v890_v45 = vld [vmem:[%s1145_s15 + $0xb8] sm:$0xf0]  ;;  %v821_v46 = vor.u32 %v1001_v42, %v818_v43  ;;  %v816_v47 = vld [vmem:[%s1145_s15 + $0x20] sm:$0xf]  ;;  %v1002_v48 = vld [vmem:[%s1145_s15 + $0x24] sm:$0xf0] }
  0x19   : > { %v893_v49 = vor.u32 %v1019_v44, %v890_v45  ;;  %v880_v50 = vld [vmem:[%s1145_s15 + $0xa0] sm:$0xf]  ;;  %v1018_v51 = vld [vmem:[%s1145_s15 + $0xa4] sm:$0xf0]  ;;  %v817_v52 = vor.u32 %v1002_v48, %v816_v47  ;;  %v1003_v54 = vld [vmem:[%s1145_s15 + $0x34] sm:$0xf] }
  0x1a   : > { %524 = vmatpush.bf16.msra.mxu0 %v1033_v10  ;;  %1045 = vmatpush.bf16.msra.mxu2 %v1033_v10  ;;  %v881_v53 = vor.u32 %v1018_v51, %v880_v50  ;;  %v826_v55 = vld [vmem:[%s1145_s15 + $0x38] sm:$0xf0]  ;;  %v1021_v56 = vld [vmem:[%s1145_s15 + $0xc4] sm:$0xf]  ;;  %v898_v57 = vld [vmem:[%s1145_s15 + $0xc8] sm:$0xf0] }
  0x1b   : > { %614 = vmatpush.bf16.msra.mxu1 %v1040_v9  ;;  %1052 = vmatpush.bf16.msra.mxu3 %v1040_v9  ;;  %v829_v58 = vor.u32 %v1003_v54, %v826_v55  ;;  %v824_v59 = vld [vmem:[%s1145_s15 + $0x30] sm:$0xf]  ;;  %v1004_v60 = vld [vmem:[%s1145_s15 + $0x34] sm:$0xf0]  ;;  %v901_v61 = vor.u32 %v1021_v56, %v898_v57  ;;  %v1005_v2 = vld [vmem:[%s1145_s15 + $0x44] sm:$0xf] }
  0x1c   : > { %v888_v62 = vld [vmem:[%s1145_s15 + $0xb0] sm:$0xf]  ;;  %v1020_v63 = vld [vmem:[%s1145_s15 + $0xb4] sm:$0xf0]  ;;  %v825_v0 = vor.u32 %v1004_v60, %v824_v59  ;;  %v834_v3 = vld [vmem:[%s1145_s15 + $0x48] sm:$0xf0] }
  0x1d   : > { %v889_v1 = vor.u32 %v1020_v63, %v888_v62  ;;  %v1023_v4 = vld [vmem:[%s1145_s15 + $0xd4] sm:$0xf]  ;;  %v906_v5 = vld [vmem:[%s1145_s15 + $0xd8] sm:$0xf0]  ;;  %v837_v6 = vor.u32 %v1005_v2, %v834_v3  ;;  %v832_v7 = vld [vmem:[%s1145_s15 + $0x40] sm:$0xf] }
  0x1e   : > { %525 = vmatpush.bf16.msra.mxu0 %v1032_v12  ;;  %1046 = vmatpush.bf16.msra.mxu2 %v1032_v12  ;;  %v1006_v8 = vld [vmem:[%s1145_s15 + $0x44] sm:$0xf0]  ;;  %v909_v9 = vor.u32 %v1023_v4, %v906_v5  ;;  %v896_v10 = vld [vmem:[%s1145_s15 + $0xc0] sm:$0xf]  ;;  %v914_v17 = vld [vmem:[%s1145_s15 + $0xe8] sm:$0xf0] }
  0x1f   : > { %615 = vmatpush.bf16.msra.mxu1 %v1039_v11  ;;  %1053 = vmatpush.bf16.msra.mxu3 %v1039_v11  ;;  %v1022_v11 = vld [vmem:[%s1145_s15 + $0xc4] sm:$0xf0]  ;;  %v833_v12 = vor.u32 %v1006_v8, %v832_v7  ;;  %v840_v19 = vld [vmem:[%s1145_s15 + $0x50] sm:$0xf]  ;;  %v1008_v20 = vld [vmem:[%s1145_s15 + $0x54] sm:$0xf0] }
  0x20   : > { %v1024_v23 = vld [vmem:[%s1145_s15 + $0xd4] sm:$0xf0]  ;;  %v841_v24 = vor.u32 %v1008_v20, %v840_v19  ;;  %v1009_v26 = vld [vmem:[%s1145_s15 + $0x64] sm:$0xf]  ;;  %v850_v27 = vld [vmem:[%s1145_s15 + $0x68] sm:$0xf0] }
  0x21   : > { %v853_v30 = vor.u32 %v1009_v26, %v850_v27  ;;  %v848_v31 = vld [vmem:[%s1145_s15 + $0x60] sm:$0xf]  ;;  %v1010_v32 = vld [vmem:[%s1145_s15 + $0x64] sm:$0xf0]  ;;  %v1011_v38 = vld [vmem:[%s1145_s15 + $0x74] sm:$0xf] }
  0x22   : > { %526 = vmatpush.bf16.msra.mxu0 %v1031_v14  ;;  %1047 = vmatpush.bf16.msra.mxu2 %v1031_v14  ;;  %v1007_v14 = vld [vmem:[%s1145_s15 + $0x54] sm:$0xf]  ;;  %v1026_v35 = vld [vmem:[%s1145_s15 + $0xe4] sm:$0xf0]  ;;  %v849_v36 = vor.u32 %v1010_v32, %v848_v31  ;;  %v858_v39 = vld [vmem:[%s1145_s15 + $0x78] sm:$0xf0] }
  0x23   : > { %616 = vmatpush.bf16.msra.mxu1 %v1038_v13  ;;  %1054 = vmatpush.bf16.msra.mxu3 %v1038_v13  ;;  %v897_v13 = vor.u32 %v1022_v11, %v896_v10  ;;  %v1012_v42 = vld [vmem:[%s1145_s15 + $0x74] sm:$0xf0]  ;;  %v920_v43 = vld [vmem:[%s1145_s15 + $0xf0] sm:$0xf]  ;;  %v1013_v47 = vld [vmem:[%s1145_s15 + $0x84] sm:$0xf] }
  0x24   : > { %v1028_v44 = vld [vmem:[%s1145_s15 + $0xf4] sm:$0xf0]  ;;  %v866_v48 = vld [vmem:[%s1145_s15 + $0x88] sm:$0xf0]  ;;  %v1235_v51 = vld [vmem:[#allocation2] ss:$0 sm:$0xff] }
  0x26   : > { %527 = vmatpush.bf16.msra.mxu0 %v1030_v16  ;;  %1048 = vmatpush.bf16.msra.mxu2 %v1030_v16  ;;  %v1025_v16 = vld [vmem:[%s1145_s15 + $0xe4] sm:$0xf] }
  0x27   : > { %617 = vmatpush.bf16.msra.mxu1 %v1037_v15  ;;  %1055 = vmatpush.bf16.msra.mxu3 %v1037_v15  ;;  %v842_v15 = vld [vmem:[%s1145_s15 + $0x58] sm:$0xf0] }
  0x28   : > { %v845_v18 = vor.u32 %v1007_v14, %v842_v15 }
  0x2a   : > { %978 = vmatmul.msk.bf16.vlgmr.msra.gmra.mxu1 %vm468_vm1, %v805_v21  ;;  %528 = vmatpush.bf16.msra.mxu0 %v1029_v22  ;;  %v917_v21 = vor.u32 %v1025_v16, %v914_v17 }
  0x2b   : > { %987 = vmatmul.msk.bf16.vlgmr.msra.gmra.mxu3 %vm468_vm1, %v877_v25  ;;  %1049 = vmatpush.bf16.msra.mxu2 %v1029_v22  ;;  %v904_v22 = vld [vmem:[%s1145_s15 + $0xd0] sm:$0xf] }
  0x2c   : > { %v905_v25 = vor.u32 %v1024_v23, %v904_v22 }
  0x2d   : > { %529 = vmatmul.bf16.vlgmr.msra.gmra.mxu0 %v801_v28  ;;  %v1027_v28 = vld [vmem:[%s1145_s15 + $0xf4] sm:$0xf] }
  0x2e   : > { %569 = vmatmul.bf16.vlgmr.msra.gmra.mxu2 %v865_v29  ;;  %v922_v29 = vld [vmem:[%s1145_s15 + $0xf8] sm:$0xf0] }
  0x2f   : > { %v925_v33 = vor.u32 %v1027_v28, %v922_v29 }
  0x3a   : > { %979 = vmatmul.msk.bf16.gmra.mxu1 %vm468_vm1, %v813_v34  ;;  %v912_v34 = vld [vmem:[%s1145_s15 + $0xe0] sm:$0xf] }
  0x3b   : > { %988 = vmatmul.msk.bf16.gmra.mxu3 %vm468_vm1, %v885_v37  ;;  %v913_v37 = vor.u32 %v1026_v35, %v912_v34 }
  0x3d   : > { %534 = vmatmul.bf16.gmra.mxu0 %v809_v40  ;;  %v861_v40 = vor.u32 %v1011_v38, %v858_v39 }
  0x3e   : > { %574 = vmatmul.bf16.gmra.mxu2 %v873_v41  ;;  %v856_v41 = vld [vmem:[%s1145_s15 + $0x70] sm:$0xf] }
  0x3f   : > { %v857_v45 = vor.u32 %v1012_v42, %v856_v41 }
  0x4a   : > { %980 = vmatmul.msk.bf16.gmra.mxu1 %vm468_vm1, %v821_v46  ;;  %v921_v46 = vor.u32 %v1028_v44, %v920_v43 }
  0x4b   : > { %989 = vmatmul.msk.bf16.gmra.mxu3 %vm468_vm1, %v893_v49  ;;  %v869_v49 = vor.u32 %v1013_v47, %v866_v48 }
  0x4d   : > { %539 = vmatmul.bf16.gmra.mxu0 %v817_v52 }
  0x4e   : > { %579 = vmatmul.bf16.gmra.mxu2 %v881_v53 }
  0x5a   : > { %981 = vmatmul.msk.bf16.gmra.mxu1 %vm468_vm1, %v829_v58 }
  0x5b   : > { %990 = vmatmul.msk.bf16.gmra.mxu3 %vm468_vm1, %v901_v61 }
  0x5d   : > { %544 = vmatmul.bf16.gmra.mxu0 %v825_v0 }
  0x5e   : > { %584 = vmatmul.bf16.gmra.mxu2 %v889_v1 }
  0x6a   : > { %982 = vmatmul.msk.bf16.gmra.mxu1 %vm468_vm1, %v837_v6 }
  0x6b   : > { %991 = vmatmul.msk.bf16.gmra.mxu3 %vm468_vm1, %v909_v9 }
  0x6d   : > { %549 = vmatmul.bf16.gmra.mxu0 %v833_v12 }
  0x6e   : > { %589 = vmatmul.bf16.gmra.mxu2 %v897_v13 }
  0x7a   : > { %983 = vmatmul.msk.bf16.gmra.mxu1 %vm468_vm1, %v845_v18 }
  0x7b   : > { %992 = vmatmul.msk.bf16.gmra.mxu3 %vm468_vm1, %v917_v21 }
  0x7d   : > { %554 = vmatmul.bf16.gmra.mxu0 %v841_v24 }
  0x7e   : > { %594 = vmatmul.bf16.gmra.mxu2 %v905_v25 }
  0x8a   : > { %984 = vmatmul.msk.bf16.gmra.mxu1 %vm468_vm1, %v853_v30 }
  0x8b   : > { %993 = vmatmul.msk.bf16.gmra.mxu3 %vm468_vm1, %v925_v33 }
  0x8d   : > { %559 = vmatmul.bf16.gmra.mxu0 %v849_v36 }
  0x8e   : > { %599 = vmatmul.bf16.gmra.mxu2 %v913_v37 }
  0x9a   : > { %985 = vmatmul.msk.bf16.gmra.mxu1 %vm468_vm1, %v861_v40 }
  0x9d   : > { %564 = vmatmul.bf16.gmra.mxu0 %v857_v45 }
  0x9e   : > { %604 = vmatmul.bf16.gmra.mxu2 %v921_v46 }
  0xa7   : > { %v619_v50 = vpop.f32.mrf.mxu1 }
  0xaa   : > { %986 = vmatmul.msk.bf16.gmra.mxu1 %vm468_vm1, %v869_v49  ;;  %v530_v52 = vpop.f32.mrf.mxu0 }
  0xab   : > { %v531_v53 = vadd.f32 %v1235_v51, %v530_v52 }
  0xad   : > { %v620_v54 = vadd.f32 %v619_v50, %v531_v53 }
  0xae   : > { %v664_v55 = vpop.f32.mrf.mxu3 }
  0xaf   : > { %v621_v56 = vpop.f32.mrf.mxu1  ;;  %700 = vst.msk [vmem:[%s1244_s24] sm:$0xff] %vm699_vm2, %v620_v54 }
  0xb1   : > { %v1248_v57 = vpop.f32.mrf.mxu2 }
  0xb2   : > { %v532_v58 = vpop.f32.mrf.mxu0 }
  0xb3   : > { %v533_v59 = vadd.f32 %v1235_v51, %v532_v58 }
  0xb5   : > { %v622_v60 = vadd.f32 %v621_v56, %v533_v59 }
  0xb6   : > { %v666_v61 = vpop.f32.mrf.mxu3 }
  0xb7   : > { %v624_v62 = vpop.f32.mrf.mxu1  ;;  %701 = vst.msk [vmem:[%s1244_s24 + $0x8] sm:$0xff] %vm699_vm2, %v622_v60 }
  0xb9   : > { %v1253_v63 = vpop.f32.mrf.mxu2 }
  0xba   : > { %v535_v0 = vpop.f32.mrf.mxu0 }
  0xbb   : > { %v536_v1 = vadd.f32 %v1235_v51, %v535_v0 }
  0xbd   : > { %v625_v2 = vadd.f32 %v624_v62, %v536_v1 }
  0xbe   : > { %v669_v3 = vpop.f32.mrf.mxu3 }
  0xbf   : > { %v626_v4 = vpop.f32.mrf.mxu1  ;;  %702 = vst.msk [vmem:[%s1244_s24 + $0x10] sm:$0xff] %vm699_vm2, %v625_v2 }
  0xc1   : > { %v575_v5 = vpop.f32.mrf.mxu2 }
  0xc2   : > { %v576_v6 = vadd.f32 %v1235_v51, %v575_v5  ;;  %v537_v7 = vpop.f32.mrf.mxu0 }
  0xc3   : > { %v538_v8 = vadd.f32 %v1235_v51, %v537_v7 }
  0xc4   : > { %v665_v9 = vadd.f32 %v664_v55, %v576_v6 }
  0xc5   : > { %v627_v10 = vadd.f32 %v626_v4, %v538_v8 }
  0xc6   : > { %718 = vst.msk [vmem:[%s1244_s24 + $0x90] sm:$0xff] %vm699_vm2, %v665_v9  ;;  %v671_v12 = vpop.f32.mrf.mxu3 }
  0xc7   : > { %v629_v11 = vpop.f32.mrf.mxu1  ;;  %703 = vst.msk [vmem:[%s1244_s24 + $0x18] sm:$0xff] %vm699_vm2, %v627_v10 }
  0xc9   : > { %v577_v13 = vpop.f32.mrf.mxu2 }
  0xca   : > { %v578_v14 = vadd.f32 %v1235_v51, %v577_v13  ;;  %v540_v15 = vpop.f32.mrf.mxu0 }
  0xcb   : > { %v541_v16 = vadd.f32 %v1235_v51, %v540_v15 }
  0xcc   : > { %v667_v17 = vadd.f32 %v666_v61, %v578_v14 }
  0xcd   : > { %v630_v18 = vadd.f32 %v629_v11, %v541_v16 }
  0xce   : > { %719 = vst.msk [vmem:[%s1244_s24 + $0x98] sm:$0xff] %vm699_vm2, %v667_v17  ;;  %v674_v21 = vpop.f32.mrf.mxu3 }
  0xcf   : > { %v631_v19 = vpop.f32.mrf.mxu1  ;;  %704 = vst.msk [vmem:[%s1244_s24 + $0x20] sm:$0xff] %vm699_vm2, %v630_v18 }
  0xd1   : > { %v580_v20 = vpop.f32.mrf.mxu2 }
  0xd2   : > { %v581_v22 = vadd.f32 %v1235_v51, %v580_v20  ;;  %v542_v23 = vpop.f32.mrf.mxu0 }
  0xd3   : > { %v543_v24 = vadd.f32 %v1235_v51, %v542_v23 }
  0xd4   : > { %v670_v25 = vadd.f32 %v669_v3, %v581_v22 }
  0xd5   : > { %v632_v26 = vadd.f32 %v631_v19, %v543_v24 }
  0xd6   : > { %720 = vst.msk [vmem:[%s1244_s24 + $0xa0] sm:$0xff] %vm699_vm2, %v670_v25  ;;  %v676_v32 = vpop.f32.mrf.mxu3 }
  0xd7   : > { %v634_v27 = vpop.f32.mrf.mxu1  ;;  %705 = vst.msk [vmem:[%s1244_s24 + $0x28] sm:$0xff] %vm699_vm2, %v632_v26 }
  0xd9   : > { %v582_v28 = vpop.f32.mrf.mxu2 }
  0xda   : > { %v583_v29 = vadd.f32 %v1235_v51, %v582_v28  ;;  %v545_v30 = vpop.f32.mrf.mxu0 }
  0xdb   : > { %v546_v31 = vadd.f32 %v1235_v51, %v545_v30 }
  0xdc   : > { %v672_v33 = vadd.f32 %v671_v12, %v583_v29 }
  0xdd   : > { %v635_v34 = vadd.f32 %v634_v27, %v546_v31 }
  0xde   : > { %721 = vst.msk [vmem:[%s1244_s24 + $0xa8] sm:$0xff] %vm699_vm2, %v672_v33  ;;  %v679_v42 = vpop.f32.mrf.mxu3 }
  0xdf   : > { %v636_v35 = vpop.f32.mrf.mxu1  ;;  %706 = vst.msk [vmem:[%s1244_s24 + $0x30] sm:$0xff] %vm699_vm2, %v635_v34 }
  0xe1   : > { %v585_v36 = vpop.f32.mrf.mxu2 }
  0xe2   : > { %v586_v37 = vadd.f32 %v1235_v51, %v585_v36  ;;  %v547_v38 = vpop.f32.mrf.mxu0 }
  0xe3   : > { %v548_v39 = vadd.f32 %v1235_v51, %v547_v38 }
  0xe4   : > { %v675_v40 = vadd.f32 %v674_v21, %v586_v37 }
  0xe5   : > { %v637_v41 = vadd.f32 %v636_v35, %v548_v39 }
  0xe6   : > { %722 = vst.msk [vmem:[%s1244_s24 + $0xb0] sm:$0xff] %vm699_vm2, %v675_v40  ;;  %v681_v52 = vpop.f32.mrf.mxu3 }
  0xe7   : > { %v639_v43 = vpop.f32.mrf.mxu1  ;;  %707 = vst.msk [vmem:[%s1244_s24 + $0x38] sm:$0xff] %vm699_vm2, %v637_v41 }
  0xe9   : > { %v587_v44 = vpop.f32.mrf.mxu2 }
  0xea   : > { %v588_v45 = vadd.f32 %v1235_v51, %v587_v44  ;;  %v550_v46 = vpop.f32.mrf.mxu0 }
  0xeb   : > { %v551_v47 = vadd.f32 %v1235_v51, %v550_v46 }
  0xec   : > { %v677_v48 = vadd.f32 %v676_v32, %v588_v45 }
  0xed   : > { %v640_v49 = vadd.f32 %v639_v43, %v551_v47  ;;  %v571_v43 = vadd.f32 %v1235_v51, %v1248_v57 }
  0xee   : > { %723 = vst.msk [vmem:[%s1244_s24 + $0xb8] sm:$0xff] %vm699_vm2, %v677_v48  ;;  %v684_v62 = vpop.f32.mrf.mxu3 }
  0xef   : > { %v641_v50 = vpop.f32.mrf.mxu1  ;;  %708 = vst.msk [vmem:[%s1244_s24 + $0x40] sm:$0xff] %vm699_vm2, %v640_v49 }
  0xf1   : > { %v590_v53 = vpop.f32.mrf.mxu2 }
  0xf2   : > { %v591_v54 = vadd.f32 %v1235_v51, %v590_v53  ;;  %v552_v55 = vpop.f32.mrf.mxu0 }
  0xf3   : > { %v553_v56 = vadd.f32 %v1235_v51, %v552_v55 }
  0xf4   : > { %v680_v58 = vadd.f32 %v679_v42, %v591_v54 }
  0xf5   : > { %v642_v59 = vadd.f32 %v641_v50, %v553_v56 }
  0xf6   : > { %724 = vst.msk [vmem:[%s1244_s24 + $0xc0] sm:$0xff] %vm699_vm2, %v680_v58  ;;  %v686_v10 = vpop.f32.mrf.mxu3 }
  0xf7   : > { %v644_v60 = vpop.f32.mrf.mxu1  ;;  %709 = vst.msk [vmem:[%s1244_s24 + $0x48] sm:$0xff] %vm699_vm2, %v642_v59 }
  0xf9   : > { %v592_v61 = vpop.f32.mrf.mxu2 }
  0xfa   : > { %v593_v0 = vadd.f32 %v1235_v51, %v592_v61  ;;  %v555_v1 = vpop.f32.mrf.mxu0 }
  0xfb   : > { %v556_v2 = vadd.f32 %v1235_v51, %v555_v1 }
  0xfc   : > { %v682_v3 = vadd.f32 %v681_v52, %v593_v0  ;;  %v573_v52 = vadd.f32 %v1235_v51, %v1253_v63 }
  0xfd   : > { %v645_v4 = vadd.f32 %v644_v60, %v556_v2 }
  0xfe   : > { %725 = vst.msk [vmem:[%s1244_s24 + $0xc8] sm:$0xff] %vm699_vm2, %v682_v3  ;;  %v689_v20 = vpop.f32.mrf.mxu3 }
  0xff   : > { %v646_v5 = vpop.f32.mrf.mxu1  ;;  %710 = vst.msk [vmem:[%s1244_s24 + $0x50] sm:$0xff] %vm699_vm2, %v645_v4 }
 0x101   : > { %v595_v6 = vpop.f32.mrf.mxu2 }
 0x102   : > { %v596_v7 = vadd.f32 %v1235_v51, %v595_v6  ;;  %v557_v8 = vpop.f32.mrf.mxu0 }
 0x103   : > { %v558_v9 = vadd.f32 %v1235_v51, %v557_v8 }
 0x104   : > { %v685_v11 = vadd.f32 %v684_v62, %v596_v7 }
 0x105   : > { %v647_v12 = vadd.f32 %v646_v5, %v558_v9 }
 0x106   : > { %726 = vst.msk [vmem:[%s1244_s24 + $0xd0] sm:$0xff] %vm699_vm2, %v685_v11  ;;  %v691_v29 = vpop.f32.mrf.mxu3 }
 0x107   : > { %v649_v13 = vpop.f32.mrf.mxu1  ;;  %711 = vst.msk [vmem:[%s1244_s24 + $0x58] sm:$0xff] %vm699_vm2, %v647_v12 }
 0x109   : > { %v597_v14 = vpop.f32.mrf.mxu2 }
 0x10a   : > { %v598_v15 = vadd.f32 %v1235_v51, %v597_v14  ;;  %v560_v16 = vpop.f32.mrf.mxu0 }
 0x10b   : > { %v561_v17 = vadd.f32 %v1235_v51, %v560_v16 }
 0x10c   : > { %v687_v18 = vadd.f32 %v686_v10, %v598_v15 }
 0x10d   : > { %v650_v19 = vadd.f32 %v649_v13, %v561_v17 }
 0x10e   : > { %727 = vst.msk [vmem:[%s1244_s24 + $0xd8] sm:$0xff] %vm699_vm2, %v687_v18  ;;  %v694_v37 = vpop.f32.mrf.mxu3 }
 0x10f   : > { %v651_v21 = vpop.f32.mrf.mxu1  ;;  %712 = vst.msk [vmem:[%s1244_s24 + $0x60] sm:$0xff] %vm699_vm2, %v650_v19 }
 0x111   : > { %v600_v22 = vpop.f32.mrf.mxu2 }
 0x112   : > { %v601_v23 = vadd.f32 %v1235_v51, %v600_v22  ;;  %v562_v24 = vpop.f32.mrf.mxu0 }
 0x113   : > { %v563_v25 = vadd.f32 %v1235_v51, %v562_v24 }
 0x114   : > { %v690_v26 = vadd.f32 %v689_v20, %v601_v23 }
 0x115   : > { %v652_v27 = vadd.f32 %v651_v21, %v563_v25 }
 0x116   : > { %728 = vst.msk [vmem:[%s1244_s24 + $0xe0] sm:$0xff] %vm699_vm2, %v690_v26  ;;  %v696_v49 = vpop.f32.mrf.mxu3 }
 0x117   : > { %v654_v28 = vpop.f32.mrf.mxu1  ;;  %713 = vst.msk [vmem:[%s1244_s24 + $0x68] sm:$0xff] %vm699_vm2, %v652_v27 }
 0x119   : > { %v602_v30 = vpop.f32.mrf.mxu2 }
 0x11a   : > { %v603_v31 = vadd.f32 %v1235_v51, %v602_v30  ;;  %v565_v32 = vpop.f32.mrf.mxu0 }
 0x11b   : > { %v566_v33 = vadd.f32 %v1235_v51, %v565_v32 }
 0x11c   : > { %v692_v34 = vadd.f32 %v691_v29, %v603_v31 }
 0x11d   : > { %v655_v35 = vadd.f32 %v654_v28, %v566_v33 }
 0x11e   : > { %729 = vst.msk [vmem:[%s1244_s24 + $0xe8] sm:$0xff] %vm699_vm2, %v692_v34 }
 0x11f   : > { %v656_v36 = vpop.f32.mrf.mxu1  ;;  %714 = vst.msk [vmem:[%s1244_s24 + $0x70] sm:$0xff] %vm699_vm2, %v655_v35 }
 0x121   : > { %v605_v38 = vpop.f32.mrf.mxu2 }
 0x122   : > { %v606_v39 = vadd.f32 %v1235_v51, %v605_v38  ;;  %v567_v40 = vpop.f32.mrf.mxu0 }
 0x123   : > { %v568_v41 = vadd.f32 %v1235_v51, %v567_v40 }
 0x124   : > { %v695_v42 = vadd.f32 %v694_v37, %v606_v39 }
 0x125   : > { %v657_v44 = vadd.f32 %v656_v36, %v568_v41 }
 0x126   : > { %730 = vst.msk [vmem:[%s1244_s24 + $0xf0] sm:$0xff] %vm699_vm2, %v695_v42 }
 0x127   : > { %v659_v45 = vpop.f32.mrf.mxu1  ;;  %715 = vst.msk [vmem:[%s1244_s24 + $0x78] sm:$0xff] %vm699_vm2, %v657_v44 }
 0x128   : > { %v660_v46 = vadd.f32 %v659_v45, %v571_v43 }
 0x129   : > { %v607_v47 = vpop.f32.mrf.mxu2 }
 0x12a   : > { %716 = vst.msk [vmem:[%s1244_s24 + $0x80] sm:$0xff] %vm699_vm2, %v660_v46  ;;  %v608_v48 = vadd.f32 %v1235_v51, %v607_v47 }
 0x12c   : > { %v697_v50 = vadd.f32 %v696_v49, %v608_v48 }
 0x12e   : > { %731 = vst.msk [vmem:[%s1244_s24 + $0xf8] sm:$0xff] %vm699_vm2, %v697_v50 }
 0x12f   : > { %v661_v57 = vpop.f32.mrf.mxu1 }
 0x130   : > { %v662_v53 = vadd.f32 %v661_v57, %v573_v52 }
 0x132   : > { %717 = vst.msk [vmem:[%s1244_s24 + $0x88] sm:$0xff] %vm699_vm2, %v662_v53 }
 0x133 PF: > { %s15_s14 = sadd.s32 1, %s1071_s14  }
 0x134   : > { %p12_p4 = scmp.ge.s32.totalorder %s15_s14, 10  }
 0x136   :  { %14 = sbr.rel (!%p12_p4) target bundleno = 3 (0x3), region = 62 }

// kernel: seq2seq3d_forward.20
= control target key start
LH: loop header
LB: loop body
LE: loop exit
PB: predicated region body
PF: predicated region fallthrough
CT: control target
= control target key end

     0   :  { %vm354_vm0 = vcmask 1043456   ;;  %vm305_vm1 = vcmask 719872   ;;  %vm536_vm2 = vcmask 7168   ;;  %s1270_s1 = inlined_call_operand.vmem [shape: bf16[216,1], index: 1, kind: input, shape index: {}]   ;;  %s1271_s0 = inlined_call_operand.vmem [shape: bf16[256,216], index: 0, kind: input, shape index: {}]   ;;  %s1272_s2 = inlined_call_operand.<no memory space> [shape: f32[1,1], index: 2, kind: input, shape index: {}]   ;;  %s1273_s3 = inlined_call_operand.vmem [shape: f32[256,1], index: 3, kind: output, shape index: {}]  }
   0x1   :  { %v808_v0 = vld [vmem:[%s1270_s1 + $0x38] sm:$0xff]  ;;  %v75_v1 = vld [vmem:[%s1270_s1 + $0x68] sm:$0xf]  ;;  %v807_v3 = vld [vmem:[%s1270_s1 + $0x30] sm:$0xff] }
   0x2   :  { %v277_v2 = vunpack.c.l.b16 %v75_v1  ;;  %358 = vmatpush.bf16.msra.mxu0 %v808_v0  ;;  %814 = vmatpush.bf16.msra.mxu2 %v808_v0  ;;  %v813_v6 = vld [vmem:[%s1270_s1 + $0x60] sm:$0xff]  ;;  %v806_v7 = vld [vmem:[%s1270_s1 + $0x28] sm:$0xff]  ;;  %v812_v8 = vld [vmem:[%s1270_s1 + $0x58] sm:$0xff] }
   0x3   :  { %v805_v9 = vld [vmem:[%s1270_s1 + $0x20] sm:$0xff]  ;;  %v811_v10 = vld [vmem:[%s1270_s1 + $0x50] sm:$0xff]  ;;  %v804_v11 = vld [vmem:[%s1270_s1 + $0x18] sm:$0xff] }
   0x4   :  { %v291_v4 = vpack.c.b16 %v277_v2, %v277_v2  ;;  %v810_v12 = vld [vmem:[%s1270_s1 + $0x48] sm:$0xff]  ;;  %v803_v13 = vld [vmem:[%s1270_s1 + $0x10] sm:$0xff]  ;;  %v809_v14 = vld [vmem:[%s1270_s1 + $0x40] sm:$0xff] }
   0x5   :  { %v802_v15 = vld [vmem:[%s1270_s1 + $0x8] sm:$0xff]  ;;  %v769_v16 = vld [vmem:[%s1271_s0 + $0x4] sm:$0xf]  ;;  %v787_v18 = vld [vmem:[%s1271_s0 + $0x94] sm:$0xf] }
   0x6   :  { %v356_v5 = vsel %vm354_vm0, %v291_v4, 0  ;;  %359 = vmatpush.bf16.msra.mxu0 %v807_v3  ;;  %815 = vmatpush.bf16.msra.mxu2 %v807_v3  ;;  %v577_v17 = vld [vmem:[%s1271_s0 + $0x8] sm:$0xf0]  ;;  %v649_v19 = vld [vmem:[%s1271_s0 + $0x98] sm:$0xf0]  ;;  %v801_v21 = vld [vmem:[%s1270_s1] sm:$0xff] }
   0x7   :  { %449 = vmatpush.bf16.msra.mxu1 %v356_v5  ;;  %822 = vmatpush.bf16.msra.mxu3 %v356_v5  ;;  %v580_v20 = vor.u32 %v769_v16, %v577_v17  ;;  %v575_v22 = vld [vmem:[%s1271_s0] sm:$0xf]  ;;  %v770_v23 = vld [vmem:[%s1271_s0 + $0x4] sm:$0xf0]  ;;  %v652_v24 = vor.u32 %v787_v18, %v649_v19  ;;  %v771_v29 = vld [vmem:[%s1271_s0 + $0x14] sm:$0xf] }
   0x8   :  { %v639_v25 = vld [vmem:[%s1271_s0 + $0x80] sm:$0xf]  ;;  %v786_v26 = vld [vmem:[%s1271_s0 + $0x84] sm:$0xf0]  ;;  %v576_v27 = vor.u32 %v770_v23, %v575_v22  ;;  %v585_v30 = vld [vmem:[%s1271_s0 + $0x18] sm:$0xf0] }
   0x9   :  { %v640_v28 = vor.u32 %v786_v26, %v639_v25  ;;  %v789_v31 = vld [vmem:[%s1271_s0 + $0xa4] sm:$0xf]  ;;  %v657_v32 = vld [vmem:[%s1271_s0 + $0xa8] sm:$0xf0]  ;;  %v588_v33 = vor.u32 %v771_v29, %v585_v30  ;;  %v583_v34 = vld [vmem:[%s1271_s0 + $0x10] sm:$0xf] }
   0xa   :  { %360 = vmatpush.bf16.msra.mxu0 %v806_v7  ;;  %816 = vmatpush.bf16.msra.mxu2 %v806_v7  ;;  %v772_v35 = vld [vmem:[%s1271_s0 + $0x14] sm:$0xf0]  ;;  %v660_v36 = vor.u32 %v789_v31, %v657_v32  ;;  %v647_v37 = vld [vmem:[%s1271_s0 + $0x90] sm:$0xf]  ;;  %v773_v41 = vld [vmem:[%s1271_s0 + $0x24] sm:$0xf] }
   0xb   :  { %450 = vmatpush.bf16.msra.mxu1 %v813_v6  ;;  %823 = vmatpush.bf16.msra.mxu3 %v813_v6  ;;  %v788_v38 = vld [vmem:[%s1271_s0 + $0x94] sm:$0xf0]  ;;  %v584_v39 = vor.u32 %v772_v35, %v583_v34  ;;  %v593_v42 = vld [vmem:[%s1271_s0 + $0x28] sm:$0xf0]  ;;  %v791_v43 = vld [vmem:[%s1271_s0 + $0xb4] sm:$0xf] }
   0xc   :  { %v648_v40 = vor.u32 %v788_v38, %v647_v37  ;;  %v665_v44 = vld [vmem:[%s1271_s0 + $0xb8] sm:$0xf0]  ;;  %v596_v45 = vor.u32 %v773_v41, %v593_v42  ;;  %v591_v46 = vld [vmem:[%s1271_s0 + $0x20] sm:$0xf]  ;;  %v774_v47 = vld [vmem:[%s1271_s0 + $0x24] sm:$0xf0] }
   0xd   :  { %v668_v48 = vor.u32 %v791_v43, %v665_v44  ;;  %v655_v49 = vld [vmem:[%s1271_s0 + $0xa0] sm:$0xf]  ;;  %v790_v50 = vld [vmem:[%s1271_s0 + $0xa4] sm:$0xf0]  ;;  %v592_v51 = vor.u32 %v774_v47, %v591_v46  ;;  %v775_v53 = vld [vmem:[%s1271_s0 + $0x34] sm:$0xf] }
   0xe   :  { %361 = vmatpush.bf16.msra.mxu0 %v805_v9  ;;  %817 = vmatpush.bf16.msra.mxu2 %v805_v9  ;;  %v656_v52 = vor.u32 %v790_v50, %v655_v49  ;;  %v601_v54 = vld [vmem:[%s1271_s0 + $0x38] sm:$0xf0]  ;;  %v793_v55 = vld [vmem:[%s1271_s0 + $0xc4] sm:$0xf]  ;;  %v673_v56 = vld [vmem:[%s1271_s0 + $0xc8] sm:$0xf0] }
   0xf   :  { %451 = vmatpush.bf16.msra.mxu1 %v812_v8  ;;  %824 = vmatpush.bf16.msra.mxu3 %v812_v8  ;;  %v604_v57 = vor.u32 %v775_v53, %v601_v54  ;;  %v599_v58 = vld [vmem:[%s1271_s0 + $0x30] sm:$0xf]  ;;  %v776_v59 = vld [vmem:[%s1271_s0 + $0x34] sm:$0xf0]  ;;  %v676_v60 = vor.u32 %v793_v55, %v673_v56  ;;  %v777_v1 = vld [vmem:[%s1271_s0 + $0x44] sm:$0xf] }
  0x10   :  { %v663_v61 = vld [vmem:[%s1271_s0 + $0xb0] sm:$0xf]  ;;  %v792_v62 = vld [vmem:[%s1271_s0 + $0xb4] sm:$0xf0]  ;;  %v600_v63 = vor.u32 %v776_v59, %v599_v58  ;;  %v609_v2 = vld [vmem:[%s1271_s0 + $0x48] sm:$0xf0] }
  0x11   :  { %v664_v0 = vor.u32 %v792_v62, %v663_v61  ;;  %v795_v3 = vld [vmem:[%s1271_s0 + $0xd4] sm:$0xf]  ;;  %v681_v4 = vld [vmem:[%s1271_s0 + $0xd8] sm:$0xf0]  ;;  %v612_v5 = vor.u32 %v777_v1, %v609_v2  ;;  %v607_v6 = vld [vmem:[%s1271_s0 + $0x40] sm:$0xf] }
  0x12   :  { %362 = vmatpush.bf16.msra.mxu0 %v804_v11  ;;  %818 = vmatpush.bf16.msra.mxu2 %v804_v11  ;;  %v778_v7 = vld [vmem:[%s1271_s0 + $0x44] sm:$0xf0]  ;;  %v684_v8 = vor.u32 %v795_v3, %v681_v4  ;;  %v671_v9 = vld [vmem:[%s1271_s0 + $0xc0] sm:$0xf]  ;;  %v689_v16 = vld [vmem:[%s1271_s0 + $0xe8] sm:$0xf0] }
  0x13   :  { %452 = vmatpush.bf16.msra.mxu1 %v811_v10  ;;  %825 = vmatpush.bf16.msra.mxu3 %v811_v10  ;;  %v794_v10 = vld [vmem:[%s1271_s0 + $0xc4] sm:$0xf0]  ;;  %v608_v11 = vor.u32 %v778_v7, %v607_v6  ;;  %v615_v18 = vld [vmem:[%s1271_s0 + $0x50] sm:$0xf]  ;;  %v780_v19 = vld [vmem:[%s1271_s0 + $0x54] sm:$0xf0] }
  0x14   :  { %v796_v22 = vld [vmem:[%s1271_s0 + $0xd4] sm:$0xf0]  ;;  %v616_v23 = vor.u32 %v780_v19, %v615_v18  ;;  %v781_v25 = vld [vmem:[%s1271_s0 + $0x64] sm:$0xf]  ;;  %v625_v26 = vld [vmem:[%s1271_s0 + $0x68] sm:$0xf0] }
  0x15   :  { %v697_v29 = vld [vmem:[%s1271_s0 + $0xf8] sm:$0xf0]  ;;  %v628_v30 = vor.u32 %v781_v25, %v625_v26  ;;  %v623_v31 = vld [vmem:[%s1271_s0 + $0x60] sm:$0xf]  ;;  %v782_v32 = vld [vmem:[%s1271_s0 + $0x64] sm:$0xf0] }
  0x16   :  { %363 = vmatpush.bf16.msra.mxu0 %v803_v13  ;;  %819 = vmatpush.bf16.msra.mxu2 %v803_v13  ;;  %v779_v13 = vld [vmem:[%s1271_s0 + $0x54] sm:$0xf]  ;;  %v687_v34 = vld [vmem:[%s1271_s0 + $0xe0] sm:$0xf]  ;;  %v798_v35 = vld [vmem:[%s1271_s0 + $0xe4] sm:$0xf0] }
  0x17   :  { %453 = vmatpush.bf16.msra.mxu1 %v810_v12  ;;  %826 = vmatpush.bf16.msra.mxu3 %v810_v12  ;;  %v672_v12 = vor.u32 %v794_v10, %v671_v9  ;;  %v688_v37 = vor.u32 %v798_v35, %v687_v34  ;;  %v783_v38 = vld [vmem:[%s1271_s0 + $0x74] sm:$0xf]  ;;  %v631_v41 = vld [vmem:[%s1271_s0 + $0x70] sm:$0xf]  ;;  %v784_v42 = vld [vmem:[%s1271_s0 + $0x74] sm:$0xf0] }
  0x18   :  { %v695_v43 = vld [vmem:[%s1271_s0 + $0xf0] sm:$0xf]  ;;  %v800_v44 = vld [vmem:[%s1271_s0 + $0xf4] sm:$0xf0]  ;;  %v785_v47 = vld [vmem:[%s1271_s0 + $0x84] sm:$0xf] }
  0x19   :  { %v696_v46 = vor.u32 %v800_v44, %v695_v43 }
  0x1a   :  { %364 = vmatpush.bf16.msra.mxu0 %v802_v15  ;;  %820 = vmatpush.bf16.msra.mxu2 %v802_v15  ;;  %v797_v15 = vld [vmem:[%s1271_s0 + $0xe4] sm:$0xf] }
  0x1b   :  { %454 = vmatpush.bf16.msra.mxu1 %v809_v14  ;;  %827 = vmatpush.bf16.msra.mxu3 %v809_v14  ;;  %v617_v14 = vld [vmem:[%s1271_s0 + $0x58] sm:$0xf0] }
  0x1c   :  { %v620_v17 = vor.u32 %v779_v13, %v617_v14 }
  0x1e   :  { %753 = vmatmul.msk.bf16.vlgmr.msra.gmra.mxu1 %vm305_vm1, %v580_v20  ;;  %365 = vmatpush.bf16.msra.mxu0 %v801_v21  ;;  %v692_v20 = vor.u32 %v797_v15, %v689_v16 }
  0x1f   :  { %762 = vmatmul.msk.bf16.vlgmr.msra.gmra.mxu3 %vm305_vm1, %v652_v24  ;;  %821 = vmatpush.bf16.msra.mxu2 %v801_v21  ;;  %v679_v21 = vld [vmem:[%s1271_s0 + $0xd0] sm:$0xf] }
  0x20   :  { %v680_v24 = vor.u32 %v796_v22, %v679_v21 }
  0x21   :  { %366 = vmatmul.bf16.vlgmr.msra.gmra.mxu0 %v576_v27  ;;  %v8_v27 = vstv %s1272_s2 }
  0x22   :  { %406 = vmatmul.bf16.vlgmr.msra.gmra.mxu2 %v640_v28  ;;  %v799_v28 = vld [vmem:[%s1271_s0 + $0xf4] sm:$0xf]  ;;  %9 = vst [vmem:[#allocation2] sm:$0x1] %v8_v27 }
  0x2e   :  { %754 = vmatmul.msk.bf16.gmra.mxu1 %vm305_vm1, %v588_v33  ;;  %v700_v33 = vor.u32 %v799_v28, %v697_v29 }
  0x2f   :  { %763 = vmatmul.msk.bf16.gmra.mxu3 %vm305_vm1, %v660_v36  ;;  %v624_v36 = vor.u32 %v782_v32, %v623_v31 }
  0x31   :  { %371 = vmatmul.bf16.gmra.mxu0 %v584_v39  ;;  %v633_v39 = vld [vmem:[%s1271_s0 + $0x78] sm:$0xf0] }
  0x32   :  { %411 = vmatmul.bf16.gmra.mxu2 %v648_v40  ;;  %v636_v40 = vor.u32 %v783_v38, %v633_v39 }
  0x3e   :  { %755 = vmatmul.msk.bf16.gmra.mxu1 %vm305_vm1, %v596_v45  ;;  %v632_v45 = vor.u32 %v784_v42, %v631_v41 }
  0x3f   :  { %764 = vmatmul.msk.bf16.gmra.mxu3 %vm305_vm1, %v668_v48  ;;  %v641_v48 = vld [vmem:[%s1271_s0 + $0x88] sm:$0xf0] }
  0x40   :  { %v644_v49 = vor.u32 %v785_v47, %v641_v48 }
  0x41   :  { %376 = vmatmul.bf16.gmra.mxu0 %v592_v51  ;;  %v1101_v51 = vld [vmem:[#allocation2] ss:$0 sm:$0xff] }
  0x42   :  { %416 = vmatmul.bf16.gmra.mxu2 %v656_v52 }
  0x4e   :  { %756 = vmatmul.msk.bf16.gmra.mxu1 %vm305_vm1, %v604_v57 }
  0x4f   :  { %765 = vmatmul.msk.bf16.gmra.mxu3 %vm305_vm1, %v676_v60 }
  0x51   :  { %381 = vmatmul.bf16.gmra.mxu0 %v600_v63 }
  0x52   :  { %421 = vmatmul.bf16.gmra.mxu2 %v664_v0 }
  0x5e   :  { %757 = vmatmul.msk.bf16.gmra.mxu1 %vm305_vm1, %v612_v5 }
  0x5f   :  { %766 = vmatmul.msk.bf16.gmra.mxu3 %vm305_vm1, %v684_v8 }
  0x61   :  { %386 = vmatmul.bf16.gmra.mxu0 %v608_v11 }
  0x62   :  { %426 = vmatmul.bf16.gmra.mxu2 %v672_v12 }
  0x6e   :  { %758 = vmatmul.msk.bf16.gmra.mxu1 %vm305_vm1, %v620_v17 }
  0x6f   :  { %767 = vmatmul.msk.bf16.gmra.mxu3 %vm305_vm1, %v692_v20 }
  0x71   :  { %391 = vmatmul.bf16.gmra.mxu0 %v616_v23 }
  0x72   :  { %431 = vmatmul.bf16.gmra.mxu2 %v680_v24 }
  0x7e   :  { %759 = vmatmul.msk.bf16.gmra.mxu1 %vm305_vm1, %v628_v30 }
  0x7f   :  { %768 = vmatmul.msk.bf16.gmra.mxu3 %vm305_vm1, %v700_v33 }
  0x81   :  { %396 = vmatmul.bf16.gmra.mxu0 %v624_v36 }
  0x82   :  { %436 = vmatmul.bf16.gmra.mxu2 %v688_v37 }
  0x8e   :  { %760 = vmatmul.msk.bf16.gmra.mxu1 %vm305_vm1, %v636_v40 }
  0x91   :  { %401 = vmatmul.bf16.gmra.mxu0 %v632_v45 }
  0x92   :  { %441 = vmatmul.bf16.gmra.mxu2 %v696_v46 }
  0x9b   :  { %v456_v50 = vpop.f32.mrf.mxu1 }
  0x9e   :  { %761 = vmatmul.msk.bf16.gmra.mxu1 %vm305_vm1, %v644_v49  ;;  %v367_v52 = vpop.f32.mrf.mxu0 }
  0x9f   :  { %v368_v53 = vadd.f32 %v1101_v51, %v367_v52 }
  0xa1   :  { %v457_v54 = vadd.f32 %v456_v50, %v368_v53 }
  0xa2   :  { %v501_v55 = vpop.f32.mrf.mxu3 }
  0xa3   :  { %v458_v56 = vpop.f32.mrf.mxu1  ;;  %537 = vst.msk [vmem:[%s1273_s3] sm:$0xff] %vm536_vm2, %v457_v54 }
  0xa5   :  { %v1109_v57 = vpop.f32.mrf.mxu2 }
  0xa6   :  { %v369_v58 = vpop.f32.mrf.mxu0 }
  0xa7   :  { %v370_v59 = vadd.f32 %v1101_v51, %v369_v58 }
  0xa9   :  { %v459_v60 = vadd.f32 %v458_v56, %v370_v59 }
  0xaa   :  { %v503_v61 = vpop.f32.mrf.mxu3 }
  0xab   :  { %v461_v62 = vpop.f32.mrf.mxu1  ;;  %538 = vst.msk [vmem:[%s1273_s3 + $0x8] sm:$0xff] %vm536_vm2, %v459_v60 }
  0xad   :  { %v1116_v63 = vpop.f32.mrf.mxu2 }
  0xae   :  { %v372_v0 = vpop.f32.mrf.mxu0 }
  0xaf   :  { %v373_v1 = vadd.f32 %v1101_v51, %v372_v0 }
  0xb1   :  { %v462_v2 = vadd.f32 %v461_v62, %v373_v1 }
  0xb2   :  { %v506_v3 = vpop.f32.mrf.mxu3 }
  0xb3   :  { %v463_v4 = vpop.f32.mrf.mxu1  ;;  %539 = vst.msk [vmem:[%s1273_s3 + $0x10] sm:$0xff] %vm536_vm2, %v462_v2 }
  0xb5   :  { %v412_v5 = vpop.f32.mrf.mxu2 }
  0xb6   :  { %v413_v6 = vadd.f32 %v1101_v51, %v412_v5  ;;  %v374_v7 = vpop.f32.mrf.mxu0 }
  0xb7   :  { %v375_v8 = vadd.f32 %v1101_v51, %v374_v7 }
  0xb8   :  { %v502_v9 = vadd.f32 %v501_v55, %v413_v6 }
  0xb9   :  { %v464_v10 = vadd.f32 %v463_v4, %v375_v8 }
  0xba   :  { %555 = vst.msk [vmem:[%s1273_s3 + $0x90] sm:$0xff] %vm536_vm2, %v502_v9  ;;  %v508_v12 = vpop.f32.mrf.mxu3 }
  0xbb   :  { %v466_v11 = vpop.f32.mrf.mxu1  ;;  %540 = vst.msk [vmem:[%s1273_s3 + $0x18] sm:$0xff] %vm536_vm2, %v464_v10 }
  0xbd   :  { %v414_v13 = vpop.f32.mrf.mxu2 }
  0xbe   :  { %v415_v14 = vadd.f32 %v1101_v51, %v414_v13  ;;  %v377_v15 = vpop.f32.mrf.mxu0 }
  0xbf   :  { %v378_v16 = vadd.f32 %v1101_v51, %v377_v15 }
  0xc0   :  { %v504_v17 = vadd.f32 %v503_v61, %v415_v14 }
  0xc1   :  { %v467_v18 = vadd.f32 %v466_v11, %v378_v16 }
  0xc2   :  { %556 = vst.msk [vmem:[%s1273_s3 + $0x98] sm:$0xff] %vm536_vm2, %v504_v17  ;;  %v511_v21 = vpop.f32.mrf.mxu3 }
  0xc3   :  { %v468_v19 = vpop.f32.mrf.mxu1  ;;  %541 = vst.msk [vmem:[%s1273_s3 + $0x20] sm:$0xff] %vm536_vm2, %v467_v18 }
  0xc5   :  { %v417_v20 = vpop.f32.mrf.mxu2 }
  0xc6   :  { %v418_v22 = vadd.f32 %v1101_v51, %v417_v20  ;;  %v379_v23 = vpop.f32.mrf.mxu0 }
  0xc7   :  { %v380_v24 = vadd.f32 %v1101_v51, %v379_v23 }
  0xc8   :  { %v507_v25 = vadd.f32 %v506_v3, %v418_v22 }
  0xc9   :  { %v469_v26 = vadd.f32 %v468_v19, %v380_v24 }
  0xca   :  { %557 = vst.msk [vmem:[%s1273_s3 + $0xa0] sm:$0xff] %vm536_vm2, %v507_v25  ;;  %v513_v32 = vpop.f32.mrf.mxu3 }
  0xcb   :  { %v471_v27 = vpop.f32.mrf.mxu1  ;;  %542 = vst.msk [vmem:[%s1273_s3 + $0x28] sm:$0xff] %vm536_vm2, %v469_v26 }
  0xcd   :  { %v419_v28 = vpop.f32.mrf.mxu2 }
  0xce   :  { %v420_v29 = vadd.f32 %v1101_v51, %v419_v28  ;;  %v382_v30 = vpop.f32.mrf.mxu0 }
  0xcf   :  { %v383_v31 = vadd.f32 %v1101_v51, %v382_v30 }
  0xd0   :  { %v509_v33 = vadd.f32 %v508_v12, %v420_v29 }
  0xd1   :  { %v472_v34 = vadd.f32 %v471_v27, %v383_v31 }
  0xd2   :  { %558 = vst.msk [vmem:[%s1273_s3 + $0xa8] sm:$0xff] %vm536_vm2, %v509_v33  ;;  %v516_v42 = vpop.f32.mrf.mxu3 }
  0xd3   :  { %v473_v35 = vpop.f32.mrf.mxu1  ;;  %543 = vst.msk [vmem:[%s1273_s3 + $0x30] sm:$0xff] %vm536_vm2, %v472_v34 }
  0xd5   :  { %v422_v36 = vpop.f32.mrf.mxu2 }
  0xd6   :  { %v423_v37 = vadd.f32 %v1101_v51, %v422_v36  ;;  %v384_v38 = vpop.f32.mrf.mxu0 }
  0xd7   :  { %v385_v39 = vadd.f32 %v1101_v51, %v384_v38 }
  0xd8   :  { %v512_v40 = vadd.f32 %v511_v21, %v423_v37 }
  0xd9   :  { %v474_v41 = vadd.f32 %v473_v35, %v385_v39 }
  0xda   :  { %559 = vst.msk [vmem:[%s1273_s3 + $0xb0] sm:$0xff] %vm536_vm2, %v512_v40  ;;  %v518_v52 = vpop.f32.mrf.mxu3 }
  0xdb   :  { %v476_v43 = vpop.f32.mrf.mxu1  ;;  %544 = vst.msk [vmem:[%s1273_s3 + $0x38] sm:$0xff] %vm536_vm2, %v474_v41 }
  0xdd   :  { %v424_v44 = vpop.f32.mrf.mxu2 }
  0xde   :  { %v425_v45 = vadd.f32 %v1101_v51, %v424_v44  ;;  %v387_v46 = vpop.f32.mrf.mxu0 }
  0xdf   :  { %v388_v47 = vadd.f32 %v1101_v51, %v387_v46 }
  0xe0   :  { %v514_v48 = vadd.f32 %v513_v32, %v425_v45 }
  0xe1   :  { %v477_v49 = vadd.f32 %v476_v43, %v388_v47  ;;  %v408_v43 = vadd.f32 %v1101_v51, %v1109_v57 }
  0xe2   :  { %560 = vst.msk [vmem:[%s1273_s3 + $0xb8] sm:$0xff] %vm536_vm2, %v514_v48  ;;  %v521_v62 = vpop.f32.mrf.mxu3 }
  0xe3   :  { %v478_v50 = vpop.f32.mrf.mxu1  ;;  %545 = vst.msk [vmem:[%s1273_s3 + $0x40] sm:$0xff] %vm536_vm2, %v477_v49 }
  0xe5   :  { %v427_v53 = vpop.f32.mrf.mxu2 }
  0xe6   :  { %v428_v54 = vadd.f32 %v1101_v51, %v427_v53  ;;  %v389_v55 = vpop.f32.mrf.mxu0 }
  0xe7   :  { %v390_v56 = vadd.f32 %v1101_v51, %v389_v55 }
  0xe8   :  { %v517_v58 = vadd.f32 %v516_v42, %v428_v54 }
  0xe9   :  { %v479_v59 = vadd.f32 %v478_v50, %v390_v56  ;;  %v410_v50 = vadd.f32 %v1101_v51, %v1116_v63 }
  0xea   :  { %561 = vst.msk [vmem:[%s1273_s3 + $0xc0] sm:$0xff] %vm536_vm2, %v517_v58  ;;  %v523_v10 = vpop.f32.mrf.mxu3 }
  0xeb   :  { %v481_v60 = vpop.f32.mrf.mxu1  ;;  %546 = vst.msk [vmem:[%s1273_s3 + $0x48] sm:$0xff] %vm536_vm2, %v479_v59 }
  0xed   :  { %v429_v61 = vpop.f32.mrf.mxu2 }
  0xee   :  { %v430_v0 = vadd.f32 %v1101_v51, %v429_v61  ;;  %v392_v1 = vpop.f32.mrf.mxu0 }
  0xef   :  { %v393_v2 = vadd.f32 %v1101_v51, %v392_v1 }
  0xf0   :  { %v519_v3 = vadd.f32 %v518_v52, %v430_v0 }
  0xf1   :  { %v482_v4 = vadd.f32 %v481_v60, %v393_v2 }
  0xf2   :  { %562 = vst.msk [vmem:[%s1273_s3 + $0xc8] sm:$0xff] %vm536_vm2, %v519_v3  ;;  %v526_v20 = vpop.f32.mrf.mxu3 }
  0xf3   :  { %v483_v5 = vpop.f32.mrf.mxu1  ;;  %547 = vst.msk [vmem:[%s1273_s3 + $0x50] sm:$0xff] %vm536_vm2, %v482_v4 }
  0xf5   :  { %v432_v6 = vpop.f32.mrf.mxu2 }
  0xf6   :  { %v433_v7 = vadd.f32 %v1101_v51, %v432_v6  ;;  %v394_v8 = vpop.f32.mrf.mxu0 }
  0xf7   :  { %v395_v9 = vadd.f32 %v1101_v51, %v394_v8 }
  0xf8   :  { %v522_v11 = vadd.f32 %v521_v62, %v433_v7 }
  0xf9   :  { %v484_v12 = vadd.f32 %v483_v5, %v395_v9 }
  0xfa   :  { %563 = vst.msk [vmem:[%s1273_s3 + $0xd0] sm:$0xff] %vm536_vm2, %v522_v11  ;;  %v528_v29 = vpop.f32.mrf.mxu3 }
  0xfb   :  { %v486_v13 = vpop.f32.mrf.mxu1  ;;  %548 = vst.msk [vmem:[%s1273_s3 + $0x58] sm:$0xff] %vm536_vm2, %v484_v12 }
  0xfd   :  { %v434_v14 = vpop.f32.mrf.mxu2 }
  0xfe   :  { %v435_v15 = vadd.f32 %v1101_v51, %v434_v14  ;;  %v397_v16 = vpop.f32.mrf.mxu0 }
  0xff   :  { %v398_v17 = vadd.f32 %v1101_v51, %v397_v16 }
 0x100   :  { %v524_v18 = vadd.f32 %v523_v10, %v435_v15 }
 0x101   :  { %v487_v19 = vadd.f32 %v486_v13, %v398_v17 }
 0x102   :  { %564 = vst.msk [vmem:[%s1273_s3 + $0xd8] sm:$0xff] %vm536_vm2, %v524_v18  ;;  %v531_v37 = vpop.f32.mrf.mxu3 }
 0x103   :  { %v488_v21 = vpop.f32.mrf.mxu1  ;;  %549 = vst.msk [vmem:[%s1273_s3 + $0x60] sm:$0xff] %vm536_vm2, %v487_v19 }
 0x105   :  { %v437_v22 = vpop.f32.mrf.mxu2 }
 0x106   :  { %v438_v23 = vadd.f32 %v1101_v51, %v437_v22  ;;  %v399_v24 = vpop.f32.mrf.mxu0 }
 0x107   :  { %v400_v25 = vadd.f32 %v1101_v51, %v399_v24 }
 0x108   :  { %v527_v26 = vadd.f32 %v526_v20, %v438_v23 }
 0x109   :  { %v489_v27 = vadd.f32 %v488_v21, %v400_v25 }
 0x10a   :  { %565 = vst.msk [vmem:[%s1273_s3 + $0xe0] sm:$0xff] %vm536_vm2, %v527_v26  ;;  %v533_v48 = vpop.f32.mrf.mxu3 }
 0x10b   :  { %v491_v28 = vpop.f32.mrf.mxu1  ;;  %550 = vst.msk [vmem:[%s1273_s3 + $0x68] sm:$0xff] %vm536_vm2, %v489_v27 }
 0x10d   :  { %v439_v30 = vpop.f32.mrf.mxu2 }
 0x10e   :  { %v440_v31 = vadd.f32 %v1101_v51, %v439_v30  ;;  %v402_v32 = vpop.f32.mrf.mxu0 }
 0x10f   :  { %v403_v33 = vadd.f32 %v1101_v51, %v402_v32 }
 0x110   :  { %v529_v34 = vadd.f32 %v528_v29, %v440_v31 }
 0x111   :  { %v492_v35 = vadd.f32 %v491_v28, %v403_v33 }
 0x112   :  { %566 = vst.msk [vmem:[%s1273_s3 + $0xe8] sm:$0xff] %vm536_vm2, %v529_v34 }
 0x113   :  { %v493_v36 = vpop.f32.mrf.mxu1  ;;  %551 = vst.msk [vmem:[%s1273_s3 + $0x70] sm:$0xff] %vm536_vm2, %v492_v35 }
 0x115   :  { %v442_v38 = vpop.f32.mrf.mxu2 }
 0x116   :  { %v443_v39 = vadd.f32 %v1101_v51, %v442_v38  ;;  %v404_v40 = vpop.f32.mrf.mxu0 }
 0x117   :  { %v405_v41 = vadd.f32 %v1101_v51, %v404_v40 }
 0x118   :  { %v532_v42 = vadd.f32 %v531_v37, %v443_v39 }
 0x119   :  { %v494_v44 = vadd.f32 %v493_v36, %v405_v41 }
 0x11a   :  { %567 = vst.msk [vmem:[%s1273_s3 + $0xf0] sm:$0xff] %vm536_vm2, %v532_v42 }
 0x11b   :  { %v496_v45 = vpop.f32.mrf.mxu1  ;;  %552 = vst.msk [vmem:[%s1273_s3 + $0x78] sm:$0xff] %vm536_vm2, %v494_v44 }
 0x11c   :  { %v497_v46 = vadd.f32 %v496_v45, %v408_v43 }
 0x11d   :  { %v444_v47 = vpop.f32.mrf.mxu2 }
 0x11e   :  { %553 = vst.msk [vmem:[%s1273_s3 + $0x80] sm:$0xff] %vm536_vm2, %v497_v46  ;;  %v445_v57 = vadd.f32 %v1101_v51, %v444_v47 }
 0x120   :  { %v534_v49 = vadd.f32 %v533_v48, %v445_v57 }
 0x122   :  { %568 = vst.msk [vmem:[%s1273_s3 + $0xf8] sm:$0xff] %vm536_vm2, %v534_v49 }
 0x123   :  { %v498_v52 = vpop.f32.mrf.mxu1 }
 0x124   :  { %v499_v53 = vadd.f32 %v498_v52, %v410_v50 }
 0x126   :  { %554 = vst.msk [vmem:[%s1273_s3 + $0x88] sm:$0xff] %vm536_vm2, %v499_v53 }

// kernel: seq2seq3d_forward.23
= control target key start
LH: loop header
LB: loop body
LE: loop exit
PB: predicated region body
PF: predicated region fallthrough
CT: control target
= control target key end

     0   :  { %vm43_vm0 = vcmask 1043456   ;;  %vm36_vm1 = vcmask 64512   ;;  %vm66_vm2 = vcmask 7168   ;;  %s133_s1 = inlined_call_operand.vmem [shape: bf16[8,1], index: 1, kind: input, shape index: {}]   ;;  %s134_s0 = inlined_call_operand.vmem [shape: bf16[32,8], index: 0, kind: input, shape index: {}]   ;;  %s135_s2 = inlined_call_operand.<no memory space> [shape: f32[1,1], index: 2, kind: input, shape index: {}]   ;;  %s136_s3 = inlined_call_operand.vmem [shape: f32[32,1], index: 3, kind: output, shape index: {}]  }
   0x1   :  { %v21_v0 = vld [vmem:[%s133_s1] sm:$0xf]  ;;  %v8_v1 = vstv %s135_s2  ;;  %v86_v4 = vld [vmem:[%s134_s0 + $0x8] sm:$0xff] }
   0x2   :  { %v45_v2 = vsel %vm43_vm0, %v21_v0, 0  ;;  %v85_v3 = vld [vmem:[%s134_s0] sm:$0xff]  ;;  %9 = vst [vmem:[#allocation2] sm:$0x1] %v8_v1 }
   0x3   :  { %54 = vmatpush.bf16.msra.mxu0 %v45_v2  ;;  %87 = vmatpush.bf16.msra.mxu1 %v45_v2 }
   0x6   :  { %83 = vmatmul.msk.bf16.vlgmr.msra.gmra.mxu0 %vm36_vm1, %v85_v3  ;;  %84 = vmatmul.msk.bf16.vlgmr.msra.gmra.mxu1 %vm36_vm1, %v86_v4 }
   0x9   :  { %v88_v5 = vld [vmem:[#allocation2] ss:$0 sm:$0xff] }
  0x83   :  { %v56_v6 = vpop.f32.mrf.mxu0  ;;  %v61_v7 = vpop.f32.mrf.mxu1 }
  0x84   :  { %v57_v8 = vadd.f32 %v88_v5, %v56_v6  ;;  %v62_v9 = vadd.f32 %v88_v5, %v61_v7 }
  0x86   :  { %67 = vst.msk [vmem:[%s136_s3] sm:$0xff] %vm66_vm2, %v57_v8 }
  0x87   :  { %69 = vst.msk [vmem:[%s136_s3 + $0x10] sm:$0xff] %vm66_vm2, %v62_v9 }
  0x8b   :  { %v58_v10 = vpop.f32.mrf.mxu0  ;;  %v63_v11 = vpop.f32.mrf.mxu1 }
  0x8c   :  { %v59_v12 = vadd.f32 %v88_v5, %v58_v10  ;;  %v64_v13 = vadd.f32 %v88_v5, %v63_v11 }
  0x8e   :  { %68 = vst.msk [vmem:[%s136_s3 + $0x8] sm:$0xff] %vm66_vm2, %v59_v12 }
  0x8f   :  { %70 = vst.msk [vmem:[%s136_s3 + $0x18] sm:$0xff] %vm66_vm2, %v64_v13 }

// kernel: seq2seq3d_forward.18
= control target key start
LH: loop header
LB: loop body
LE: loop exit
PB: predicated region body
PF: predicated region fallthrough
CT: control target
= control target key end

     0   :  { %vm283_vm0 = vcmask 392192   ;;  %vm366_vm1 = vcmask 7168   ;;  %s723_s1 = inlined_call_operand.vmem [shape: bf16[432,1], index: 1, kind: input, shape index: {}]   ;;  %s724_s0 = inlined_call_operand.vmem [shape: bf16[32,432], index: 0, kind: input, shape index: {}]   ;;  %s725_s2 = inlined_call_operand.<no memory space> [shape: f32[1,1], index: 2, kind: input, shape index: {}]   ;;  %s726_s3 = inlined_call_operand.vmem [shape: f32[32,1], index: 3, kind: output, shape index: {}]  }
   0x1   :  { %v532_v0 = vld [vmem:[%s723_s1 + $0x38] sm:$0xff]  ;;  %v531_v3 = vld [vmem:[%s723_s1 + $0x30] sm:$0xff]  ;;  %v530_v7 = vld [vmem:[%s723_s1 + $0x28] sm:$0xff]  ;;  %v8_v23 = vstv %s725_s2 }
   0x2   :  { %v540_v1 = vld [vmem:[%s723_s1 + $0x78] sm:$0xff]  ;;  %290 = vmatpush.bf16.msra.mxu0 %v532_v0  ;;  %v539_v4 = vld [vmem:[%s723_s1 + $0x70] sm:$0xff]  ;;  %v538_v8 = vld [vmem:[%s723_s1 + $0x68] sm:$0xff]  ;;  %9 = vst [vmem:[#allocation2] sm:$0x1] %v8_v23 }
   0x3   :  { %v548_v2 = vld [vmem:[%s723_s1 + $0xb8] sm:$0xff]  ;;  %309 = vmatpush.bf16.msra.mxu1 %v540_v1  ;;  %v547_v5 = vld [vmem:[%s723_s1 + $0xb0] sm:$0xff]  ;;  %v546_v9 = vld [vmem:[%s723_s1 + $0xa8] sm:$0xff] }
   0x4   :  { %328 = vmatpush.bf16.msra.mxu2 %v548_v2  ;;  %v551_v6 = vld [vmem:[%s723_s1 + $0xd0] sm:$0xff]  ;;  %v550_v10 = vld [vmem:[%s723_s1 + $0xc8] sm:$0xff]  ;;  %v529_v11 = vld [vmem:[%s723_s1 + $0x20] sm:$0xff] }
   0x5   :  { %352 = vmatpush.bf16.msra.mxu3 %v551_v6  ;;  %v537_v12 = vld [vmem:[%s723_s1 + $0x60] sm:$0xff]  ;;  %v518_v15 = vld [vmem:[%s724_s0 + $0xc] sm:$0xf]  ;;  %v387_v16 = vld [vmem:[%s724_s0 + $0x18] sm:$0xf0] }
   0x6   :  { %291 = vmatpush.bf16.msra.mxu0 %v531_v3  ;;  %v545_v13 = vld [vmem:[%s723_s1 + $0xa0] sm:$0xff]  ;;  %v528_v17 = vld [vmem:[%s723_s1 + $0x18] sm:$0xff]  ;;  %v390_v20 = vor.u32 %v518_v15, %v387_v16  ;;  %v527_v21 = vld [vmem:[%s723_s1 + $0x10] sm:$0xff] }
   0x7   :  { %310 = vmatpush.bf16.msra.mxu1 %v539_v4  ;;  %v549_v14 = vld [vmem:[%s723_s1 + $0xc0] sm:$0xff]  ;;  %v536_v18 = vld [vmem:[%s723_s1 + $0x58] sm:$0xff]  ;;  %v535_v22 = vld [vmem:[%s723_s1 + $0x50] sm:$0xff] }
   0x8   :  { %329 = vmatpush.bf16.msra.mxu2 %v547_v5  ;;  %v544_v19 = vld [vmem:[%s723_s1 + $0x98] sm:$0xff]  ;;  %v543_v24 = vld [vmem:[%s723_s1 + $0x90] sm:$0xff]  ;;  %v526_v25 = vld [vmem:[%s723_s1 + $0x8] sm:$0xff] }
   0x9   :  { %353 = vmatpush.bf16.msra.mxu3 %v550_v10  ;;  %v534_v26 = vld [vmem:[%s723_s1 + $0x48] sm:$0xff]  ;;  %v525_v28 = vld [vmem:[%s723_s1] sm:$0xff]  ;;  %v519_v31 = vld [vmem:[%s724_s0 + $0xc] sm:$0xf0] }
   0xa   :  { %292 = vmatpush.bf16.msra.mxu0 %v530_v7  ;;  %v542_v27 = vld [vmem:[%s723_s1 + $0x88] sm:$0xff]  ;;  %v533_v29 = vld [vmem:[%s723_s1 + $0x40] sm:$0xff]  ;;  %v379_v33 = vld [vmem:[%s724_s0 + $0x10] sm:$0xf0] }
   0xb   :  { %311 = vmatpush.bf16.msra.mxu1 %v538_v8  ;;  %v377_v30 = vld [vmem:[%s724_s0] sm:$0xf]  ;;  %v517_v32 = vld [vmem:[%s724_s0 + $0x4] sm:$0xf]  ;;  %v385_v35 = vld [vmem:[%s724_s0 + $0x8] sm:$0xf] }
   0xc   :  { %330 = vmatpush.bf16.msra.mxu2 %v546_v9  ;;  %v541_v34 = vld [vmem:[%s723_s1 + $0x80] sm:$0xff]  ;;  %v520_v36 = vld [vmem:[%s724_s0 + $0x14] sm:$0xf0]  ;;  %v522_v37 = vld [vmem:[%s724_s0 + $0x2c] sm:$0xf]  ;;  %v378_v39 = vor.u32 %v519_v31, %v377_v30  ;;  %v382_v40 = vor.u32 %v517_v32, %v379_v33 }
   0xd   :  { %354 = vmatpush.bf16.msra.mxu3 %v549_v14  ;;  %v403_v38 = vld [vmem:[%s724_s0 + $0x38] sm:$0xf0]  ;;  %v386_v41 = vor.u32 %v520_v36, %v385_v35  ;;  %v393_v43 = vld [vmem:[%s724_s0 + $0x20] sm:$0xf]  ;;  %v523_v44 = vld [vmem:[%s724_s0 + $0x2c] sm:$0xf0] }
   0xe   :  { %293 = vmatpush.bf16.msra.mxu0 %v529_v11  ;;  %v406_v42 = vor.u32 %v522_v37, %v403_v38  ;;  %v521_v45 = vld [vmem:[%s724_s0 + $0x24] sm:$0xf]  ;;  %v395_v46 = vld [vmem:[%s724_s0 + $0x30] sm:$0xf0]  ;;  %v401_v47 = vld [vmem:[%s724_s0 + $0x28] sm:$0xf]  ;;  %v394_v49 = vor.u32 %v523_v44, %v393_v43 }
   0xf   :  { %312 = vmatpush.bf16.msra.mxu1 %v537_v12  ;;  %v524_v48 = vld [vmem:[%s724_s0 + $0x34] sm:$0xf0]  ;;  %v398_v50 = vor.u32 %v521_v45, %v395_v46  ;;  %v552_v52 = vld [vmem:[#allocation2] ss:$0 sm:$0xff] }
  0x10   :  { %331 = vmatpush.bf16.msra.mxu2 %v545_v13  ;;  %515 = vmatmul.msk.bf16.vlgmr.msra.gmra.mxu3 %vm283_vm0, %v390_v20  ;;  %v402_v51 = vor.u32 %v524_v48, %v401_v47 }
  0x12   :  { %294 = vmatpush.bf16.msra.mxu0 %v528_v17 }
  0x13   :  { %313 = vmatpush.bf16.msra.mxu1 %v536_v18 }
  0x14   :  { %332 = vmatpush.bf16.msra.mxu2 %v544_v19 }
  0x16   :  { %295 = vmatpush.bf16.msra.mxu0 %v527_v21 }
  0x17   :  { %314 = vmatpush.bf16.msra.mxu1 %v535_v22 }
  0x18   :  { %333 = vmatpush.bf16.msra.mxu2 %v543_v24 }
  0x1a   :  { %296 = vmatpush.bf16.msra.mxu0 %v526_v25 }
  0x1b   :  { %315 = vmatpush.bf16.msra.mxu1 %v534_v26 }
  0x1c   :  { %334 = vmatpush.bf16.msra.mxu2 %v542_v27 }
  0x1e   :  { %297 = vmatpush.bf16.msra.mxu0 %v525_v28 }
  0x1f   :  { %316 = vmatpush.bf16.msra.mxu1 %v533_v29 }
  0x20   :  { %335 = vmatpush.bf16.msra.mxu2 %v541_v34  ;;  %516 = vmatmul.msk.bf16.gmra.mxu3 %vm283_vm0, %v406_v42 }
  0x21   :  { %298 = vmatmul.bf16.vlgmr.msra.gmra.mxu0 %v378_v39 }
  0x22   :  { %317 = vmatmul.bf16.vlgmr.msra.gmra.mxu1 %v382_v40 }
  0x23   :  { %336 = vmatmul.bf16.vlgmr.msra.gmra.mxu2 %v386_v41 }
  0x31   :  { %303 = vmatmul.bf16.gmra.mxu0 %v394_v49 }
  0x32   :  { %322 = vmatmul.bf16.gmra.mxu1 %v398_v50 }
  0x33   :  { %341 = vmatmul.bf16.gmra.mxu2 %v402_v51 }
  0x93   :  { %v356_v56 = vpop.f32.mrf.mxu3 }
  0x9b   :  { %v358_v0 = vpop.f32.mrf.mxu3 }
  0x9e   :  { %v299_v53 = vpop.f32.mrf.mxu0 }
  0x9f   :  { %v318_v54 = vpop.f32.mrf.mxu1  ;;  %v300_v55 = vadd.f32 %v552_v52, %v299_v53 }
  0xa1   :  { %v319_v57 = vadd.f32 %v318_v54, %v300_v55 }
  0xa3   :  { %v361_v9 = vpop.f32.mrf.mxu3 }
  0xa6   :  { %v337_v58 = vpop.f32.mrf.mxu2  ;;  %v301_v60 = vpop.f32.mrf.mxu0 }
  0xa7   :  { %v338_v59 = vadd.f32 %v337_v58, %v319_v57  ;;  %v320_v61 = vpop.f32.mrf.mxu1  ;;  %v302_v63 = vadd.f32 %v552_v52, %v301_v60 }
  0xa9   :  { %v357_v62 = vadd.f32 %v356_v56, %v338_v59  ;;  %v321_v1 = vadd.f32 %v320_v61, %v302_v63 }
  0xab   :  { %367 = vst.msk [vmem:[%s726_s3] sm:$0xff] %vm366_vm1, %v357_v62  ;;  %v363_v19 = vpop.f32.mrf.mxu3 }
  0xae   :  { %v339_v2 = vpop.f32.mrf.mxu2  ;;  %v304_v4 = vpop.f32.mrf.mxu0 }
  0xaf   :  { %v340_v3 = vadd.f32 %v339_v2, %v321_v1  ;;  %v305_v5 = vadd.f32 %v552_v52, %v304_v4  ;;  %v323_v7 = vpop.f32.mrf.mxu1 }
  0xb1   :  { %v359_v6 = vadd.f32 %v358_v0, %v340_v3  ;;  %v324_v8 = vadd.f32 %v323_v7, %v305_v5 }
  0xb3   :  { %368 = vst.msk [vmem:[%s726_s3 + $0x8] sm:$0xff] %vm366_vm1, %v359_v6 }
  0xb6   :  { %v342_v10 = vpop.f32.mrf.mxu2  ;;  %v306_v12 = vpop.f32.mrf.mxu0 }
  0xb7   :  { %v343_v11 = vadd.f32 %v342_v10, %v324_v8  ;;  %v307_v14 = vadd.f32 %v552_v52, %v306_v12  ;;  %v325_v15 = vpop.f32.mrf.mxu1 }
  0xb9   :  { %v362_v13 = vadd.f32 %v361_v9, %v343_v11  ;;  %v326_v16 = vadd.f32 %v325_v15, %v307_v14 }
  0xbb   :  { %369 = vst.msk [vmem:[%s726_s3 + $0x10] sm:$0xff] %vm366_vm1, %v362_v13 }
  0xbe   :  { %v344_v17 = vpop.f32.mrf.mxu2 }
  0xbf   :  { %v345_v18 = vadd.f32 %v344_v17, %v326_v16 }
  0xc1   :  { %v364_v20 = vadd.f32 %v363_v19, %v345_v18 }
  0xc3   :  { %370 = vst.msk [vmem:[%s726_s3 + $0x18] sm:$0xff] %vm366_vm1, %v364_v20 }

</bundles_post_ra>
